<compile_context>
chip_gen: v5e
topology: v5e:2x2
jax: 0.10.0
libtpu: 0.0.40
codegen_flags: <defaults>
</compile_context>

<pallas_src>
import functools

import jax
import jax.numpy as jnp
from jax.experimental import pallas as pl
from jax.experimental.pallas import tpu as pltpu

EPS = 1e-5   # nn.BatchNorm default
K = 5        # Conv3d kernel size


def _vmem_limit_bytes():
    """Per-generation scoped-VMEM limit: ~half of physical, clamped 32..96 MiB."""
    try:
        cap = pltpu.get_tpu_info().vmem_capacity_bytes
    except Exception:                      # conservative fallback (v7x-safe)
        cap = 64 * 1024 * 1024
    return int(min(96 * 1024 * 1024, max(32 * 1024 * 1024, cap // 2)))


def _conv_stats_kernel(w_ref, mask_ref, x0, x1, x2, x3, x4,
                       conv_ref, stats_ref, *, cout, cin, Wp, Lout):
    """Pass 1: conv of one output depth plane + per-plane BN statistics.

    x0..x4 are the 5 padded depth planes (C_in, Hp*Wp) this output plane needs.
    Each of the 125 taps is a contiguous lane slice of a flattened plane; the
    columns j with (j % Wp) >= W are "wrap" garbage, excluded from the stats
    via `mask` and stripped in pass 2.
    """
    planes = (x0[0, 0], x1[0, 0], x2[0, 0], x3[0, 0], x4[0, 0])   # (cin, Lp) each
    w = w_ref[...]                                                # (cout, 125*cin)
    acc = jnp.zeros((cout, Lout), dtype=jnp.float32)
    t = 0
    for kd in range(K):
        plane = planes[kd]
        for kh in range(K):
            for kw in range(K):
                off = kh * Wp + kw
                xs = plane[:, off:off + Lout]                     # (cin, Lout)
                wt = w[:, t * cin:(t + 1) * cin]                  # (cout, cin)
                acc = acc + jnp.dot(wt, xs,
                                    preferred_element_type=jnp.float32)
                t += 1
    m = mask_ref[...]                                             # (1, Lout)
    s = jnp.sum(acc * m, axis=1, keepdims=True)                   # (cout, 1)
    q = jnp.sum(acc * acc * m, axis=1, keepdims=True)             # (cout, 1)
    stats_ref[0, 0] = jnp.concatenate([s, q], axis=1)             # (cout, 2)
    conv_ref[0, 0] = acc.astype(conv_ref.dtype)


def _bn_elu_kernel(conv_ref, a_ref, b_ref, o_ref, *, H, W, Wp):
    """Pass 2: folded BN affine (single FMA) + ELU, written straight to NCDHW."""
    y = conv_ref[0, 0].astype(jnp.float32) * a_ref[...] + b_ref[...]   # (C, Lout)
    # TODO(synk): PyTorch ELU uses expm1 (more accurate near 0); keep exp(y)-1
    # for a guaranteed Mosaic lowering (abs diff ~1e-7).
    y = jnp.where(y > 0.0, y, jnp.exp(y) - 1.0).astype(o_ref.dtype)
    # Strip the (Wp - W) wrap-garbage columns of each output row.  The block
    # placement (index_map) already does the D<->C layout swap for free.
    for h in range(H):
        o_ref[0, :, 0, h, :] = y[:, h * Wp:h * Wp + W]


def luconv_forward(x_ncdhw, conv_w, conv_b, gamma, beta, *,
                   mxu_dtype=jnp.float32):
    """LUConv forward: Conv3d(k=5, pad=2) -> ContBatchNorm3d -> ELU.

    mxu_dtype=jnp.bfloat16 halves the dominant HBM streams (padded-input reads
    and the conv intermediate); recommended on v5e/v7x.  Stats/BN/ELU stay f32.
    """
    del conv_b  # cancels exactly against the batch-mean subtraction in BN
    N, C, D, H, W = x_ncdhw.shape
    assert conv_w.shape[0] == C and conv_w.shape[1] == C
    Dp, Hp, Wp = D + 4, H + 4, W + 4
    Lp = Hp * Wp                      # flattened padded plane length
    Lout = (H - 1) * Wp + W           # flattened (padded-width) output length
    M = N * D * H * W                 # true element count per channel
    Kdim = K * K * K * C

    f32 = jnp.dtype(mxu_dtype) == jnp.dtype(jnp.float32)
    interm_dtype = jnp.float32 if f32 else jnp.bfloat16

    # ---- glue: NCDHW -> padded (N, Dp, C, Hp*Wp) planes (input-sized copies only) ----
    xq = jnp.transpose(x_ncdhw, (0, 2, 1, 3, 4)).astype(jnp.float32)  # (N,D,C,H,W)
    xp = jnp.pad(xq, ((0, 0), (2, 2), (0, 0), (2, 2), (2, 2)))         # (N,Dp,C,Hp,Wp)
    xp = xp.reshape(N, Dp, C, Lp).astype(mxu_dtype)

    # PyTorch conv weight (Cout, Cin, kd, kh, kw) -> (Cout, 125*Cin), tap-major then cin
    w2 = jnp.transpose(conv_w, (0, 2, 3, 4, 1)).reshape(C, Kdim).astype(mxu_dtype)

    # valid-column mask over the flattened output row: j is valid iff (j % Wp) < W
    mask = ((jnp.arange(Lout) % Wp) < W).astype(jnp.float32).reshape(1, Lout)

    cparams = pltpu.CompilerParams(
        dimension_semantics=("parallel", "parallel"),
        vmem_limit_bytes=_vmem_limit_bytes())

    def _plane_index_map(kd):
        def imap(n, d):
            return (n, d + kd, 0, 0)   # block size 1 along Dp => element index
        return imap

    # ---- pass 1: per-(n, d) conv plane + merged per-plane stats ----
    kern1 = functools.partial(_conv_stats_kernel, cout=C, cin=C, Wp=Wp, Lout=Lout)
    conv_t, stats = pl.pallas_call(
        kern1,
        grid=(N, D),
        in_specs=[pl.BlockSpec((C, Kdim), lambda n, d: (0, 0)),      # weights, resident
                  pl.BlockSpec((1, Lout), lambda n, d: (0, 0))]      # column mask
                 + [pl.BlockSpec((1, 1, C, Lp), _plane_index_map(kd))
                    for kd in range(K)],                             # 5 depth taps
        out_specs=(pl.BlockSpec((1, 1, C, Lout), lambda n, d: (n, d, 0, 0)),
                   pl.BlockSpec((1, 1, C, 2), lambda n, d: (n, d, 0, 0))),
        out_shape=(jax.ShapeDtypeStruct((N, D, C, Lout), interm_dtype),
                   jax.ShapeDtypeStruct((N, D, C, 2), jnp.float32)),
        compiler_params=cparams,
    )(w2, mask, xp, xp, xp, xp, xp)

    # ---- glue: fold batch stats + gamma/beta into one per-channel scale/shift ----
    # TODO(synk): var = E[x^2]-E[x]^2 can cancel badly if activations are far
    # from zero-mean; switch to a shifted two-pass accumulation if needed.
    csum = jnp.sum(stats, axis=(0, 1))                 # (C, 2)
    mean = csum[:, 0] / M
    var = csum[:, 1] / M - mean * mean                 # biased variance (training=True)
    a = gamma.astype(jnp.float32) * jax.lax.rsqrt(var + EPS)
    b = beta.astype(jnp.float32) - mean * a

    # ---- pass 2: (conv * a + b) + ELU, written directly into NCDHW ----
    kern2 = functools.partial(_bn_elu_kernel, H=H, W=W, Wp=Wp)
    out = pl.pallas_call(
        kern2,
        grid=(N, D),
        in_specs=[pl.BlockSpec((1, 1, C, Lout), lambda n, d: (n, d, 0, 0)),
                  pl.BlockSpec((C, 1), lambda n, d: (0, 0)),
                  pl.BlockSpec((C, 1), lambda n, d: (0, 0))],
        out_specs=pl.BlockSpec((1, C, 1, H, W), lambda n, d: (n, 0, d, 0, 0)),
        out_shape=jax.ShapeDtypeStruct((N, C, D, H, W), jnp.float32),
        compiler_params=cparams,
    )(conv_t, a.reshape(C, 1), b.reshape(C, 1))
    return out


def luconv_reference(x_ncdhw, conv_w, conv_b, gamma, beta):
    """Pure-JAX reference mirroring the PyTorch module."""
    conv = jax.lax.conv_general_dilated(
        x_ncdhw.astype(jnp.float32), conv_w.astype(jnp.float32),
        window_strides=(1, 1, 1), padding=((2, 2), (2, 2), (2, 2)),
        dimension_numbers=("NCDHW", "OIDHW", "NCDHW"))
    conv = conv + conv_b.reshape(1, -1, 1, 1, 1)
    mean = jnp.mean(conv, axis=(0, 2, 3, 4), keepdims=True)
    var = jnp.mean((conv - mean) ** 2, axis=(0, 2, 3, 4), keepdims=True)
    xhat = (conv - mean) * jax.lax.rsqrt(var + EPS)
    y = xhat * gamma.reshape(1, -1, 1, 1, 1) + beta.reshape(1, -1, 1, 1, 1)
    return jnp.where(y > 0, y, jnp.expm1(y))


if __name__ == "__main__":
    # Small deterministic shapes: N=2, C=4, D=H=W=8 (ELUCons with elu=True -> ELU)
    N, C, D, H, W = 2, 4, 8, 8, 8
    key = jax.random.PRNGKey(0)
    kx, kw, kb = jax.random.split(key, 3)

    x = jax.random.normal(kx, (N, C, D, H, W), dtype=jnp.float32)
    conv_w = jax.random.normal(kw, (C, C, 5, 5, 5), dtype=jnp.float32) * 0.05
    conv_b = jax.random.normal(kb, (C,), dtype=jnp.float32) * 0.05
    gamma = jnp.ones((C,), dtype=jnp.float32)   # BatchNorm default init
    beta = jnp.zeros((C,), dtype=jnp.float32)

    ref = luconv_reference(x, conv_w, conv_b, gamma, beta)

    # float32 MXU path: must match the f32 reference tightly.
    fwd = jax.jit(luconv_forward)
    out = jax.block_until_ready(fwd(x, conv_w, conv_b, gamma, beta))
    assert out.shape == (N, C, D, H, W)
    assert jnp.allclose(out, ref, atol=1e-4, rtol=1e-4), (
        float(jnp.max(jnp.abs(out - ref))))

    # bfloat16 path (recommended on v5e/v7x): conv inputs and the conv
    # intermediate are bf16; stats / BN folding / ELU stay float32.
    fwd_bf16 = jax.jit(functools.partial(luconv_forward, mxu_dtype=jnp.bfloat16))
    out_bf16 = jax.block_until_ready(fwd_bf16(x, conv_w, conv_b, gamma, beta))
    assert jnp.allclose(out_bf16, ref, atol=5e-2, rtol=5e-2), (
        float(jnp.max(jnp.abs(out_bf16 - ref))))

    print("KERNEL_OK")
</pallas_src>

<mosaic_0001>
module attributes {stable_mosaic.version = 11 : i64} {
  func.func @_conv_stats_kernel(%arg0: i32, %arg1: i32, %arg2: memref<4x500xf32, #tpu.memory_space<vmem>>, %arg3: memref<1x92xf32, #tpu.memory_space<vmem>>, %arg4: memref<1x1x4x144xf32, #tpu.memory_space<vmem>>, %arg5: memref<1x1x4x144xf32, #tpu.memory_space<vmem>>, %arg6: memref<1x1x4x144xf32, #tpu.memory_space<vmem>>, %arg7: memref<1x1x4x144xf32, #tpu.memory_space<vmem>>, %arg8: memref<1x1x4x144xf32, #tpu.memory_space<vmem>>, %arg9: memref<1x1x4x92xf32, #tpu.memory_space<vmem>>, %arg10: memref<1x1x4x2xf32, #tpu.memory_space<vmem>>) attributes {dimension_semantics = [#tpu.dimension_semantics<parallel>, #tpu.dimension_semantics<parallel>], iteration_bounds = array<i64: 2, 8>, scalar_prefetch = 0 : i64, scratch_operands = 0 : i64, tpu.core_type = #tpu.core_type<tc>, window_params = [{pipeline_mode = #tpu.pipeline_mode<synchronous>, transform_indices = @transform_0, window_bounds = array<i64: 4, 500>}, {pipeline_mode = #tpu.pipeline_mode<synchronous>, transform_indices = @transform_1, window_bounds = array<i64: 1, 92>}, {transform_indices = @transform_2, window_bounds = array<i64: 1, 1, 4, 144>}, {transform_indices = @transform_3, window_bounds = array<i64: 1, 1, 4, 144>}, {transform_indices = @transform_4, window_bounds = array<i64: 1, 1, 4, 144>}, {transform_indices = @transform_5, window_bounds = array<i64: 1, 1, 4, 144>}, {transform_indices = @transform_6, window_bounds = array<i64: 1, 1, 4, 144>}, {transform_indices = @transform_7, window_bounds = array<i64: 1, 1, 4, 92>}, {transform_indices = @transform_8, window_bounds = array<i64: 1, 1, 4, 2>}]} {
    %c0 = arith.constant 0 : index
    %c0_0 = arith.constant 0 : index
    %c0_1 = arith.constant 0 : index
    %c0_2 = arith.constant 0 : index
    %0 = vector.load %arg4[%c0, %c0_0, %c0_1, %c0_2] : memref<1x1x4x144xf32, #tpu.memory_space<vmem>>, vector<1x1x4x144xf32>
    %1 = vector.shape_cast %0 : vector<1x1x4x144xf32> to vector<4x144xf32>
    %c0_3 = arith.constant 0 : index
    %c0_4 = arith.constant 0 : index
    %c0_5 = arith.constant 0 : index
    %c0_6 = arith.constant 0 : index
    %2 = vector.load %arg5[%c0_3, %c0_4, %c0_5, %c0_6] : memref<1x1x4x144xf32, #tpu.memory_space<vmem>>, vector<1x1x4x144xf32>
    %3 = vector.shape_cast %2 : vector<1x1x4x144xf32> to vector<4x144xf32>
    %c0_7 = arith.constant 0 : index
    %c0_8 = arith.constant 0 : index
    %c0_9 = arith.constant 0 : index
    %c0_10 = arith.constant 0 : index
    %4 = vector.load %arg6[%c0_7, %c0_8, %c0_9, %c0_10] : memref<1x1x4x144xf32, #tpu.memory_space<vmem>>, vector<1x1x4x144xf32>
    %5 = vector.shape_cast %4 : vector<1x1x4x144xf32> to vector<4x144xf32>
    %c0_11 = arith.constant 0 : index
    %c0_12 = arith.constant 0 : index
    %c0_13 = arith.constant 0 : index
    %c0_14 = arith.constant 0 : index
    %6 = vector.load %arg7[%c0_11, %c0_12, %c0_13, %c0_14] : memref<1x1x4x144xf32, #tpu.memory_space<vmem>>, vector<1x1x4x144xf32>
    %7 = vector.shape_cast %6 : vector<1x1x4x144xf32> to vector<4x144xf32>
    %c0_15 = arith.constant 0 : index
    %c0_16 = arith.constant 0 : index
    %c0_17 = arith.constant 0 : index
    %c0_18 = arith.constant 0 : index
    %8 = vector.load %arg8[%c0_15, %c0_16, %c0_17, %c0_18] : memref<1x1x4x144xf32, #tpu.memory_space<vmem>>, vector<1x1x4x144xf32>
    %9 = vector.shape_cast %8 : vector<1x1x4x144xf32> to vector<4x144xf32>
    %c0_19 = arith.constant 0 : index
    %c0_20 = arith.constant 0 : index
    %10 = vector.load %arg2[%c0_19, %c0_20] : memref<4x500xf32, #tpu.memory_space<vmem>>, vector<4x500xf32>
    %cst = arith.constant 0.000000e+00 : f32
    %11 = vector.broadcast %cst : f32 to vector<4x92xf32>
    %12 = vector.extract_strided_slice %1 {offsets = [0, 0], sizes = [4, 92], strides = [1, 1]} : vector<4x144xf32> to vector<4x92xf32>
    %13 = vector.extract_strided_slice %10 {offsets = [0, 0], sizes = [4, 4], strides = [1, 1]} : vector<4x500xf32> to vector<4x4xf32>
    %cst_21 = arith.constant dense<0.000000e+00> : vector<4x92xf32>
    %14 = tpu.matmul %13, %12, %cst_21 {dimension_numbers = #tpu.dot_dimension_numbers<[1], [0], [0], [1], [0, 0, 1, 1], [], []>} : vector<4x4xf32>, vector<4x92xf32>, vector<4x92xf32> -> vector<4x92xf32>
    %15 = arith.addf %11, %14 : vector<4x92xf32>
    %16 = vector.extract_strided_slice %1 {offsets = [0, 1], sizes = [4, 92], strides = [1, 1]} : vector<4x144xf32> to vector<4x92xf32>
    %17 = vector.extract_strided_slice %10 {offsets = [0, 4], sizes = [4, 4], strides = [1, 1]} : vector<4x500xf32> to vector<4x4xf32>
    %cst_22 = arith.constant dense<0.000000e+00> : vector<4x92xf32>
    %18 = tpu.matmul %17, %16, %cst_22 {dimension_numbers = #tpu.dot_dimension_numbers<[1], [0], [0], [1], [0, 0, 1, 1], [], []>} : vector<4x4xf32>, vector<4x92xf32>, vector<4x92xf32> -> vector<4x92xf32>
    %19 = arith.addf %15, %18 : vector<4x92xf32>
    %20 = vector.extract_strided_slice %1 {offsets = [0, 2], sizes = [4, 92], strides = [1, 1]} : vector<4x144xf32> to vector<4x92xf32>
    %21 = vector.extract_strided_slice %10 {offsets = [0, 8], sizes = [4, 4], strides = [1, 1]} : vector<4x500xf32> to vector<4x4xf32>
    %cst_23 = arith.constant dense<0.000000e+00> : vector<4x92xf32>
    %22 = tpu.matmul %21, %20, %cst_23 {dimension_numbers = #tpu.dot_dimension_numbers<[1], [0], [0], [1], [0, 0, 1, 1], [], []>} : vector<4x4xf32>, vector<4x92xf32>, vector<4x92xf32> -> vector<4x92xf32>
    %23 = arith.addf %19, %22 : vector<4x92xf32>
    %24 = vector.extract_strided_slice %1 {offsets = [0, 3], sizes = [4, 92], strides = [1, 1]} : vector<4x144xf32> to vector<4x92xf32>
    %25 = vector.extract_strided_slice %10 {offsets = [0, 12], sizes = [4, 4], strides = [1, 1]} : vector<4x500xf32> to vector<4x4xf32>
    %cst_24 = arith.constant dense<0.000000e+00> : vector<4x92xf32>
    %26 = tpu.matmul %25, %24, %cst_24 {dimension_numbers = #tpu.dot_dimension_numbers<[1], [0], [0], [1], [0, 0, 1, 1], [], []>} : vector<4x4xf32>, vector<4x92xf32>, vector<4x92xf32> -> vector<4x92xf32>
    %27 = arith.addf %23, %26 : vector<4x92xf32>
    %28 = vector.extract_strided_slice %1 {offsets = [0, 4], sizes = [4, 92], strides = [1, 1]} : vector<4x144xf32> to vector<4x92xf32>
    %29 = vector.extract_strided_slice %10 {offsets = [0, 16], sizes = [4, 4], strides = [1, 1]} : vector<4x500xf32> to vector<4x4xf32>
    %cst_25 = arith.constant dense<0.000000e+00> : vector<4x92xf32>
    %30 = tpu.matmul %29, %28, %cst_25 {dimension_numbers = #tpu.dot_dimension_numbers<[1], [0], [0], [1], [0, 0, 1, 1], [], []>} : vector<4x4xf32>, vector<4x92xf32>, vector<4x92xf32> -> vector<4x92xf32>
    %31 = arith.addf %27, %30 : vector<4x92xf32>
    %32 = vector.extract_strided_slice %1 {offsets = [0, 12], sizes = [4, 92], strides = [1, 1]} : vector<4x144xf32> to vector<4x92xf32>
    %33 = vector.extract_strided_slice %10 {offsets = [0, 20], sizes = [4, 4], strides = [1, 1]} : vector<4x500xf32> to vector<4x4xf32>
    %cst_26 = arith.constant dense<0.000000e+00> : vector<4x92xf32>
    %34 = tpu.matmul %33, %32, %cst_26 {dimension_numbers = #tpu.dot_dimension_numbers<[1], [0], [0], [1], [0, 0, 1, 1], [], []>} : vector<4x4xf32>, vector<4x92xf32>, vector<4x92xf32> -> vector<4x92xf32>
    %35 = arith.addf %31, %34 : vector<4x92xf32>
    %36 = vector.extract_strided_slice %1 {offsets = [0, 13], sizes = [4, 92], strides = [1, 1]} : vector<4x144xf32> to vector<4x92xf32>
    %37 = vector.extract_strided_slice %10 {offsets = [0, 24], sizes = [4, 4], strides = [1, 1]} : vector<4x500xf32> to vector<4x4xf32>
    %cst_27 = arith.constant dense<0.000000e+00> : vector<4x92xf32>
    %38 = tpu.matmul %37, %36, %cst_27 {dimension_numbers = #tpu.dot_dimension_numbers<[1], [0], [0], [1], [0, 0, 1, 1], [], []>} : vector<4x4xf32>, vector<4x92xf32>, vector<4x92xf32> -> vector<4x92xf32>
    %39 = arith.addf %35, %38 : vector<4x92xf32>
    %40 = vector.extract_strided_slice %1 {offsets = [0, 14], sizes = [4, 92], strides = [1, 1]} : vector<4x144xf32> to vector<4x92xf32>
    %41 = vector.extract_strided_slice %10 {offsets = [0, 28], sizes = [4, 4], strides = [1, 1]} : vector<4x500xf32> to vector<4x4xf32>
    %cst_28 = arith.constant dense<0.000000e+00> : vector<4x92xf32>
    %42 = tpu.matmul %41, %40, %cst_28 {dimension_numbers = #tpu.dot_dimension_numbers<[1], [0], [0], [1], [0, 0, 1, 1], [], []>} : vector<4x4xf32>, vector<4x92xf32>, vector<4x92xf32> -> vector<4x92xf32>
    %43 = arith.addf %39, %42 : vector<4x92xf32>
    %44 = vector.extract_strided_slice %1 {offsets = [0, 15], sizes = [4, 92], strides = [1, 1]} : vector<4x144xf32> to vector<4x92xf32>
    %45 = vector.extract_strided_slice %10 {offsets = [0, 32], sizes = [4, 4], strides = [1, 1]} : vector<4x500xf32> to vector<4x4xf32>
    %cst_29 = arith.constant dense<0.000000e+00> : vector<4x92xf32>
    %46 = tpu.matmul %45, %44, %cst_29 {dimension_numbers = #tpu.dot_dimension_numbers<[1], [0], [0], [1], [0, 0, 1, 1], [], []>} : vector<4x4xf32>, vector<4x92xf32>, vector<4x92xf32> -> vector<4x92xf32>
    %47 = arith.addf %43, %46 : vector<4x92xf32>
    %48 = vector.extract_strided_slice %1 {offsets = [0, 16], sizes = [4, 92], strides = [1, 1]} : vector<4x144xf32> to vector<4x92xf32>
    %49 = vector.extract_strided_slice %10 {offsets = [0, 36], sizes = [4, 4], strides = [1, 1]} : vector<4x500xf32> to vector<4x4xf32>
    %cst_30 = arith.constant dense<0.000000e+00> : vector<4x92xf32>
    %50 = tpu.matmul %49, %48, %cst_30 {dimension_numbers = #tpu.dot_dimension_numbers<[1], [0], [0], [1], [0, 0, 1, 1], [], []>} : vector<4x4xf32>, vector<4x92xf32>, vector<4x92xf32> -> vector<4x92xf32>
    %51 = arith.addf %47, %50 : vector<4x92xf32>
    %52 = vector.extract_strided_slice %1 {offsets = [0, 24], sizes = [4, 92], strides = [1, 1]} : vector<4x144xf32> to vector<4x92xf32>
    %53 = vector.extract_strided_slice %10 {offsets = [0, 40], sizes = [4, 4], strides = [1, 1]} : vector<4x500xf32> to vector<4x4xf32>
    %cst_31 = arith.constant dense<0.000000e+00> : vector<4x92xf32>
    %54 = tpu.matmul %53, %52, %cst_31 {dimension_numbers = #tpu.dot_dimension_numbers<[1], [0], [0], [1], [0, 0, 1, 1], [], []>} : vector<4x4xf32>, vector<4x92xf32>, vector<4x92xf32> -> vector<4x92xf32>
    %55 = arith.addf %51, %54 : vector<4x92xf32>
    %56 = vector.extract_strided_slice %1 {offsets = [0, 25], sizes = [4, 92], strides = [1, 1]} : vector<4x144xf32> to vector<4x92xf32>
    %57 = vector.extract_strided_slice %10 {offsets = [0, 44], sizes = [4, 4], strides = [1, 1]} : vector<4x500xf32> to vector<4x4xf32>
    %cst_32 = arith.constant dense<0.000000e+00> : vector<4x92xf32>
    %58 = tpu.matmul %57, %56, %cst_32 {dimension_numbers = #tpu.dot_dimension_numbers<[1], [0], [0], [1], [0, 0, 1, 1], [], []>} : vector<4x4xf32>, vector<4x92xf32>, vector<4x92xf32> -> vector<4x92xf32>
    %59 = arith.addf %55, %58 : vector<4x92xf32>
    %60 = vector.extract_strided_slice %1 {offsets = [0, 26], sizes = [4, 92], strides = [1, 1]} : vector<4x144xf32> to vector<4x92xf32>
    %61 = vector.extract_strided_slice %10 {offsets = [0, 48], sizes = [4, 4], strides = [1, 1]} : vector<4x500xf32> to vector<4x4xf32>
    %cst_33 = arith.constant dense<0.000000e+00> : vector<4x92xf32>
    %62 = tpu.matmul %61, %60, %cst_33 {dimension_numbers = #tpu.dot_dimension_numbers<[1], [0], [0], [1], [0, 0, 1, 1], [], []>} : vector<4x4xf32>, vector<4x92xf32>, vector<4x92xf32> -> vector<4x92xf32>
    %63 = arith.addf %59, %62 : vector<4x92xf32>
    %64 = vector.extract_strided_slice %1 {offsets = [0, 27], sizes = [4, 92], strides = [1, 1]} : vector<4x144xf32> to vector<4x92xf32>
    %65 = vector.extract_strided_slice %10 {offsets = [0, 52], sizes = [4, 4], strides = [1, 1]} : vector<4x500xf32> to vector<4x4xf32>
    %cst_34 = arith.constant dense<0.000000e+00> : vector<4x92xf32>
    %66 = tpu.matmul %65, %64, %cst_34 {dimension_numbers = #tpu.dot_dimension_numbers<[1], [0], [0], [1], [0, 0, 1, 1], [], []>} : vector<4x4xf32>, vector<4x92xf32>, vector<4x92xf32> -> vector<4x92xf32>
    %67 = arith.addf %63, %66 : vector<4x92xf32>
    %68 = vector.extract_strided_slice %1 {offsets = [0, 28], sizes = [4, 92], strides = [1, 1]} : vector<4x144xf32> to vector<4x92xf32>
    %69 = vector.extract_strided_slice %10 {offsets = [0, 56], sizes = [4, 4], strides = [1, 1]} : vector<4x500xf32> to vector<4x4xf32>
    %cst_35 = arith.constant dense<0.000000e+00> : vector<4x92xf32>
    %70 = tpu.matmul %69, %68, %cst_35 {dimension_numbers = #tpu.dot_dimension_numbers<[1], [0], [0], [1], [0, 0, 1, 1], [], []>} : vector<4x4xf32>, vector<4x92xf32>, vector<4x92xf32> -> vector<4x92xf32>
    %71 = arith.addf %67, %70 : vector<4x92xf32>
    %72 = vector.extract_strided_slice %1 {offsets = [0, 36], sizes = [4, 92], strides = [1, 1]} : vector<4x144xf32> to vector<4x92xf32>
    %73 = vector.extract_strided_slice %10 {offsets = [0, 60], sizes = [4, 4], strides = [1, 1]} : vector<4x500xf32> to vector<4x4xf32>
    %cst_36 = arith.constant dense<0.000000e+00> : vector<4x92xf32>
    %74 = tpu.matmul %73, %72, %cst_36 {dimension_numbers = #tpu.dot_dimension_numbers<[1], [0], [0], [1], [0, 0, 1, 1], [], []>} : vector<4x4xf32>, vector<4x92xf32>, vector<4x92xf32> -> vector<4x92xf32>
    %75 = arith.addf %71, %74 : vector<4x92xf32>
    %76 = vector.extract_strided_slice %1 {offsets = [0, 37], sizes = [4, 92], strides = [1, 1]} : vector<4x144xf32> to vector<4x92xf32>
    %77 = vector.extract_strided_slice %10 {offsets = [0, 64], sizes = [4, 4], strides = [1, 1]} : vector<4x500xf32> to vector<4x4xf32>
    %cst_37 = arith.constant dense<0.000000e+00> : vector<4x92xf32>
    %78 = tpu.matmul %77, %76, %cst_37 {dimension_numbers = #tpu.dot_dimension_numbers<[1], [0], [0], [1], [0, 0, 1, 1], [], []>} : vector<4x4xf32>, vector<4x92xf32>, vector<4x92xf32> -> vector<4x92xf32>
    %79 = arith.addf %75, %78 : vector<4x92xf32>
    %80 = vector.extract_strided_slice %1 {offsets = [0, 38], sizes = [4, 92], strides = [1, 1]} : vector<4x144xf32> to vector<4x92xf32>
    %81 = vector.extract_strided_slice %10 {offsets = [0, 68], sizes = [4, 4], strides = [1, 1]} : vector<4x500xf32> to vector<4x4xf32>
    %cst_38 = arith.constant dense<0.000000e+00> : vector<4x92xf32>
    %82 = tpu.matmul %81, %80, %cst_38 {dimension_numbers = #tpu.dot_dimension_numbers<[1], [0], [0], [1], [0, 0, 1, 1], [], []>} : vector<4x4xf32>, vector<4x92xf32>, vector<4x92xf32> -> vector<4x92xf32>
    %83 = arith.addf %79, %82 : vector<4x92xf32>
    %84 = vector.extract_strided_slice %1 {offsets = [0, 39], sizes = [4, 92], strides = [1, 1]} : vector<4x144xf32> to vector<4x92xf32>
    %85 = vector.extract_strided_slice %10 {offsets = [0, 72], sizes = [4, 4], strides = [1, 1]} : vector<4x500xf32> to vector<4x4xf32>
    %cst_39 = arith.constant dense<0.000000e+00> : vector<4x92xf32>
    %86 = tpu.matmul %85, %84, %cst_39 {dimension_numbers = #tpu.dot_dimension_numbers<[1], [0], [0], [1], [0, 0, 1, 1], [], []>} : vector<4x4xf32>, vector<4x92xf32>, vector<4x92xf32> -> vector<4x92xf32>
    %87 = arith.addf %83, %86 : vector<4x92xf32>
    %88 = vector.extract_strided_slice %1 {offsets = [0, 40], sizes = [4, 92], strides = [1, 1]} : vector<4x144xf32> to vector<4x92xf32>
    %89 = vector.extract_strided_slice %10 {offsets = [0, 76], sizes = [4, 4], strides = [1, 1]} : vector<4x500xf32> to vector<4x4xf32>
    %cst_40 = arith.constant dense<0.000000e+00> : vector<4x92xf32>
    %90 = tpu.matmul %89, %88, %cst_40 {dimension_numbers = #tpu.dot_dimension_numbers<[1], [0], [0], [1], [0, 0, 1, 1], [], []>} : vector<4x4xf32>, vector<4x92xf32>, vector<4x92xf32> -> vector<4x92xf32>
    %91 = arith.addf %87, %90 : vector<4x92xf32>
    %92 = vector.extract_strided_slice %1 {offsets = [0, 48], sizes = [4, 92], strides = [1, 1]} : vector<4x144xf32> to vector<4x92xf32>
    %93 = vector.extract_strided_slice %10 {offsets = [0, 80], sizes = [4, 4], strides = [1, 1]} : vector<4x500xf32> to vector<4x4xf32>
    %cst_41 = arith.constant dense<0.000000e+00> : vector<4x92xf32>
    %94 = tpu.matmul %93, %92, %cst_41 {dimension_numbers = #tpu.dot_dimension_numbers<[1], [0], [0], [1], [0, 0, 1, 1], [], []>} : vector<4x4xf32>, vector<4x92xf32>, vector<4x92xf32> -> vector<4x92xf32>
    %95 = arith.addf %91, %94 : vector<4x92xf32>
    %96 = vector.extract_strided_slice %1 {offsets = [0, 49], sizes = [4, 92], strides = [1, 1]} : vector<4x144xf32> to vector<4x92xf32>
    %97 = vector.extract_strided_slice %10 {offsets = [0, 84], sizes = [4, 4], strides = [1, 1]} : vector<4x500xf32> to vector<4x4xf32>
    %cst_42 = arith.constant dense<0.000000e+00> : vector<4x92xf32>
    %98 = tpu.matmul %97, %96, %cst_42 {dimension_numbers = #tpu.dot_dimension_numbers<[1], [0], [0], [1], [0, 0, 1, 1], [], []>} : vector<4x4xf32>, vector<4x92xf32>, vector<4x92xf32> -> vector<4x92xf32>
    %99 = arith.addf %95, %98 : vector<4x92xf32>
    %100 = vector.extract_strided_slice %1 {offsets = [0, 50], sizes = [4, 92], strides = [1, 1]} : vector<4x144xf32> to vector<4x92xf32>
    %101 = vector.extract_strided_slice %10 {offsets = [0, 88], sizes = [4, 4], strides = [1, 1]} : vector<4x500xf32> to vector<4x4xf32>
    %cst_43 = arith.constant dense<0.000000e+00> : vector<4x92xf32>
    %102 = tpu.matmul %101, %100, %cst_43 {dimension_numbers = #tpu.dot_dimension_numbers<[1], [0], [0], [1], [0, 0, 1, 1], [], []>} : vector<4x4xf32>, vector<4x92xf32>, vector<4x92xf32> -> vector<4x92xf32>
    %103 = arith.addf %99, %102 : vector<4x92xf32>
    %104 = vector.extract_strided_slice %1 {offsets = [0, 51], sizes = [4, 92], strides = [1, 1]} : vector<4x144xf32> to vector<4x92xf32>
    %105 = vector.extract_strided_slice %10 {offsets = [0, 92], sizes = [4, 4], strides = [1, 1]} : vector<4x500xf32> to vector<4x4xf32>
    %cst_44 = arith.constant dense<0.000000e+00> : vector<4x92xf32>
    %106 = tpu.matmul %105, %104, %cst_44 {dimension_numbers = #tpu.dot_dimension_numbers<[1], [0], [0], [1], [0, 0, 1, 1], [], []>} : vector<4x4xf32>, vector<4x92xf32>, vector<4x92xf32> -> vector<4x92xf32>
    %107 = arith.addf %103, %106 : vector<4x92xf32>
    %108 = vector.extract_strided_slice %1 {offsets = [0, 52], sizes = [4, 92], strides = [1, 1]} : vector<4x144xf32> to vector<4x92xf32>
    %109 = vector.extract_strided_slice %10 {offsets = [0, 96], sizes = [4, 4], strides = [1, 1]} : vector<4x500xf32> to vector<4x4xf32>
    %cst_45 = arith.constant dense<0.000000e+00> : vector<4x92xf32>
    %110 = tpu.matmul %109, %108, %cst_45 {dimension_numbers = #tpu.dot_dimension_numbers<[1], [0], [0], [1], [0, 0, 1, 1], [], []>} : vector<4x4xf32>, vector<4x92xf32>, vector<4x92xf32> -> vector<4x92xf32>
    %111 = arith.addf %107, %110 : vector<4x92xf32>
    %112 = vector.extract_strided_slice %3 {offsets = [0, 0], sizes = [4, 92], strides = [1, 1]} : vector<4x144xf32> to vector<4x92xf32>
    %113 = vector.extract_strided_slice %10 {offsets = [0, 100], sizes = [4, 4], strides = [1, 1]} : vector<4x500xf32> to vector<4x4xf32>
    %cst_46 = arith.constant dense<0.000000e+00> : vector<4x92xf32>
    %114 = tpu.matmul %113, %112, %cst_46 {dimension_numbers = #tpu.dot_dimension_numbers<[1], [0], [0], [1], [0, 0, 1, 1], [], []>} : vector<4x4xf32>, vector<4x92xf32>, vector<4x92xf32> -> vector<4x92xf32>
    %115 = arith.addf %111, %114 : vector<4x92xf32>
    %116 = vector.extract_strided_slice %3 {offsets = [0, 1], sizes = [4, 92], strides = [1, 1]} : vector<4x144xf32> to vector<4x92xf32>
    %117 = vector.extract_strided_slice %10 {offsets = [0, 104], sizes = [4, 4], strides = [1, 1]} : vector<4x500xf32> to vector<4x4xf32>
    %cst_47 = arith.constant dense<0.000000e+00> : vector<4x92xf32>
    %118 = tpu.matmul %117, %116, %cst_47 {dimension_numbers = #tpu.dot_dimension_numbers<[1], [0], [0], [1], [0, 0, 1, 1], [], []>} : vector<4x4xf32>, vector<4x92xf32>, vector<4x92xf32> -> vector<4x92xf32>
    %119 = arith.addf %115, %118 : vector<4x92xf32>
    %120 = vector.extract_strided_slice %3 {offsets = [0, 2], sizes = [4, 92], strides = [1, 1]} : vector<4x144xf32> to vector<4x92xf32>
    %121 = vector.extract_strided_slice %10 {offsets = [0, 108], sizes = [4, 4], strides = [1, 1]} : vector<4x500xf32> to vector<4x4xf32>
    %cst_48 = arith.constant dense<0.000000e+00> : vector<4x92xf32>
    %122 = tpu.matmul %121, %120, %cst_48 {dimension_numbers = #tpu.dot_dimension_numbers<[1], [0], [0], [1], [0, 0, 1, 1], [], []>} : vector<4x4xf32>, vector<4x92xf32>, vector<4x92xf32> -> vector<4x92xf32>
    %123 = arith.addf %119, %122 : vector<4x92xf32>
    %124 = vector.extract_strided_slice %3 {offsets = [0, 3], sizes = [4, 92], strides = [1, 1]} : vector<4x144xf32> to vector<4x92xf32>
    %125 = vector.extract_strided_slice %10 {offsets = [0, 112], sizes = [4, 4], strides = [1, 1]} : vector<4x500xf32> to vector<4x4xf32>
    %cst_49 = arith.constant dense<0.000000e+00> : vector<4x92xf32>
    %126 = tpu.matmul %125, %124, %cst_49 {dimension_numbers = #tpu.dot_dimension_numbers<[1], [0], [0], [1], [0, 0, 1, 1], [], []>} : vector<4x4xf32>, vector<4x92xf32>, vector<4x92xf32> -> vector<4x92xf32>
    %127 = arith.addf %123, %126 : vector<4x92xf32>
    %128 = vector.extract_strided_slice %3 {offsets = [0, 4], sizes = [4, 92], strides = [1, 1]} : vector<4x144xf32> to vector<4x92xf32>
    %129 = vector.extract_strided_slice %10 {offsets = [0, 116], sizes = [4, 4], strides = [1, 1]} : vector<4x500xf32> to vector<4x4xf32>
    %cst_50 = arith.constant dense<0.000000e+00> : vector<4x92xf32>
    %130 = tpu.matmul %129, %128, %cst_50 {dimension_numbers = #tpu.dot_dimension_numbers<[1], [0], [0], [1], [0, 0, 1, 1], [], []>} : vector<4x4xf32>, vector<4x92xf32>, vector<4x92xf32> -> vector<4x92xf32>
    %131 = arith.addf %127, %130 : vector<4x92xf32>
    %132 = vector.extract_strided_slice %3 {offsets = [0, 12], sizes = [4, 92], strides = [1, 1]} : vector<4x144xf32> to vector<4x92xf32>
    %133 = vector.extract_strided_slice %10 {offsets = [0, 120], sizes = [4, 4], strides = [1, 1]} : vector<4x500xf32> to vector<4x4xf32>
    %cst_51 = arith.constant dense<0.000000e+00> : vector<4x92xf32>
    %134 = tpu.matmul %133, %132, %cst_51 {dimension_numbers = #tpu.dot_dimension_numbers<[1], [0], [0], [1], [0, 0, 1, 1], [], []>} : vector<4x4xf32>, vector<4x92xf32>, vector<4x92xf32> -> vector<4x92xf32>
    %135 = arith.addf %131, %134 : vector<4x92xf32>
    %136 = vector.extract_strided_slice %3 {offsets = [0, 13], sizes = [4, 92], strides = [1, 1]} : vector<4x144xf32> to vector<4x92xf32>
    %137 = vector.extract_strided_slice %10 {offsets = [0, 124], sizes = [4, 4], strides = [1, 1]} : vector<4x500xf32> to vector<4x4xf32>
    %cst_52 = arith.constant dense<0.000000e+00> : vector<4x92xf32>
    %138 = tpu.matmul %137, %136, %cst_52 {dimension_numbers = #tpu.dot_dimension_numbers<[1], [0], [0], [1], [0, 0, 1, 1], [], []>} : vector<4x4xf32>, vector<4x92xf32>, vector<4x92xf32> -> vector<4x92xf32>
    %139 = arith.addf %135, %138 : vector<4x92xf32>
    %140 = vector.extract_strided_slice %3 {offsets = [0, 14], sizes = [4, 92], strides = [1, 1]} : vector<4x144xf32> to vector<4x92xf32>
    %141 = vector.extract_strided_slice %10 {offsets = [0, 128], sizes = [4, 4], strides = [1, 1]} : vector<4x500xf32> to vector<4x4xf32>
    %cst_53 = arith.constant dense<0.000000e+00> : vector<4x92xf32>
    %142 = tpu.matmul %141, %140, %cst_53 {dimension_numbers = #tpu.dot_dimension_numbers<[1], [0], [0], [1], [0, 0, 1, 1], [], []>} : vector<4x4xf32>, vector<4x92xf32>, vector<4x92xf32> -> vector<4x92xf32>
    %143 = arith.addf %139, %142 : vector<4x92xf32>
    %144 = vector.extract_strided_slice %3 {offsets = [0, 15], sizes = [4, 92], strides = [1, 1]} : vector<4x144xf32> to vector<4x92xf32>
    %145 = vector.extract_strided_slice %10 {offsets = [0, 132], sizes = [4, 4], strides = [1, 1]} : vector<4x500xf32> to vector<4x4xf32>
    %cst_54 = arith.constant dense<0.000000e+00> : vector<4x92xf32>
    %146 = tpu.matmul %145, %144, %cst_54 {dimension_numbers = #tpu.dot_dimension_numbers<[1], [0], [0], [1], [0, 0, 1, 1], [], []>} : vector<4x4xf32>, vector<4x92xf32>, vector<4x92xf32> -> vector<4x92xf32>
    %147 = arith.addf %143, %146 : vector<4x92xf32>
    %148 = vector.extract_strided_slice %3 {offsets = [0, 16], sizes = [4, 92], strides = [1, 1]} : vector<4x144xf32> to vector<4x92xf32>
    %149 = vector.extract_strided_slice %10 {offsets = [0, 136], sizes = [4, 4], strides = [1, 1]} : vector<4x500xf32> to vector<4x4xf32>
    %cst_55 = arith.constant dense<0.000000e+00> : vector<4x92xf32>
    %150 = tpu.matmul %149, %148, %cst_55 {dimension_numbers = #tpu.dot_dimension_numbers<[1], [0], [0], [1], [0, 0, 1, 1], [], []>} : vector<4x4xf32>, vector<4x92xf32>, vector<4x92xf32> -> vector<4x92xf32>
    %151 = arith.addf %147, %150 : vector<4x92xf32>
    %152 = vector.extract_strided_slice %3 {offsets = [0, 24], sizes = [4, 92], strides = [1, 1]} : vector<4x144xf32> to vector<4x92xf32>
    %153 = vector.extract_strided_slice %10 {offsets = [0, 140], sizes = [4, 4], strides = [1, 1]} : vector<4x500xf32> to vector<4x4xf32>
    %cst_56 = arith.constant dense<0.000000e+00> : vector<4x92xf32>
    %154 = tpu.matmul %153, %152, %cst_56 {dimension_numbers = #tpu.dot_dimension_numbers<[1], [0], [0], [1], [0, 0, 1, 1], [], []>} : vector<4x4xf32>, vector<4x92xf32>, vector<4x92xf32> -> vector<4x92xf32>
    %155 = arith.addf %151, %154 : vector<4x92xf32>
    %156 = vector.extract_strided_slice %3 {offsets = [0, 25], sizes = [4, 92], strides = [1, 1]} : vector<4x144xf32> to vector<4x92xf32>
    %157 = vector.extract_strided_slice %10 {offsets = [0, 144], sizes = [4, 4], strides = [1, 1]} : vector<4x500xf32> to vector<4x4xf32>
    %cst_57 = arith.constant dense<0.000000e+00> : vector<4x92xf32>
    %158 = tpu.matmul %157, %156, %cst_57 {dimension_numbers = #tpu.dot_dimension_numbers<[1], [0], [0], [1], [0, 0, 1, 1], [], []>} : vector<4x4xf32>, vector<4x92xf32>, vector<4x92xf32> -> vector<4x92xf32>
    %159 = arith.addf %155, %158 : vector<4x92xf32>
    %160 = vector.extract_strided_slice %3 {offsets = [0, 26], sizes = [4, 92], strides = [1, 1]} : vector<4x144xf32> to vector<4x92xf32>
    %161 = vector.extract_strided_slice %10 {offsets = [0, 148], sizes = [4, 4], strides = [1, 1]} : vector<4x500xf32> to vector<4x4xf32>
    %cst_58 = arith.constant dense<0.000000e+00> : vector<4x92xf32>
    %162 = tpu.matmul %161, %160, %cst_58 {dimension_numbers = #tpu.dot_dimension_numbers<[1], [0], [0], [1], [0, 0, 1, 1], [], []>} : vector<4x4xf32>, vector<4x92xf32>, vector<4x92xf32> -> vector<4x92xf32>
    %163 = arith.addf %159, %162 : vector<4x92xf32>
    %164 = vector.extract_strided_slice %3 {offsets = [0, 27], sizes = [4, 92], strides = [1, 1]} : vector<4x144xf32> to vector<4x92xf32>
    %165 = vector.extract_strided_slice %10 {offsets = [0, 152], sizes = [4, 4], strides = [1, 1]} : vector<4x500xf32> to vector<4x4xf32>
    %cst_59 = arith.constant dense<0.000000e+00> : vector<4x92xf32>
    %166 = tpu.matmul %165, %164, %cst_59 {dimension_numbers = #tpu.dot_dimension_numbers<[1], [0], [0], [1], [0, 0, 1, 1], [], []>} : vector<4x4xf32>, vector<4x92xf32>, vector<4x92xf32> -> vector<4x92xf32>
    %167 = arith.addf %163, %166 : vector<4x92xf32>
    %168 = vector.extract_strided_slice %3 {offsets = [0, 28], sizes = [4, 92], strides = [1, 1]} : vector<4x144xf32> to vector<4x92xf32>
    %169 = vector.extract_strided_slice %10 {offsets = [0, 156], sizes = [4, 4], strides = [1, 1]} : vector<4x500xf32> to vector<4x4xf32>
    %cst_60 = arith.constant dense<0.000000e+00> : vector<4x92xf32>
    %170 = tpu.matmul %169, %168, %cst_60 {dimension_numbers = #tpu.dot_dimension_numbers<[1], [0], [0], [1], [0, 0, 1, 1], [], []>} : vector<4x4xf32>, vector<4x92xf32>, vector<4x92xf32> -> vector<4x92xf32>
    %171 = arith.addf %167, %170 : vector<4x92xf32>
    %172 = vector.extract_strided_slice %3 {offsets = [0, 36], sizes = [4, 92], strides = [1, 1]} : vector<4x144xf32> to vector<4x92xf32>
    %173 = vector.extract_strided_slice %10 {offsets = [0, 160], sizes = [4, 4], strides = [1, 1]} : vector<4x500xf32> to vector<4x4xf32>
    %cst_61 = arith.constant dense<0.000000e+00> : vector<4x92xf32>
    %174 = tpu.matmul %173, %172, %cst_61 {dimension_numbers = #tpu.dot_dimension_numbers<[1], [0], [0], [1], [0, 0, 1, 1], [], []>} : vector<4x4xf32>, vector<4x92xf32>, vector<4x92xf32> -> vector<4x92xf32>
    %175 = arith.addf %171, %174 : vector<4x92xf32>
    %176 = vector.extract_strided_slice %3 {offsets = [0, 37], sizes = [4, 92], strides = [1, 1]} : vector<4x144xf32> to vector<4x92xf32>
    %177 = vector.extract_strided_slice %10 {offsets = [0, 164], sizes = [4, 4], strides = [1, 1]} : vector<4x500xf32> to vector<4x4xf32>
    %cst_62 = arith.constant dense<0.000000e+00> : vector<4x92xf32>
    %178 = tpu.matmul %177, %176, %cst_62 {dimension_numbers = #tpu.dot_dimension_numbers<[1], [0], [0], [1], [0, 0, 1, 1], [], []>} : vector<4x4xf32>, vector<4x92xf32>, vector<4x92xf32> -> vector<4x92xf32>
    %179 = arith.addf %175, %178 : vector<4x92xf32>
    %180 = vector.extract_strided_slice %3 {offsets = [0, 38], sizes = [4, 92], strides = [1, 1]} : vector<4x144xf32> to vector<4x92xf32>
    %181 = vector.extract_strided_slice %10 {offsets = [0, 168], sizes = [4, 4], strides = [1, 1]} : vector<4x500xf32> to vector<4x4xf32>
    %cst_63 = arith.constant dense<0.000000e+00> : vector<4x92xf32>
    %182 = tpu.matmul %181, %180, %cst_63 {dimension_numbers = #tpu.dot_dimension_numbers<[1], [0], [0], [1], [0, 0, 1, 1], [], []>} : vector<4x4xf32>, vector<4x92xf32>, vector<4x92xf32> -> vector<4x92xf32>
    %183 = arith.addf %179, %182 : vector<4x92xf32>
    %184 = vector.extract_strided_slice %3 {offsets = [0, 39], sizes = [4, 92], strides = [1, 1]} : vector<4x144xf32> to vector<4x92xf32>
    %185 = vector.extract_strided_slice %10 {offsets = [0, 172], sizes = [4, 4], strides = [1, 1]} : vector<4x500xf32> to vector<4x4xf32>
    %cst_64 = arith.constant dense<0.000000e+00> : vector<4x92xf32>
    %186 = tpu.matmul %185, %184, %cst_64 {dimension_numbers = #tpu.dot_dimension_numbers<[1], [0], [0], [1], [0, 0, 1, 1], [], []>} : vector<4x4xf32>, vector<4x92xf32>, vector<4x92xf32> -> vector<4x92xf32>
    %187 = arith.addf %183, %186 : vector<4x92xf32>
    %188 = vector.extract_strided_slice %3 {offsets = [0, 40], sizes = [4, 92], strides = [1, 1]} : vector<4x144xf32> to vector<4x92xf32>
    %189 = vector.extract_strided_slice %10 {offsets = [0, 176], sizes = [4, 4], strides = [1, 1]} : vector<4x500xf32> to vector<4x4xf32>
    %cst_65 = arith.constant dense<0.000000e+00> : vector<4x92xf32>
    %190 = tpu.matmul %189, %188, %cst_65 {dimension_numbers = #tpu.dot_dimension_numbers<[1], [0], [0], [1], [0, 0, 1, 1], [], []>} : vector<4x4xf32>, vector<4x92xf32>, vector<4x92xf32> -> vector<4x92xf32>
    %191 = arith.addf %187, %190 : vector<4x92xf32>
    %192 = vector.extract_strided_slice %3 {offsets = [0, 48], sizes = [4, 92], strides = [1, 1]} : vector<4x144xf32> to vector<4x92xf32>
    %193 = vector.extract_strided_slice %10 {offsets = [0, 180], sizes = [4, 4], strides = [1, 1]} : vector<4x500xf32> to vector<4x4xf32>
    %cst_66 = arith.constant dense<0.000000e+00> : vector<4x92xf32>
    %194 = tpu.matmul %193, %192, %cst_66 {dimension_numbers = #tpu.dot_dimension_numbers<[1], [0], [0], [1], [0, 0, 1, 1], [], []>} : vector<4x4xf32>, vector<4x92xf32>, vector<4x92xf32> -> vector<4x92xf32>
    %195 = arith.addf %191, %194 : vector<4x92xf32>
    %196 = vector.extract_strided_slice %3 {offsets = [0, 49], sizes = [4, 92], strides = [1, 1]} : vector<4x144xf32> to vector<4x92xf32>
    %197 = vector.extract_strided_slice %10 {offsets = [0, 184], sizes = [4, 4], strides = [1, 1]} : vector<4x500xf32> to vector<4x4xf32>
    %cst_67 = arith.constant dense<0.000000e+00> : vector<4x92xf32>
    %198 = tpu.matmul %197, %196, %cst_67 {dimension_numbers = #tpu.dot_dimension_numbers<[1], [0], [0], [1], [0, 0, 1, 1], [], []>} : vector<4x4xf32>, vector<4x92xf32>, vector<4x92xf32> -> vector<4x92xf32>
    %199 = arith.addf %195, %198 : vector<4x92xf32>
    %200 = vector.extract_strided_slice %3 {offsets = [0, 50], sizes = [4, 92], strides = [1, 1]} : vector<4x144xf32> to vector<4x92xf32>
    %201 = vector.extract_strided_slice %10 {offsets = [0, 188], sizes = [4, 4], strides = [1, 1]} : vector<4x500xf32> to vector<4x4xf32>
    %cst_68 = arith.constant dense<0.000000e+00> : vector<4x92xf32>
    %202 = tpu.matmul %201, %200, %cst_68 {dimension_numbers = #tpu.dot_dimension_numbers<[1], [0], [0], [1], [0, 0, 1, 1], [], []>} : vector<4x4xf32>, vector<4x92xf32>, vector<4x92xf32> -> vector<4x92xf32>
    %203 = arith.addf %199, %202 : vector<4x92xf32>
    %204 = vector.extract_strided_slice %3 {offsets = [0, 51], sizes = [4, 92], strides = [1, 1]} : vector<4x144xf32> to vector<4x92xf32>
    %205 = vector.extract_strided_slice %10 {offsets = [0, 192], sizes = [4, 4], strides = [1, 1]} : vector<4x500xf32> to vector<4x4xf32>
    %cst_69 = arith.constant dense<0.000000e+00> : vector<4x92xf32>
    %206 = tpu.matmul %205, %204, %cst_69 {dimension_numbers = #tpu.dot_dimension_numbers<[1], [0], [0], [1], [0, 0, 1, 1], [], []>} : vector<4x4xf32>, vector<4x92xf32>, vector<4x92xf32> -> vector<4x92xf32>
    %207 = arith.addf %203, %206 : vector<4x92xf32>
    %208 = vector.extract_strided_slice %3 {offsets = [0, 52], sizes = [4, 92], strides = [1, 1]} : vector<4x144xf32> to vector<4x92xf32>
    %209 = vector.extract_strided_slice %10 {offsets = [0, 196], sizes = [4, 4], strides = [1, 1]} : vector<4x500xf32> to vector<4x4xf32>
    %cst_70 = arith.constant dense<0.000000e+00> : vector<4x92xf32>
    %210 = tpu.matmul %209, %208, %cst_70 {dimension_numbers = #tpu.dot_dimension_numbers<[1], [0], [0], [1], [0, 0, 1, 1], [], []>} : vector<4x4xf32>, vector<4x92xf32>, vector<4x92xf32> -> vector<4x92xf32>
    %211 = arith.addf %207, %210 : vector<4x92xf32>
    %212 = vector.extract_strided_slice %5 {offsets = [0, 0], sizes = [4, 92], strides = [1, 1]} : vector<4x144xf32> to vector<4x92xf32>
    %213 = vector.extract_strided_slice %10 {offsets = [0, 200], sizes = [4, 4], strides = [1, 1]} : vector<4x500xf32> to vector<4x4xf32>
    %cst_71 = arith.constant dense<0.000000e+00> : vector<4x92xf32>
    %214 = tpu.matmul %213, %212, %cst_71 {dimension_numbers = #tpu.dot_dimension_numbers<[1], [0], [0], [1], [0, 0, 1, 1], [], []>} : vector<4x4xf32>, vector<4x92xf32>, vector<4x92xf32> -> vector<4x92xf32>
    %215 = arith.addf %211, %214 : vector<4x92xf32>
    %216 = vector.extract_strided_slice %5 {offsets = [0, 1], sizes = [4, 92], strides = [1, 1]} : vector<4x144xf32> to vector<4x92xf32>
    %217 = vector.extract_strided_slice %10 {offsets = [0, 204], sizes = [4, 4], strides = [1, 1]} : vector<4x500xf32> to vector<4x4xf32>
    %cst_72 = arith.constant dense<0.000000e+00> : vector<4x92xf32>
    %218 = tpu.matmul %217, %216, %cst_72 {dimension_numbers = #tpu.dot_dimension_numbers<[1], [0], [0], [1], [0, 0, 1, 1], [], []>} : vector<4x4xf32>, vector<4x92xf32>, vector<4x92xf32> -> vector<4x92xf32>
    %219 = arith.addf %215, %218 : vector<4x92xf32>
    %220 = vector.extract_strided_slice %5 {offsets = [0, 2], sizes = [4, 92], strides = [1, 1]} : vector<4x144xf32> to vector<4x92xf32>
    %221 = vector.extract_strided_slice %10 {offsets = [0, 208], sizes = [4, 4], strides = [1, 1]} : vector<4x500xf32> to vector<4x4xf32>
    %cst_73 = arith.constant dense<0.000000e+00> : vector<4x92xf32>
    %222 = tpu.matmul %221, %220, %cst_73 {dimension_numbers = #tpu.dot_dimension_numbers<[1], [0], [0], [1], [0, 0, 1, 1], [], []>} : vector<4x4xf32>, vector<4x92xf32>, vector<4x92xf32> -> vector<4x92xf32>
    %223 = arith.addf %219, %222 : vector<4x92xf32>
    %224 = vector.extract_strided_slice %5 {offsets = [0, 3], sizes = [4, 92], strides = [1, 1]} : vector<4x144xf32> to vector<4x92xf32>
    %225 = vector.extract_strided_slice %10 {offsets = [0, 212], sizes = [4, 4], strides = [1, 1]} : vector<4x500xf32> to vector<4x4xf32>
    %cst_74 = arith.constant dense<0.000000e+00> : vector<4x92xf32>
    %226 = tpu.matmul %225, %224, %cst_74 {dimension_numbers = #tpu.dot_dimension_numbers<[1], [0], [0], [1], [0, 0, 1, 1], [], []>} : vector<4x4xf32>, vector<4x92xf32>, vector<4x92xf32> -> vector<4x92xf32>
    %227 = arith.addf %223, %226 : vector<4x92xf32>
    %228 = vector.extract_strided_slice %5 {offsets = [0, 4], sizes = [4, 92], strides = [1, 1]} : vector<4x144xf32> to vector<4x92xf32>
    %229 = vector.extract_strided_slice %10 {offsets = [0, 216], sizes = [4, 4], strides = [1, 1]} : vector<4x500xf32> to vector<4x4xf32>
    %cst_75 = arith.constant dense<0.000000e+00> : vector<4x92xf32>
    %230 = tpu.matmul %229, %228, %cst_75 {dimension_numbers = #tpu.dot_dimension_numbers<[1], [0], [0], [1], [0, 0, 1, 1], [], []>} : vector<4x4xf32>, vector<4x92xf32>, vector<4x92xf32> -> vector<4x92xf32>
    %231 = arith.addf %227, %230 : vector<4x92xf32>
    %232 = vector.extract_strided_slice %5 {offsets = [0, 12], sizes = [4, 92], strides = [1, 1]} : vector<4x144xf32> to vector<4x92xf32>
    %233 = vector.extract_strided_slice %10 {offsets = [0, 220], sizes = [4, 4], strides = [1, 1]} : vector<4x500xf32> to vector<4x4xf32>
    %cst_76 = arith.constant dense<0.000000e+00> : vector<4x92xf32>
    %234 = tpu.matmul %233, %232, %cst_76 {dimension_numbers = #tpu.dot_dimension_numbers<[1], [0], [0], [1], [0, 0, 1, 1], [], []>} : vector<4x4xf32>, vector<4x92xf32>, vector<4x92xf32> -> vector<4x92xf32>
    %235 = arith.addf %231, %234 : vector<4x92xf32>
    %236 = vector.extract_strided_slice %5 {offsets = [0, 13], sizes = [4, 92], strides = [1, 1]} : vector<4x144xf32> to vector<4x92xf32>
    %237 = vector.extract_strided_slice %10 {offsets = [0, 224], sizes = [4, 4], strides = [1, 1]} : vector<4x500xf32> to vector<4x4xf32>
    %cst_77 = arith.constant dense<0.000000e+00> : vector<4x92xf32>
    %238 = tpu.matmul %237, %236, %cst_77 {dimension_numbers = #tpu.dot_dimension_numbers<[1], [0], [0], [1], [0, 0, 1, 1], [], []>} : vector<4x4xf32>, vector<4x92xf32>, vector<4x92xf32> -> vector<4x92xf32>
    %239 = arith.addf %235, %238 : vector<4x92xf32>
    %240 = vector.extract_strided_slice %5 {offsets = [0, 14], sizes = [4, 92], strides = [1, 1]} : vector<4x144xf32> to vector<4x92xf32>
    %241 = vector.extract_strided_slice %10 {offsets = [0, 228], sizes = [4, 4], strides = [1, 1]} : vector<4x500xf32> to vector<4x4xf32>
    %cst_78 = arith.constant dense<0.000000e+00> : vector<4x92xf32>
    %242 = tpu.matmul %241, %240, %cst_78 {dimension_numbers = #tpu.dot_dimension_numbers<[1], [0], [0], [1], [0, 0, 1, 1], [], []>} : vector<4x4xf32>, vector<4x92xf32>, vector<4x92xf32> -> vector<4x92xf32>
    %243 = arith.addf %239, %242 : vector<4x92xf32>
    %244 = vector.extract_strided_slice %5 {offsets = [0, 15], sizes = [4, 92], strides = [1, 1]} : vector<4x144xf32> to vector<4x92xf32>
    %245 = vector.extract_strided_slice %10 {offsets = [0, 232], sizes = [4, 4], strides = [1, 1]} : vector<4x500xf32> to vector<4x4xf32>
    %cst_79 = arith.constant dense<0.000000e+00> : vector<4x92xf32>
    %246 = tpu.matmul %245, %244, %cst_79 {dimension_numbers = #tpu.dot_dimension_numbers<[1], [0], [0], [1], [0, 0, 1, 1], [], []>} : vector<4x4xf32>, vector<4x92xf32>, vector<4x92xf32> -> vector<4x92xf32>
    %247 = arith.addf %243, %246 : vector<4x92xf32>
    %248 = vector.extract_strided_slice %5 {offsets = [0, 16], sizes = [4, 92], strides = [1, 1]} : vector<4x144xf32> to vector<4x92xf32>
    %249 = vector.extract_strided_slice %10 {offsets = [0, 236], sizes = [4, 4], strides = [1, 1]} : vector<4x500xf32> to vector<4x4xf32>
    %cst_80 = arith.constant dense<0.000000e+00> : vector<4x92xf32>
    %250 = tpu.matmul %249, %248, %cst_80 {dimension_numbers = #tpu.dot_dimension_numbers<[1], [0], [0], [1], [0, 0, 1, 1], [], []>} : vector<4x4xf32>, vector<4x92xf32>, vector<4x92xf32> -> vector<4x92xf32>
    %251 = arith.addf %247, %250 : vector<4x92xf32>
    %252 = vector.extract_strided_slice %5 {offsets = [0, 24], sizes = [4, 92], strides = [1, 1]} : vector<4x144xf32> to vector<4x92xf32>
    %253 = vector.extract_strided_slice %10 {offsets = [0, 240], sizes = [4, 4], strides = [1, 1]} : vector<4x500xf32> to vector<4x4xf32>
    %cst_81 = arith.constant dense<0.000000e+00> : vector<4x92xf32>
    %254 = tpu.matmul %253, %252, %cst_81 {dimension_numbers = #tpu.dot_dimension_numbers<[1], [0], [0], [1], [0, 0, 1, 1], [], []>} : vector<4x4xf32>, vector<4x92xf32>, vector<4x92xf32> -> vector<4x92xf32>
    %255 = arith.addf %251, %254 : vector<4x92xf32>
    %256 = vector.extract_strided_slice %5 {offsets = [0, 25], sizes = [4, 92], strides = [1, 1]} : vector<4x144xf32> to vector<4x92xf32>
    %257 = vector.extract_strided_slice %10 {offsets = [0, 244], sizes = [4, 4], strides = [1, 1]} : vector<4x500xf32> to vector<4x4xf32>
    %cst_82 = arith.constant dense<0.000000e+00> : vector<4x92xf32>
    %258 = tpu.matmul %257, %256, %cst_82 {dimension_numbers = #tpu.dot_dimension_numbers<[1], [0], [0], [1], [0, 0, 1, 1], [], []>} : vector<4x4xf32>, vector<4x92xf32>, vector<4x92xf32> -> vector<4x92xf32>
    %259 = arith.addf %255, %258 : vector<4x92xf32>
    %260 = vector.extract_strided_slice %5 {offsets = [0, 26], sizes = [4, 92], strides = [1, 1]} : vector<4x144xf32> to vector<4x92xf32>
    %261 = vector.extract_strided_slice %10 {offsets = [0, 248], sizes = [4, 4], strides = [1, 1]} : vector<4x500xf32> to vector<4x4xf32>
    %cst_83 = arith.constant dense<0.000000e+00> : vector<4x92xf32>
    %262 = tpu.matmul %261, %260, %cst_83 {dimension_numbers = #tpu.dot_dimension_numbers<[1], [0], [0], [1], [0, 0, 1, 1], [], []>} : vector<4x4xf32>, vector<4x92xf32>, vector<4x92xf32> -> vector<4x92xf32>
    %263 = arith.addf %259, %262 : vector<4x92xf32>
    %264 = vector.extract_strided_slice %5 {offsets = [0, 27], sizes = [4, 92], strides = [1, 1]} : vector<4x144xf32> to vector<4x92xf32>
    %265 = vector.extract_strided_slice %10 {offsets = [0, 252], sizes = [4, 4], strides = [1, 1]} : vector<4x500xf32> to vector<4x4xf32>
    %cst_84 = arith.constant dense<0.000000e+00> : vector<4x92xf32>
    %266 = tpu.matmul %265, %264, %cst_84 {dimension_numbers = #tpu.dot_dimension_numbers<[1], [0], [0], [1], [0, 0, 1, 1], [], []>} : vector<4x4xf32>, vector<4x92xf32>, vector<4x92xf32> -> vector<4x92xf32>
    %267 = arith.addf %263, %266 : vector<4x92xf32>
    %268 = vector.extract_strided_slice %5 {offsets = [0, 28], sizes = [4, 92], strides = [1, 1]} : vector<4x144xf32> to vector<4x92xf32>
    %269 = vector.extract_strided_slice %10 {offsets = [0, 256], sizes = [4, 4], strides = [1, 1]} : vector<4x500xf32> to vector<4x4xf32>
    %cst_85 = arith.constant dense<0.000000e+00> : vector<4x92xf32>
    %270 = tpu.matmul %269, %268, %cst_85 {dimension_numbers = #tpu.dot_dimension_numbers<[1], [0], [0], [1], [0, 0, 1, 1], [], []>} : vector<4x4xf32>, vector<4x92xf32>, vector<4x92xf32> -> vector<4x92xf32>
    %271 = arith.addf %267, %270 : vector<4x92xf32>
    %272 = vector.extract_strided_slice %5 {offsets = [0, 36], sizes = [4, 92], strides = [1, 1]} : vector<4x144xf32> to vector<4x92xf32>
    %273 = vector.extract_strided_slice %10 {offsets = [0, 260], sizes = [4, 4], strides = [1, 1]} : vector<4x500xf32> to vector<4x4xf32>
    %cst_86 = arith.constant dense<0.000000e+00> : vector<4x92xf32>
    %274 = tpu.matmul %273, %272, %cst_86 {dimension_numbers = #tpu.dot_dimension_numbers<[1], [0], [0], [1], [0, 0, 1, 1], [], []>} : vector<4x4xf32>, vector<4x92xf32>, vector<4x92xf32> -> vector<4x92xf32>
    %275 = arith.addf %271, %274 : vector<4x92xf32>
    %276 = vector.extract_strided_slice %5 {offsets = [0, 37], sizes = [4, 92], strides = [1, 1]} : vector<4x144xf32> to vector<4x92xf32>
    %277 = vector.extract_strided_slice %10 {offsets = [0, 264], sizes = [4, 4], strides = [1, 1]} : vector<4x500xf32> to vector<4x4xf32>
    %cst_87 = arith.constant dense<0.000000e+00> : vector<4x92xf32>
    %278 = tpu.matmul %277, %276, %cst_87 {dimension_numbers = #tpu.dot_dimension_numbers<[1], [0], [0], [1], [0, 0, 1, 1], [], []>} : vector<4x4xf32>, vector<4x92xf32>, vector<4x92xf32> -> vector<4x92xf32>
    %279 = arith.addf %275, %278 : vector<4x92xf32>
    %280 = vector.extract_strided_slice %5 {offsets = [0, 38], sizes = [4, 92], strides = [1, 1]} : vector<4x144xf32> to vector<4x92xf32>
    %281 = vector.extract_strided_slice %10 {offsets = [0, 268], sizes = [4, 4], strides = [1, 1]} : vector<4x500xf32> to vector<4x4xf32>
    %cst_88 = arith.constant dense<0.000000e+00> : vector<4x92xf32>
    %282 = tpu.matmul %281, %280, %cst_88 {dimension_numbers = #tpu.dot_dimension_numbers<[1], [0], [0], [1], [0, 0, 1, 1], [], []>} : vector<4x4xf32>, vector<4x92xf32>, vector<4x92xf32> -> vector<4x92xf32>
    %283 = arith.addf %279, %282 : vector<4x92xf32>
    %284 = vector.extract_strided_slice %5 {offsets = [0, 39], sizes = [4, 92], strides = [1, 1]} : vector<4x144xf32> to vector<4x92xf32>
    %285 = vector.extract_strided_slice %10 {offsets = [0, 272], sizes = [4, 4], strides = [1, 1]} : vector<4x500xf32> to vector<4x4xf32>
    %cst_89 = arith.constant dense<0.000000e+00> : vector<4x92xf32>
    %286 = tpu.matmul %285, %284, %cst_89 {dimension_numbers = #tpu.dot_dimension_numbers<[1], [0], [0], [1], [0, 0, 1, 1], [], []>} : vector<4x4xf32>, vector<4x92xf32>, vector<4x92xf32> -> vector<4x92xf32>
    %287 = arith.addf %283, %286 : vector<4x92xf32>
    %288 = vector.extract_strided_slice %5 {offsets = [0, 40], sizes = [4, 92], strides = [1, 1]} : vector<4x144xf32> to vector<4x92xf32>
    %289 = vector.extract_strided_slice %10 {offsets = [0, 276], sizes = [4, 4], strides = [1, 1]} : vector<4x500xf32> to vector<4x4xf32>
    %cst_90 = arith.constant dense<0.000000e+00> : vector<4x92xf32>
    %290 = tpu.matmul %289, %288, %cst_90 {dimension_numbers = #tpu.dot_dimension_numbers<[1], [0], [0], [1], [0, 0, 1, 1], [], []>} : vector<4x4xf32>, vector<4x92xf32>, vector<4x92xf32> -> vector<4x92xf32>
    %291 = arith.addf %287, %290 : vector<4x92xf32>
    %292 = vector.extract_strided_slice %5 {offsets = [0, 48], sizes = [4, 92], strides = [1, 1]} : vector<4x144xf32> to vector<4x92xf32>
    %293 = vector.extract_strided_slice %10 {offsets = [0, 280], sizes = [4, 4], strides = [1, 1]} : vector<4x500xf32> to vector<4x4xf32>
    %cst_91 = arith.constant dense<0.000000e+00> : vector<4x92xf32>
    %294 = tpu.matmul %293, %292, %cst_91 {dimension_numbers = #tpu.dot_dimension_numbers<[1], [0], [0], [1], [0, 0, 1, 1], [], []>} : vector<4x4xf32>, vector<4x92xf32>, vector<4x92xf32> -> vector<4x92xf32>
    %295 = arith.addf %291, %294 : vector<4x92xf32>
    %296 = vector.extract_strided_slice %5 {offsets = [0, 49], sizes = [4, 92], strides = [1, 1]} : vector<4x144xf32> to vector<4x92xf32>
    %297 = vector.extract_strided_slice %10 {offsets = [0, 284], sizes = [4, 4], strides = [1, 1]} : vector<4x500xf32> to vector<4x4xf32>
    %cst_92 = arith.constant dense<0.000000e+00> : vector<4x92xf32>
    %298 = tpu.matmul %297, %296, %cst_92 {dimension_numbers = #tpu.dot_dimension_numbers<[1], [0], [0], [1], [0, 0, 1, 1], [], []>} : vector<4x4xf32>, vector<4x92xf32>, vector<4x92xf32> -> vector<4x92xf32>
    %299 = arith.addf %295, %298 : vector<4x92xf32>
    %300 = vector.extract_strided_slice %5 {offsets = [0, 50], sizes = [4, 92], strides = [1, 1]} : vector<4x144xf32> to vector<4x92xf32>
    %301 = vector.extract_strided_slice %10 {offsets = [0, 288], sizes = [4, 4], strides = [1, 1]} : vector<4x500xf32> to vector<4x4xf32>
    %cst_93 = arith.constant dense<0.000000e+00> : vector<4x92xf32>
    %302 = tpu.matmul %301, %300, %cst_93 {dimension_numbers = #tpu.dot_dimension_numbers<[1], [0], [0], [1], [0, 0, 1, 1], [], []>} : vector<4x4xf32>, vector<4x92xf32>, vector<4x92xf32> -> vector<4x92xf32>
    %303 = arith.addf %299, %302 : vector<4x92xf32>
    %304 = vector.extract_strided_slice %5 {offsets = [0, 51], sizes = [4, 92], strides = [1, 1]} : vector<4x144xf32> to vector<4x92xf32>
    %305 = vector.extract_strided_slice %10 {offsets = [0, 292], sizes = [4, 4], strides = [1, 1]} : vector<4x500xf32> to vector<4x4xf32>
    %cst_94 = arith.constant dense<0.000000e+00> : vector<4x92xf32>
    %306 = tpu.matmul %305, %304, %cst_94 {dimension_numbers = #tpu.dot_dimension_numbers<[1], [0], [0], [1], [0, 0, 1, 1], [], []>} : vector<4x4xf32>, vector<4x92xf32>, vector<4x92xf32> -> vector<4x92xf32>
    %307 = arith.addf %303, %306 : vector<4x92xf32>
    %308 = vector.extract_strided_slice %5 {offsets = [0, 52], sizes = [4, 92], strides = [1, 1]} : vector<4x144xf32> to vector<4x92xf32>
    %309 = vector.extract_strided_slice %10 {offsets = [0, 296], sizes = [4, 4], strides = [1, 1]} : vector<4x500xf32> to vector<4x4xf32>
    %cst_95 = arith.constant dense<0.000000e+00> : vector<4x92xf32>
    %310 = tpu.matmul %309, %308, %cst_95 {dimension_numbers = #tpu.dot_dimension_numbers<[1], [0], [0], [1], [0, 0, 1, 1], [], []>} : vector<4x4xf32>, vector<4x92xf32>, vector<4x92xf32> -> vector<4x92xf32>
    %311 = arith.addf %307, %310 : vector<4x92xf32>
    %312 = vector.extract_strided_slice %7 {offsets = [0, 0], sizes = [4, 92], strides = [1, 1]} : vector<4x144xf32> to vector<4x92xf32>
    %313 = vector.extract_strided_slice %10 {offsets = [0, 300], sizes = [4, 4], strides = [1, 1]} : vector<4x500xf32> to vector<4x4xf32>
    %cst_96 = arith.constant dense<0.000000e+00> : vector<4x92xf32>
    %314 = tpu.matmul %313, %312, %cst_96 {dimension_numbers = #tpu.dot_dimension_numbers<[1], [0], [0], [1], [0, 0, 1, 1], [], []>} : vector<4x4xf32>, vector<4x92xf32>, vector<4x92xf32> -> vector<4x92xf32>
    %315 = arith.addf %311, %314 : vector<4x92xf32>
    %316 = vector.extract_strided_slice %7 {offsets = [0, 1], sizes = [4, 92], strides = [1, 1]} : vector<4x144xf32> to vector<4x92xf32>
    %317 = vector.extract_strided_slice %10 {offsets = [0, 304], sizes = [4, 4], strides = [1, 1]} : vector<4x500xf32> to vector<4x4xf32>
    %cst_97 = arith.constant dense<0.000000e+00> : vector<4x92xf32>
    %318 = tpu.matmul %317, %316, %cst_97 {dimension_numbers = #tpu.dot_dimension_numbers<[1], [0], [0], [1], [0, 0, 1, 1], [], []>} : vector<4x4xf32>, vector<4x92xf32>, vector<4x92xf32> -> vector<4x92xf32>
    %319 = arith.addf %315, %318 : vector<4x92xf32>
    %320 = vector.extract_strided_slice %7 {offsets = [0, 2], sizes = [4, 92], strides = [1, 1]} : vector<4x144xf32> to vector<4x92xf32>
    %321 = vector.extract_strided_slice %10 {offsets = [0, 308], sizes = [4, 4], strides = [1, 1]} : vector<4x500xf32> to vector<4x4xf32>
    %cst_98 = arith.constant dense<0.000000e+00> : vector<4x92xf32>
    %322 = tpu.matmul %321, %320, %cst_98 {dimension_numbers = #tpu.dot_dimension_numbers<[1], [0], [0], [1], [0, 0, 1, 1], [], []>} : vector<4x4xf32>, vector<4x92xf32>, vector<4x92xf32> -> vector<4x92xf32>
    %323 = arith.addf %319, %322 : vector<4x92xf32>
    %324 = vector.extract_strided_slice %7 {offsets = [0, 3], sizes = [4, 92], strides = [1, 1]} : vector<4x144xf32> to vector<4x92xf32>
    %325 = vector.extract_strided_slice %10 {offsets = [0, 312], sizes = [4, 4], strides = [1, 1]} : vector<4x500xf32> to vector<4x4xf32>
    %cst_99 = arith.constant dense<0.000000e+00> : vector<4x92xf32>
    %326 = tpu.matmul %325, %324, %cst_99 {dimension_numbers = #tpu.dot_dimension_numbers<[1], [0], [0], [1], [0, 0, 1, 1], [], []>} : vector<4x4xf32>, vector<4x92xf32>, vector<4x92xf32> -> vector<4x92xf32>
    %327 = arith.addf %323, %326 : vector<4x92xf32>
    %328 = vector.extract_strided_slice %7 {offsets = [0, 4], sizes = [4, 92], strides = [1, 1]} : vector<4x144xf32> to vector<4x92xf32>
    %329 = vector.extract_strided_slice %10 {offsets = [0, 316], sizes = [4, 4], strides = [1, 1]} : vector<4x500xf32> to vector<4x4xf32>
    %cst_100 = arith.constant dense<0.000000e+00> : vector<4x92xf32>
    %330 = tpu.matmul %329, %328, %cst_100 {dimension_numbers = #tpu.dot_dimension_numbers<[1], [0], [0], [1], [0, 0, 1, 1], [], []>} : vector<4x4xf32>, vector<4x92xf32>, vector<4x92xf32> -> vector<4x92xf32>
    %331 = arith.addf %327, %330 : vector<4x92xf32>
    %332 = vector.extract_strided_slice %7 {offsets = [0, 12], sizes = [4, 92], strides = [1, 1]} : vector<4x144xf32> to vector<4x92xf32>
    %333 = vector.extract_strided_slice %10 {offsets = [0, 320], sizes = [4, 4], strides = [1, 1]} : vector<4x500xf32> to vector<4x4xf32>
    %cst_101 = arith.constant dense<0.000000e+00> : vector<4x92xf32>
    %334 = tpu.matmul %333, %332, %cst_101 {dimension_numbers = #tpu.dot_dimension_numbers<[1], [0], [0], [1], [0, 0, 1, 1], [], []>} : vector<4x4xf32>, vector<4x92xf32>, vector<4x92xf32> -> vector<4x92xf32>
    %335 = arith.addf %331, %334 : vector<4x92xf32>
    %336 = vector.extract_strided_slice %7 {offsets = [0, 13], sizes = [4, 92], strides = [1, 1]} : vector<4x144xf32> to vector<4x92xf32>
    %337 = vector.extract_strided_slice %10 {offsets = [0, 324], sizes = [4, 4], strides = [1, 1]} : vector<4x500xf32> to vector<4x4xf32>
    %cst_102 = arith.constant dense<0.000000e+00> : vector<4x92xf32>
    %338 = tpu.matmul %337, %336, %cst_102 {dimension_numbers = #tpu.dot_dimension_numbers<[1], [0], [0], [1], [0, 0, 1, 1], [], []>} : vector<4x4xf32>, vector<4x92xf32>, vector<4x92xf32> -> vector<4x92xf32>
    %339 = arith.addf %335, %338 : vector<4x92xf32>
    %340 = vector.extract_strided_slice %7 {offsets = [0, 14], sizes = [4, 92], strides = [1, 1]} : vector<4x144xf32> to vector<4x92xf32>
    %341 = vector.extract_strided_slice %10 {offsets = [0, 328], sizes = [4, 4], strides = [1, 1]} : vector<4x500xf32> to vector<4x4xf32>
    %cst_103 = arith.constant dense<0.000000e+00> : vector<4x92xf32>
    %342 = tpu.matmul %341, %340, %cst_103 {dimension_numbers = #tpu.dot_dimension_numbers<[1], [0], [0], [1], [0, 0, 1, 1], [], []>} : vector<4x4xf32>, vector<4x92xf32>, vector<4x92xf32> -> vector<4x92xf32>
    %343 = arith.addf %339, %342 : vector<4x92xf32>
    %344 = vector.extract_strided_slice %7 {offsets = [0, 15], sizes = [4, 92], strides = [1, 1]} : vector<4x144xf32> to vector<4x92xf32>
    %345 = vector.extract_strided_slice %10 {offsets = [0, 332], sizes = [4, 4], strides = [1, 1]} : vector<4x500xf32> to vector<4x4xf32>
    %cst_104 = arith.constant dense<0.000000e+00> : vector<4x92xf32>
    %346 = tpu.matmul %345, %344, %cst_104 {dimension_numbers = #tpu.dot_dimension_numbers<[1], [0], [0], [1], [0, 0, 1, 1], [], []>} : vector<4x4xf32>, vector<4x92xf32>, vector<4x92xf32> -> vector<4x92xf32>
    %347 = arith.addf %343, %346 : vector<4x92xf32>
    %348 = vector.extract_strided_slice %7 {offsets = [0, 16], sizes = [4, 92], strides = [1, 1]} : vector<4x144xf32> to vector<4x92xf32>
    %349 = vector.extract_strided_slice %10 {offsets = [0, 336], sizes = [4, 4], strides = [1, 1]} : vector<4x500xf32> to vector<4x4xf32>
    %cst_105 = arith.constant dense<0.000000e+00> : vector<4x92xf32>
    %350 = tpu.matmul %349, %348, %cst_105 {dimension_numbers = #tpu.dot_dimension_numbers<[1], [0], [0], [1], [0, 0, 1, 1], [], []>} : vector<4x4xf32>, vector<4x92xf32>, vector<4x92xf32> -> vector<4x92xf32>
    %351 = arith.addf %347, %350 : vector<4x92xf32>
    %352 = vector.extract_strided_slice %7 {offsets = [0, 24], sizes = [4, 92], strides = [1, 1]} : vector<4x144xf32> to vector<4x92xf32>
    %353 = vector.extract_strided_slice %10 {offsets = [0, 340], sizes = [4, 4], strides = [1, 1]} : vector<4x500xf32> to vector<4x4xf32>
    %cst_106 = arith.constant dense<0.000000e+00> : vector<4x92xf32>
    %354 = tpu.matmul %353, %352, %cst_106 {dimension_numbers = #tpu.dot_dimension_numbers<[1], [0], [0], [1], [0, 0, 1, 1], [], []>} : vector<4x4xf32>, vector<4x92xf32>, vector<4x92xf32> -> vector<4x92xf32>
    %355 = arith.addf %351, %354 : vector<4x92xf32>
    %356 = vector.extract_strided_slice %7 {offsets = [0, 25], sizes = [4, 92], strides = [1, 1]} : vector<4x144xf32> to vector<4x92xf32>
    %357 = vector.extract_strided_slice %10 {offsets = [0, 344], sizes = [4, 4], strides = [1, 1]} : vector<4x500xf32> to vector<4x4xf32>
    %cst_107 = arith.constant dense<0.000000e+00> : vector<4x92xf32>
    %358 = tpu.matmul %357, %356, %cst_107 {dimension_numbers = #tpu.dot_dimension_numbers<[1], [0], [0], [1], [0, 0, 1, 1], [], []>} : vector<4x4xf32>, vector<4x92xf32>, vector<4x92xf32> -> vector<4x92xf32>
    %359 = arith.addf %355, %358 : vector<4x92xf32>
    %360 = vector.extract_strided_slice %7 {offsets = [0, 26], sizes = [4, 92], strides = [1, 1]} : vector<4x144xf32> to vector<4x92xf32>
    %361 = vector.extract_strided_slice %10 {offsets = [0, 348], sizes = [4, 4], strides = [1, 1]} : vector<4x500xf32> to vector<4x4xf32>
    %cst_108 = arith.constant dense<0.000000e+00> : vector<4x92xf32>
    %362 = tpu.matmul %361, %360, %cst_108 {dimension_numbers = #tpu.dot_dimension_numbers<[1], [0], [0], [1], [0, 0, 1, 1], [], []>} : vector<4x4xf32>, vector<4x92xf32>, vector<4x92xf32> -> vector<4x92xf32>
    %363 = arith.addf %359, %362 : vector<4x92xf32>
    %364 = vector.extract_strided_slice %7 {offsets = [0, 27], sizes = [4, 92], strides = [1, 1]} : vector<4x144xf32> to vector<4x92xf32>
    %365 = vector.extract_strided_slice %10 {offsets = [0, 352], sizes = [4, 4], strides = [1, 1]} : vector<4x500xf32> to vector<4x4xf32>
    %cst_109 = arith.constant dense<0.000000e+00> : vector<4x92xf32>
    %366 = tpu.matmul %365, %364, %cst_109 {dimension_numbers = #tpu.dot_dimension_numbers<[1], [0], [0], [1], [0, 0, 1, 1], [], []>} : vector<4x4xf32>, vector<4x92xf32>, vector<4x92xf32> -> vector<4x92xf32>
    %367 = arith.addf %363, %366 : vector<4x92xf32>
    %368 = vector.extract_strided_slice %7 {offsets = [0, 28], sizes = [4, 92], strides = [1, 1]} : vector<4x144xf32> to vector<4x92xf32>
    %369 = vector.extract_strided_slice %10 {offsets = [0, 356], sizes = [4, 4], strides = [1, 1]} : vector<4x500xf32> to vector<4x4xf32>
    %cst_110 = arith.constant dense<0.000000e+00> : vector<4x92xf32>
    %370 = tpu.matmul %369, %368, %cst_110 {dimension_numbers = #tpu.dot_dimension_numbers<[1], [0], [0], [1], [0, 0, 1, 1], [], []>} : vector<4x4xf32>, vector<4x92xf32>, vector<4x92xf32> -> vector<4x92xf32>
    %371 = arith.addf %367, %370 : vector<4x92xf32>
    %372 = vector.extract_strided_slice %7 {offsets = [0, 36], sizes = [4, 92], strides = [1, 1]} : vector<4x144xf32> to vector<4x92xf32>
    %373 = vector.extract_strided_slice %10 {offsets = [0, 360], sizes = [4, 4], strides = [1, 1]} : vector<4x500xf32> to vector<4x4xf32>
    %cst_111 = arith.constant dense<0.000000e+00> : vector<4x92xf32>
    %374 = tpu.matmul %373, %372, %cst_111 {dimension_numbers = #tpu.dot_dimension_numbers<[1], [0], [0], [1], [0, 0, 1, 1], [], []>} : vector<4x4xf32>, vector<4x92xf32>, vector<4x92xf32> -> vector<4x92xf32>
    %375 = arith.addf %371, %374 : vector<4x92xf32>
    %376 = vector.extract_strided_slice %7 {offsets = [0, 37], sizes = [4, 92], strides = [1, 1]} : vector<4x144xf32> to vector<4x92xf32>
    %377 = vector.extract_strided_slice %10 {offsets = [0, 364], sizes = [4, 4], strides = [1, 1]} : vector<4x500xf32> to vector<4x4xf32>
    %cst_112 = arith.constant dense<0.000000e+00> : vector<4x92xf32>
    %378 = tpu.matmul %377, %376, %cst_112 {dimension_numbers = #tpu.dot_dimension_numbers<[1], [0], [0], [1], [0, 0, 1, 1], [], []>} : vector<4x4xf32>, vector<4x92xf32>, vector<4x92xf32> -> vector<4x92xf32>
    %379 = arith.addf %375, %378 : vector<4x92xf32>
    %380 = vector.extract_strided_slice %7 {offsets = [0, 38], sizes = [4, 92], strides = [1, 1]} : vector<4x144xf32> to vector<4x92xf32>
    %381 = vector.extract_strided_slice %10 {offsets = [0, 368], sizes = [4, 4], strides = [1, 1]} : vector<4x500xf32> to vector<4x4xf32>
    %cst_113 = arith.constant dense<0.000000e+00> : vector<4x92xf32>
    %382 = tpu.matmul %381, %380, %cst_113 {dimension_numbers = #tpu.dot_dimension_numbers<[1], [0], [0], [1], [0, 0, 1, 1], [], []>} : vector<4x4xf32>, vector<4x92xf32>, vector<4x92xf32> -> vector<4x92xf32>
    %383 = arith.addf %379, %382 : vector<4x92xf32>
    %384 = vector.extract_strided_slice %7 {offsets = [0, 39], sizes = [4, 92], strides = [1, 1]} : vector<4x144xf32> to vector<4x92xf32>
    %385 = vector.extract_strided_slice %10 {offsets = [0, 372], sizes = [4, 4], strides = [1, 1]} : vector<4x500xf32> to vector<4x4xf32>
    %cst_114 = arith.constant dense<0.000000e+00> : vector<4x92xf32>
    %386 = tpu.matmul %385, %384, %cst_114 {dimension_numbers = #tpu.dot_dimension_numbers<[1], [0], [0], [1], [0, 0, 1, 1], [], []>} : vector<4x4xf32>, vector<4x92xf32>, vector<4x92xf32> -> vector<4x92xf32>
    %387 = arith.addf %383, %386 : vector<4x92xf32>
    %388 = vector.extract_strided_slice %7 {offsets = [0, 40], sizes = [4, 92], strides = [1, 1]} : vector<4x144xf32> to vector<4x92xf32>
    %389 = vector.extract_strided_slice %10 {offsets = [0, 376], sizes = [4, 4], strides = [1, 1]} : vector<4x500xf32> to vector<4x4xf32>
    %cst_115 = arith.constant dense<0.000000e+00> : vector<4x92xf32>
    %390 = tpu.matmul %389, %388, %cst_115 {dimension_numbers = #tpu.dot_dimension_numbers<[1], [0], [0], [1], [0, 0, 1, 1], [], []>} : vector<4x4xf32>, vector<4x92xf32>, vector<4x92xf32> -> vector<4x92xf32>
    %391 = arith.addf %387, %390 : vector<4x92xf32>
    %392 = vector.extract_strided_slice %7 {offsets = [0, 48], sizes = [4, 92], strides = [1, 1]} : vector<4x144xf32> to vector<4x92xf32>
    %393 = vector.extract_strided_slice %10 {offsets = [0, 380], sizes = [4, 4], strides = [1, 1]} : vector<4x500xf32> to vector<4x4xf32>
    %cst_116 = arith.constant dense<0.000000e+00> : vector<4x92xf32>
    %394 = tpu.matmul %393, %392, %cst_116 {dimension_numbers = #tpu.dot_dimension_numbers<[1], [0], [0], [1], [0, 0, 1, 1], [], []>} : vector<4x4xf32>, vector<4x92xf32>, vector<4x92xf32> -> vector<4x92xf32>
    %395 = arith.addf %391, %394 : vector<4x92xf32>
    %396 = vector.extract_strided_slice %7 {offsets = [0, 49], sizes = [4, 92], strides = [1, 1]} : vector<4x144xf32> to vector<4x92xf32>
    %397 = vector.extract_strided_slice %10 {offsets = [0, 384], sizes = [4, 4], strides = [1, 1]} : vector<4x500xf32> to vector<4x4xf32>
    %cst_117 = arith.constant dense<0.000000e+00> : vector<4x92xf32>
    %398 = tpu.matmul %397, %396, %cst_117 {dimension_numbers = #tpu.dot_dimension_numbers<[1], [0], [0], [1], [0, 0, 1, 1], [], []>} : vector<4x4xf32>, vector<4x92xf32>, vector<4x92xf32> -> vector<4x92xf32>
    %399 = arith.addf %395, %398 : vector<4x92xf32>
    %400 = vector.extract_strided_slice %7 {offsets = [0, 50], sizes = [4, 92], strides = [1, 1]} : vector<4x144xf32> to vector<4x92xf32>
    %401 = vector.extract_strided_slice %10 {offsets = [0, 388], sizes = [4, 4], strides = [1, 1]} : vector<4x500xf32> to vector<4x4xf32>
    %cst_118 = arith.constant dense<0.000000e+00> : vector<4x92xf32>
    %402 = tpu.matmul %401, %400, %cst_118 {dimension_numbers = #tpu.dot_dimension_numbers<[1], [0], [0], [1], [0, 0, 1, 1], [], []>} : vector<4x4xf32>, vector<4x92xf32>, vector<4x92xf32> -> vector<4x92xf32>
    %403 = arith.addf %399, %402 : vector<4x92xf32>
    %404 = vector.extract_strided_slice %7 {offsets = [0, 51], sizes = [4, 92], strides = [1, 1]} : vector<4x144xf32> to vector<4x92xf32>
    %405 = vector.extract_strided_slice %10 {offsets = [0, 392], sizes = [4, 4], strides = [1, 1]} : vector<4x500xf32> to vector<4x4xf32>
    %cst_119 = arith.constant dense<0.000000e+00> : vector<4x92xf32>
    %406 = tpu.matmul %405, %404, %cst_119 {dimension_numbers = #tpu.dot_dimension_numbers<[1], [0], [0], [1], [0, 0, 1, 1], [], []>} : vector<4x4xf32>, vector<4x92xf32>, vector<4x92xf32> -> vector<4x92xf32>
    %407 = arith.addf %403, %406 : vector<4x92xf32>
    %408 = vector.extract_strided_slice %7 {offsets = [0, 52], sizes = [4, 92], strides = [1, 1]} : vector<4x144xf32> to vector<4x92xf32>
    %409 = vector.extract_strided_slice %10 {offsets = [0, 396], sizes = [4, 4], strides = [1, 1]} : vector<4x500xf32> to vector<4x4xf32>
    %cst_120 = arith.constant dense<0.000000e+00> : vector<4x92xf32>
    %410 = tpu.matmul %409, %408, %cst_120 {dimension_numbers = #tpu.dot_dimension_numbers<[1], [0], [0], [1], [0, 0, 1, 1], [], []>} : vector<4x4xf32>, vector<4x92xf32>, vector<4x92xf32> -> vector<4x92xf32>
    %411 = arith.addf %407, %410 : vector<4x92xf32>
    %412 = vector.extract_strided_slice %9 {offsets = [0, 0], sizes = [4, 92], strides = [1, 1]} : vector<4x144xf32> to vector<4x92xf32>
    %413 = vector.extract_strided_slice %10 {offsets = [0, 400], sizes = [4, 4], strides = [1, 1]} : vector<4x500xf32> to vector<4x4xf32>
    %cst_121 = arith.constant dense<0.000000e+00> : vector<4x92xf32>
    %414 = tpu.matmul %413, %412, %cst_121 {dimension_numbers = #tpu.dot_dimension_numbers<[1], [0], [0], [1], [0, 0, 1, 1], [], []>} : vector<4x4xf32>, vector<4x92xf32>, vector<4x92xf32> -> vector<4x92xf32>
    %415 = arith.addf %411, %414 : vector<4x92xf32>
    %416 = vector.extract_strided_slice %9 {offsets = [0, 1], sizes = [4, 92], strides = [1, 1]} : vector<4x144xf32> to vector<4x92xf32>
    %417 = vector.extract_strided_slice %10 {offsets = [0, 404], sizes = [4, 4], strides = [1, 1]} : vector<4x500xf32> to vector<4x4xf32>
    %cst_122 = arith.constant dense<0.000000e+00> : vector<4x92xf32>
    %418 = tpu.matmul %417, %416, %cst_122 {dimension_numbers = #tpu.dot_dimension_numbers<[1], [0], [0], [1], [0, 0, 1, 1], [], []>} : vector<4x4xf32>, vector<4x92xf32>, vector<4x92xf32> -> vector<4x92xf32>
    %419 = arith.addf %415, %418 : vector<4x92xf32>
    %420 = vector.extract_strided_slice %9 {offsets = [0, 2], sizes = [4, 92], strides = [1, 1]} : vector<4x144xf32> to vector<4x92xf32>
    %421 = vector.extract_strided_slice %10 {offsets = [0, 408], sizes = [4, 4], strides = [1, 1]} : vector<4x500xf32> to vector<4x4xf32>
    %cst_123 = arith.constant dense<0.000000e+00> : vector<4x92xf32>
    %422 = tpu.matmul %421, %420, %cst_123 {dimension_numbers = #tpu.dot_dimension_numbers<[1], [0], [0], [1], [0, 0, 1, 1], [], []>} : vector<4x4xf32>, vector<4x92xf32>, vector<4x92xf32> -> vector<4x92xf32>
    %423 = arith.addf %419, %422 : vector<4x92xf32>
    %424 = vector.extract_strided_slice %9 {offsets = [0, 3], sizes = [4, 92], strides = [1, 1]} : vector<4x144xf32> to vector<4x92xf32>
    %425 = vector.extract_strided_slice %10 {offsets = [0, 412], sizes = [4, 4], strides = [1, 1]} : vector<4x500xf32> to vector<4x4xf32>
    %cst_124 = arith.constant dense<0.000000e+00> : vector<4x92xf32>
    %426 = tpu.matmul %425, %424, %cst_124 {dimension_numbers = #tpu.dot_dimension_numbers<[1], [0], [0], [1], [0, 0, 1, 1], [], []>} : vector<4x4xf32>, vector<4x92xf32>, vector<4x92xf32> -> vector<4x92xf32>
    %427 = arith.addf %423, %426 : vector<4x92xf32>
    %428 = vector.extract_strided_slice %9 {offsets = [0, 4], sizes = [4, 92], strides = [1, 1]} : vector<4x144xf32> to vector<4x92xf32>
    %429 = vector.extract_strided_slice %10 {offsets = [0, 416], sizes = [4, 4], strides = [1, 1]} : vector<4x500xf32> to vector<4x4xf32>
    %cst_125 = arith.constant dense<0.000000e+00> : vector<4x92xf32>
    %430 = tpu.matmul %429, %428, %cst_125 {dimension_numbers = #tpu.dot_dimension_numbers<[1], [0], [0], [1], [0, 0, 1, 1], [], []>} : vector<4x4xf32>, vector<4x92xf32>, vector<4x92xf32> -> vector<4x92xf32>
    %431 = arith.addf %427, %430 : vector<4x92xf32>
    %432 = vector.extract_strided_slice %9 {offsets = [0, 12], sizes = [4, 92], strides = [1, 1]} : vector<4x144xf32> to vector<4x92xf32>
    %433 = vector.extract_strided_slice %10 {offsets = [0, 420], sizes = [4, 4], strides = [1, 1]} : vector<4x500xf32> to vector<4x4xf32>
    %cst_126 = arith.constant dense<0.000000e+00> : vector<4x92xf32>
    %434 = tpu.matmul %433, %432, %cst_126 {dimension_numbers = #tpu.dot_dimension_numbers<[1], [0], [0], [1], [0, 0, 1, 1], [], []>} : vector<4x4xf32>, vector<4x92xf32>, vector<4x92xf32> -> vector<4x92xf32>
    %435 = arith.addf %431, %434 : vector<4x92xf32>
    %436 = vector.extract_strided_slice %9 {offsets = [0, 13], sizes = [4, 92], strides = [1, 1]} : vector<4x144xf32> to vector<4x92xf32>
    %437 = vector.extract_strided_slice %10 {offsets = [0, 424], sizes = [4, 4], strides = [1, 1]} : vector<4x500xf32> to vector<4x4xf32>
    %cst_127 = arith.constant dense<0.000000e+00> : vector<4x92xf32>
    %438 = tpu.matmul %437, %436, %cst_127 {dimension_numbers = #tpu.dot_dimension_numbers<[1], [0], [0], [1], [0, 0, 1, 1], [], []>} : vector<4x4xf32>, vector<4x92xf32>, vector<4x92xf32> -> vector<4x92xf32>
    %439 = arith.addf %435, %438 : vector<4x92xf32>
    %440 = vector.extract_strided_slice %9 {offsets = [0, 14], sizes = [4, 92], strides = [1, 1]} : vector<4x144xf32> to vector<4x92xf32>
    %441 = vector.extract_strided_slice %10 {offsets = [0, 428], sizes = [4, 4], strides = [1, 1]} : vector<4x500xf32> to vector<4x4xf32>
    %cst_128 = arith.constant dense<0.000000e+00> : vector<4x92xf32>
    %442 = tpu.matmul %441, %440, %cst_128 {dimension_numbers = #tpu.dot_dimension_numbers<[1], [0], [0], [1], [0, 0, 1, 1], [], []>} : vector<4x4xf32>, vector<4x92xf32>, vector<4x92xf32> -> vector<4x92xf32>
    %443 = arith.addf %439, %442 : vector<4x92xf32>
    %444 = vector.extract_strided_slice %9 {offsets = [0, 15], sizes = [4, 92], strides = [1, 1]} : vector<4x144xf32> to vector<4x92xf32>
    %445 = vector.extract_strided_slice %10 {offsets = [0, 432], sizes = [4, 4], strides = [1, 1]} : vector<4x500xf32> to vector<4x4xf32>
    %cst_129 = arith.constant dense<0.000000e+00> : vector<4x92xf32>
    %446 = tpu.matmul %445, %444, %cst_129 {dimension_numbers = #tpu.dot_dimension_numbers<[1], [0], [0], [1], [0, 0, 1, 1], [], []>} : vector<4x4xf32>, vector<4x92xf32>, vector<4x92xf32> -> vector<4x92xf32>
    %447 = arith.addf %443, %446 : vector<4x92xf32>
    %448 = vector.extract_strided_slice %9 {offsets = [0, 16], sizes = [4, 92], strides = [1, 1]} : vector<4x144xf32> to vector<4x92xf32>
    %449 = vector.extract_strided_slice %10 {offsets = [0, 436], sizes = [4, 4], strides = [1, 1]} : vector<4x500xf32> to vector<4x4xf32>
    %cst_130 = arith.constant dense<0.000000e+00> : vector<4x92xf32>
    %450 = tpu.matmul %449, %448, %cst_130 {dimension_numbers = #tpu.dot_dimension_numbers<[1], [0], [0], [1], [0, 0, 1, 1], [], []>} : vector<4x4xf32>, vector<4x92xf32>, vector<4x92xf32> -> vector<4x92xf32>
    %451 = arith.addf %447, %450 : vector<4x92xf32>
    %452 = vector.extract_strided_slice %9 {offsets = [0, 24], sizes = [4, 92], strides = [1, 1]} : vector<4x144xf32> to vector<4x92xf32>
    %453 = vector.extract_strided_slice %10 {offsets = [0, 440], sizes = [4, 4], strides = [1, 1]} : vector<4x500xf32> to vector<4x4xf32>
    %cst_131 = arith.constant dense<0.000000e+00> : vector<4x92xf32>
    %454 = tpu.matmul %453, %452, %cst_131 {dimension_numbers = #tpu.dot_dimension_numbers<[1], [0], [0], [1], [0, 0, 1, 1], [], []>} : vector<4x4xf32>, vector<4x92xf32>, vector<4x92xf32> -> vector<4x92xf32>
    %455 = arith.addf %451, %454 : vector<4x92xf32>
    %456 = vector.extract_strided_slice %9 {offsets = [0, 25], sizes = [4, 92], strides = [1, 1]} : vector<4x144xf32> to vector<4x92xf32>
    %457 = vector.extract_strided_slice %10 {offsets = [0, 444], sizes = [4, 4], strides = [1, 1]} : vector<4x500xf32> to vector<4x4xf32>
    %cst_132 = arith.constant dense<0.000000e+00> : vector<4x92xf32>
    %458 = tpu.matmul %457, %456, %cst_132 {dimension_numbers = #tpu.dot_dimension_numbers<[1], [0], [0], [1], [0, 0, 1, 1], [], []>} : vector<4x4xf32>, vector<4x92xf32>, vector<4x92xf32> -> vector<4x92xf32>
    %459 = arith.addf %455, %458 : vector<4x92xf32>
    %460 = vector.extract_strided_slice %9 {offsets = [0, 26], sizes = [4, 92], strides = [1, 1]} : vector<4x144xf32> to vector<4x92xf32>
    %461 = vector.extract_strided_slice %10 {offsets = [0, 448], sizes = [4, 4], strides = [1, 1]} : vector<4x500xf32> to vector<4x4xf32>
    %cst_133 = arith.constant dense<0.000000e+00> : vector<4x92xf32>
    %462 = tpu.matmul %461, %460, %cst_133 {dimension_numbers = #tpu.dot_dimension_numbers<[1], [0], [0], [1], [0, 0, 1, 1], [], []>} : vector<4x4xf32>, vector<4x92xf32>, vector<4x92xf32> -> vector<4x92xf32>
    %463 = arith.addf %459, %462 : vector<4x92xf32>
    %464 = vector.extract_strided_slice %9 {offsets = [0, 27], sizes = [4, 92], strides = [1, 1]} : vector<4x144xf32> to vector<4x92xf32>
    %465 = vector.extract_strided_slice %10 {offsets = [0, 452], sizes = [4, 4], strides = [1, 1]} : vector<4x500xf32> to vector<4x4xf32>
    %cst_134 = arith.constant dense<0.000000e+00> : vector<4x92xf32>
    %466 = tpu.matmul %465, %464, %cst_134 {dimension_numbers = #tpu.dot_dimension_numbers<[1], [0], [0], [1], [0, 0, 1, 1], [], []>} : vector<4x4xf32>, vector<4x92xf32>, vector<4x92xf32> -> vector<4x92xf32>
    %467 = arith.addf %463, %466 : vector<4x92xf32>
    %468 = vector.extract_strided_slice %9 {offsets = [0, 28], sizes = [4, 92], strides = [1, 1]} : vector<4x144xf32> to vector<4x92xf32>
    %469 = vector.extract_strided_slice %10 {offsets = [0, 456], sizes = [4, 4], strides = [1, 1]} : vector<4x500xf32> to vector<4x4xf32>
    %cst_135 = arith.constant dense<0.000000e+00> : vector<4x92xf32>
    %470 = tpu.matmul %469, %468, %cst_135 {dimension_numbers = #tpu.dot_dimension_numbers<[1], [0], [0], [1], [0, 0, 1, 1], [], []>} : vector<4x4xf32>, vector<4x92xf32>, vector<4x92xf32> -> vector<4x92xf32>
    %471 = arith.addf %467, %470 : vector<4x92xf32>
    %472 = vector.extract_strided_slice %9 {offsets = [0, 36], sizes = [4, 92], strides = [1, 1]} : vector<4x144xf32> to vector<4x92xf32>
    %473 = vector.extract_strided_slice %10 {offsets = [0, 460], sizes = [4, 4], strides = [1, 1]} : vector<4x500xf32> to vector<4x4xf32>
    %cst_136 = arith.constant dense<0.000000e+00> : vector<4x92xf32>
    %474 = tpu.matmul %473, %472, %cst_136 {dimension_numbers = #tpu.dot_dimension_numbers<[1], [0], [0], [1], [0, 0, 1, 1], [], []>} : vector<4x4xf32>, vector<4x92xf32>, vector<4x92xf32> -> vector<4x92xf32>
    %475 = arith.addf %471, %474 : vector<4x92xf32>
    %476 = vector.extract_strided_slice %9 {offsets = [0, 37], sizes = [4, 92], strides = [1, 1]} : vector<4x144xf32> to vector<4x92xf32>
    %477 = vector.extract_strided_slice %10 {offsets = [0, 464], sizes = [4, 4], strides = [1, 1]} : vector<4x500xf32> to vector<4x4xf32>
    %cst_137 = arith.constant dense<0.000000e+00> : vector<4x92xf32>
    %478 = tpu.matmul %477, %476, %cst_137 {dimension_numbers = #tpu.dot_dimension_numbers<[1], [0], [0], [1], [0, 0, 1, 1], [], []>} : vector<4x4xf32>, vector<4x92xf32>, vector<4x92xf32> -> vector<4x92xf32>
    %479 = arith.addf %475, %478 : vector<4x92xf32>
    %480 = vector.extract_strided_slice %9 {offsets = [0, 38], sizes = [4, 92], strides = [1, 1]} : vector<4x144xf32> to vector<4x92xf32>
    %481 = vector.extract_strided_slice %10 {offsets = [0, 468], sizes = [4, 4], strides = [1, 1]} : vector<4x500xf32> to vector<4x4xf32>
    %cst_138 = arith.constant dense<0.000000e+00> : vector<4x92xf32>
    %482 = tpu.matmul %481, %480, %cst_138 {dimension_numbers = #tpu.dot_dimension_numbers<[1], [0], [0], [1], [0, 0, 1, 1], [], []>} : vector<4x4xf32>, vector<4x92xf32>, vector<4x92xf32> -> vector<4x92xf32>
    %483 = arith.addf %479, %482 : vector<4x92xf32>
    %484 = vector.extract_strided_slice %9 {offsets = [0, 39], sizes = [4, 92], strides = [1, 1]} : vector<4x144xf32> to vector<4x92xf32>
    %485 = vector.extract_strided_slice %10 {offsets = [0, 472], sizes = [4, 4], strides = [1, 1]} : vector<4x500xf32> to vector<4x4xf32>
    %cst_139 = arith.constant dense<0.000000e+00> : vector<4x92xf32>
    %486 = tpu.matmul %485, %484, %cst_139 {dimension_numbers = #tpu.dot_dimension_numbers<[1], [0], [0], [1], [0, 0, 1, 1], [], []>} : vector<4x4xf32>, vector<4x92xf32>, vector<4x92xf32> -> vector<4x92xf32>
    %487 = arith.addf %483, %486 : vector<4x92xf32>
    %488 = vector.extract_strided_slice %9 {offsets = [0, 40], sizes = [4, 92], strides = [1, 1]} : vector<4x144xf32> to vector<4x92xf32>
    %489 = vector.extract_strided_slice %10 {offsets = [0, 476], sizes = [4, 4], strides = [1, 1]} : vector<4x500xf32> to vector<4x4xf32>
    %cst_140 = arith.constant dense<0.000000e+00> : vector<4x92xf32>
    %490 = tpu.matmul %489, %488, %cst_140 {dimension_numbers = #tpu.dot_dimension_numbers<[1], [0], [0], [1], [0, 0, 1, 1], [], []>} : vector<4x4xf32>, vector<4x92xf32>, vector<4x92xf32> -> vector<4x92xf32>
    %491 = arith.addf %487, %490 : vector<4x92xf32>
    %492 = vector.extract_strided_slice %9 {offsets = [0, 48], sizes = [4, 92], strides = [1, 1]} : vector<4x144xf32> to vector<4x92xf32>
    %493 = vector.extract_strided_slice %10 {offsets = [0, 480], sizes = [4, 4], strides = [1, 1]} : vector<4x500xf32> to vector<4x4xf32>
    %cst_141 = arith.constant dense<0.000000e+00> : vector<4x92xf32>
    %494 = tpu.matmul %493, %492, %cst_141 {dimension_numbers = #tpu.dot_dimension_numbers<[1], [0], [0], [1], [0, 0, 1, 1], [], []>} : vector<4x4xf32>, vector<4x92xf32>, vector<4x92xf32> -> vector<4x92xf32>
    %495 = arith.addf %491, %494 : vector<4x92xf32>
    %496 = vector.extract_strided_slice %9 {offsets = [0, 49], sizes = [4, 92], strides = [1, 1]} : vector<4x144xf32> to vector<4x92xf32>
    %497 = vector.extract_strided_slice %10 {offsets = [0, 484], sizes = [4, 4], strides = [1, 1]} : vector<4x500xf32> to vector<4x4xf32>
    %cst_142 = arith.constant dense<0.000000e+00> : vector<4x92xf32>
    %498 = tpu.matmul %497, %496, %cst_142 {dimension_numbers = #tpu.dot_dimension_numbers<[1], [0], [0], [1], [0, 0, 1, 1], [], []>} : vector<4x4xf32>, vector<4x92xf32>, vector<4x92xf32> -> vector<4x92xf32>
    %499 = arith.addf %495, %498 : vector<4x92xf32>
    %500 = vector.extract_strided_slice %9 {offsets = [0, 50], sizes = [4, 92], strides = [1, 1]} : vector<4x144xf32> to vector<4x92xf32>
    %501 = vector.extract_strided_slice %10 {offsets = [0, 488], sizes = [4, 4], strides = [1, 1]} : vector<4x500xf32> to vector<4x4xf32>
    %cst_143 = arith.constant dense<0.000000e+00> : vector<4x92xf32>
    %502 = tpu.matmul %501, %500, %cst_143 {dimension_numbers = #tpu.dot_dimension_numbers<[1], [0], [0], [1], [0, 0, 1, 1], [], []>} : vector<4x4xf32>, vector<4x92xf32>, vector<4x92xf32> -> vector<4x92xf32>
    %503 = arith.addf %499, %502 : vector<4x92xf32>
    %504 = vector.extract_strided_slice %9 {offsets = [0, 51], sizes = [4, 92], strides = [1, 1]} : vector<4x144xf32> to vector<4x92xf32>
    %505 = vector.extract_strided_slice %10 {offsets = [0, 492], sizes = [4, 4], strides = [1, 1]} : vector<4x500xf32> to vector<4x4xf32>
    %cst_144 = arith.constant dense<0.000000e+00> : vector<4x92xf32>
    %506 = tpu.matmul %505, %504, %cst_144 {dimension_numbers = #tpu.dot_dimension_numbers<[1], [0], [0], [1], [0, 0, 1, 1], [], []>} : vector<4x4xf32>, vector<4x92xf32>, vector<4x92xf32> -> vector<4x92xf32>
    %507 = arith.addf %503, %506 : vector<4x92xf32>
    %508 = vector.extract_strided_slice %9 {offsets = [0, 52], sizes = [4, 92], strides = [1, 1]} : vector<4x144xf32> to vector<4x92xf32>
    %509 = vector.extract_strided_slice %10 {offsets = [0, 496], sizes = [4, 4], strides = [1, 1]} : vector<4x500xf32> to vector<4x4xf32>
    %cst_145 = arith.constant dense<0.000000e+00> : vector<4x92xf32>
    %510 = tpu.matmul %509, %508, %cst_145 {dimension_numbers = #tpu.dot_dimension_numbers<[1], [0], [0], [1], [0, 0, 1, 1], [], []>} : vector<4x4xf32>, vector<4x92xf32>, vector<4x92xf32> -> vector<4x92xf32>
    %511 = arith.addf %507, %510 : vector<4x92xf32>
    %c0_146 = arith.constant 0 : index
    %c0_147 = arith.constant 0 : index
    %512 = vector.load %arg3[%c0_146, %c0_147] : memref<1x92xf32, #tpu.memory_space<vmem>>, vector<1x92xf32>
    %513 = vector.broadcast %512 : vector<1x92xf32> to vector<4x92xf32>
    %514 = arith.mulf %511, %513 : vector<4x92xf32>
    %cst_148 = arith.constant dense<0.000000e+00> : vector<4xf32>
    %515 = vector.multi_reduction <add>, %514, %cst_148 [1] : vector<4x92xf32> to vector<4xf32>
    %516 = vector.shape_cast %515 : vector<4xf32> to vector<4x1xf32>
    %517 = arith.mulf %511, %511 : vector<4x92xf32>
    %518 = vector.broadcast %512 : vector<1x92xf32> to vector<4x92xf32>
    %519 = arith.mulf %517, %518 : vector<4x92xf32>
    %cst_149 = arith.constant dense<0.000000e+00> : vector<4xf32>
    %520 = vector.multi_reduction <add>, %519, %cst_149 [1] : vector<4x92xf32> to vector<4xf32>
    %521 = vector.shape_cast %520 : vector<4xf32> to vector<4x1xf32>
    %522 = tpu.concatenate %516, %521 in 1 : vector<4x1xf32>, vector<4x1xf32> -> vector<4x2xf32>
    %c0_150 = arith.constant 0 : index
    %c0_151 = arith.constant 0 : index
    %c0_152 = arith.constant 0 : index
    %c0_153 = arith.constant 0 : index
    %523 = vector.load %arg10[%c0_150, %c0_151, %c0_152, %c0_153] : memref<1x1x4x2xf32, #tpu.memory_space<vmem>>, vector<1x1x4x2xf32>
    %524 = vector.shape_cast %523 : vector<1x1x4x2xf32> to vector<4x2xf32>
    %525 = vector.shape_cast %522 : vector<4x2xf32> to vector<1x1x4x2xf32>
    tpu.vector_store %arg10[%c0_150, %c0_151, %c0_152, %c0_153], %525 {strides = array<i32>} : memref<1x1x4x2xf32, #tpu.memory_space<vmem>>, vector<1x1x4x2xf32>,
    %c0_154 = arith.constant 0 : index
    %c0_155 = arith.constant 0 : index
    %c0_156 = arith.constant 0 : index
    %c0_157 = arith.constant 0 : index
    %526 = vector.load %arg9[%c0_154, %c0_155, %c0_156, %c0_157] : memref<1x1x4x92xf32, #tpu.memory_space<vmem>>, vector<1x1x4x92xf32>
    %527 = vector.shape_cast %526 : vector<1x1x4x92xf32> to vector<4x92xf32>
    %528 = vector.shape_cast %511 : vector<4x92xf32> to vector<1x1x4x92xf32>
    tpu.vector_store %arg9[%c0_154, %c0_155, %c0_156, %c0_157], %528 {strides = array<i32>} : memref<1x1x4x92xf32, #tpu.memory_space<vmem>>, vector<1x1x4x92xf32>,
    return
  }
  func.func @transform_0(%arg0: i32, %arg1: i32) -> (i32, i32) {
    %c0_i32 = arith.constant 0 : i32
    %c0_i32_0 = arith.constant 0 : i32
    %c0_i32_1 = arith.constant 0 : i32
    return %c0_i32, %c0_i32_0 : i32, i32
  }
  func.func @transform_1(%arg0: i32, %arg1: i32) -> (i32, i32) {
    %c0_i32 = arith.constant 0 : i32
    %c0_i32_0 = arith.constant 0 : i32
    %c0_i32_1 = arith.constant 0 : i32
    return %c0_i32, %c0_i32_0 : i32, i32
  }
  func.func @transform_2(%arg0: i32, %arg1: i32) -> (i32, i32, i32, i32) {
    %c0_i32 = arith.constant 0 : i32
    %0 = arith.addi %arg1, %c0_i32 : i32
    %c0_i32_0 = arith.constant 0 : i32
    %c0_i32_1 = arith.constant 0 : i32
    %c0_i32_2 = arith.constant 0 : i32
    return %arg0, %0, %c0_i32_0, %c0_i32_1 : i32, i32, i32, i32
  }
  func.func @transform_3(%arg0: i32, %arg1: i32) -> (i32, i32, i32, i32) {
    %c1_i32 = arith.constant 1 : i32
    %0 = arith.addi %arg1, %c1_i32 : i32
    %c0_i32 = arith.constant 0 : i32
    %c0_i32_0 = arith.constant 0 : i32
    %c0_i32_1 = arith.constant 0 : i32
    return %arg0, %0, %c0_i32, %c0_i32_0 : i32, i32, i32, i32
  }
  func.func @transform_4(%arg0: i32, %arg1: i32) -> (i32, i32, i32, i32) {
    %c2_i32 = arith.constant 2 : i32
    %0 = arith.addi %arg1, %c2_i32 : i32
    %c0_i32 = arith.constant 0 : i32
    %c0_i32_0 = arith.constant 0 : i32
    %c0_i32_1 = arith.constant 0 : i32
    return %arg0, %0, %c0_i32, %c0_i32_0 : i32, i32, i32, i32
  }
  func.func @transform_5(%arg0: i32, %arg1: i32) -> (i32, i32, i32, i32) {
    %c3_i32 = arith.constant 3 : i32
    %0 = arith.addi %arg1, %c3_i32 : i32
    %c0_i32 = arith.constant 0 : i32
    %c0_i32_0 = arith.constant 0 : i32
    %c0_i32_1 = arith.constant 0 : i32
    return %arg0, %0, %c0_i32, %c0_i32_0 : i32, i32, i32, i32
  }
  func.func @transform_6(%arg0: i32, %arg1: i32) -> (i32, i32, i32, i32) {
    %c4_i32 = arith.constant 4 : i32
    %0 = arith.addi %arg1, %c4_i32 : i32
    %c0_i32 = arith.constant 0 : i32
    %c0_i32_0 = arith.constant 0 : i32
    %c0_i32_1 = arith.constant 0 : i32
    return %arg0, %0, %c0_i32, %c0_i32_0 : i32, i32, i32, i32
  }
  func.func @transform_7(%arg0: i32, %arg1: i32) -> (i32, i32, i32, i32) {
    %c0_i32 = arith.constant 0 : i32
    %c0_i32_0 = arith.constant 0 : i32
    %c0_i32_1 = arith.constant 0 : i32
    return %arg0, %arg1, %c0_i32, %c0_i32_0 : i32, i32, i32, i32
  }
  func.func @transform_8(%arg0: i32, %arg1: i32) -> (i32, i32, i32, i32) {
    %c0_i32 = arith.constant 0 : i32
    %c0_i32_0 = arith.constant 0 : i32
    %c0_i32_1 = arith.constant 0 : i32
    return %arg0, %arg1, %c0_i32, %c0_i32_0 : i32, i32, i32, i32
  }
}

module attributes {stable_mosaic.version = 11 : i64} {
  func.func @_bn_elu_kernel(%arg0: i32, %arg1: i32, %arg2: memref<1x1x4x92xf32, #tpu.memory_space<vmem>>, %arg3: memref<4x1xf32, #tpu.memory_space<vmem>>, %arg4: memref<4x1xf32, #tpu.memory_space<vmem>>, %arg5: memref<1x4x1x8x8xf32, #tpu.memory_space<vmem>>) attributes {dimension_semantics = [#tpu.dimension_semantics<parallel>, #tpu.dimension_semantics<parallel>], iteration_bounds = array<i64: 2, 8>, scalar_prefetch = 0 : i64, scratch_operands = 0 : i64, tpu.core_type = #tpu.core_type<tc>, window_params = [{transform_indices = @transform_0, window_bounds = array<i64: 1, 1, 4, 92>}, {pipeline_mode = #tpu.pipeline_mode<synchronous>, transform_indices = @transform_1, window_bounds = array<i64: 4, 1>}, {pipeline_mode = #tpu.pipeline_mode<synchronous>, transform_indices = @transform_2, window_bounds = array<i64: 4, 1>}, {transform_indices = @transform_3, window_bounds = array<i64: 1, 4, 1, 8, 8>}]} {
    %c0 = arith.constant 0 : index
    %c0_0 = arith.constant 0 : index
    %c0_1 = arith.constant 0 : index
    %c0_2 = arith.constant 0 : index
    %0 = vector.load %arg2[%c0, %c0_0, %c0_1, %c0_2] : memref<1x1x4x92xf32, #tpu.memory_space<vmem>>, vector<1x1x4x92xf32>
    %1 = vector.shape_cast %0 : vector<1x1x4x92xf32> to vector<4x92xf32>
    %c0_3 = arith.constant 0 : index
    %c0_4 = arith.constant 0 : index
    %2 = vector.load %arg3[%c0_3, %c0_4] : memref<4x1xf32, #tpu.memory_space<vmem>>, vector<4x1xf32>
    %3 = vector.broadcast %2 : vector<4x1xf32> to vector<4x92xf32>
    %4 = arith.mulf %1, %3 : vector<4x92xf32>
    %c0_5 = arith.constant 0 : index
    %c0_6 = arith.constant 0 : index
    %5 = vector.load %arg4[%c0_5, %c0_6] : memref<4x1xf32, #tpu.memory_space<vmem>>, vector<4x1xf32>
    %6 = vector.broadcast %5 : vector<4x1xf32> to vector<4x92xf32>
    %7 = arith.addf %4, %6 : vector<4x92xf32>
    %cst = arith.constant 0.000000e+00 : f32
    %8 = vector.broadcast %cst : f32 to vector<4x92xf32>
    %9 = arith.cmpf ogt, %7, %8 : vector<4x92xf32>
    %10 = math.exp %7 : vector<4x92xf32>
    %cst_7 = arith.constant 1.000000e+00 : f32
    %11 = vector.broadcast %cst_7 : f32 to vector<4x92xf32>
    %12 = arith.subf %10, %11 : vector<4x92xf32>
    %13 = arith.select %9, %7, %12 : vector<4x92xi1>, vector<4x92xf32>
    %14 = vector.extract_strided_slice %13 {offsets = [0, 0], sizes = [4, 8], strides = [1, 1]} : vector<4x92xf32> to vector<4x8xf32>
    %c0_8 = arith.constant 0 : index
    %c0_9 = arith.constant 0 : index
    %c0_10 = arith.constant 0 : index
    %c0_11 = arith.constant 0 : index
    %c0_12 = arith.constant 0 : index
    %15 = vector.load %arg5[%c0_8, %c0_9, %c0_10, %c0_11, %c0_12] : memref<1x4x1x8x8xf32, #tpu.memory_space<vmem>>, vector<1x4x1x1x8xf32>
    %16 = vector.shape_cast %15 : vector<1x4x1x1x8xf32> to vector<4x8xf32>
    %17 = vector.shape_cast %14 : vector<4x8xf32> to vector<1x4x1x1x8xf32>
    tpu.vector_store %arg5[%c0_8, %c0_9, %c0_10, %c0_11, %c0_12], %17 {strides = array<i32>} : memref<1x4x1x8x8xf32, #tpu.memory_space<vmem>>, vector<1x4x1x1x8xf32>,
    %18 = vector.extract_strided_slice %13 {offsets = [0, 12], sizes = [4, 8], strides = [1, 1]} : vector<4x92xf32> to vector<4x8xf32>
    %c0_13 = arith.constant 0 : index
    %c0_14 = arith.constant 0 : index
    %c0_15 = arith.constant 0 : index
    %c1 = arith.constant 1 : index
    %c0_16 = arith.constant 0 : index
    %19 = vector.load %arg5[%c0_13, %c0_14, %c0_15, %c1, %c0_16] : memref<1x4x1x8x8xf32, #tpu.memory_space<vmem>>, vector<1x4x1x1x8xf32>
    %20 = vector.shape_cast %19 : vector<1x4x1x1x8xf32> to vector<4x8xf32>
    %21 = vector.shape_cast %18 : vector<4x8xf32> to vector<1x4x1x1x8xf32>
    tpu.vector_store %arg5[%c0_13, %c0_14, %c0_15, %c1, %c0_16], %21 {strides = array<i32>} : memref<1x4x1x8x8xf32, #tpu.memory_space<vmem>>, vector<1x4x1x1x8xf32>,
    %22 = vector.extract_strided_slice %13 {offsets = [0, 24], sizes = [4, 8], strides = [1, 1]} : vector<4x92xf32> to vector<4x8xf32>
    %c0_17 = arith.constant 0 : index
    %c0_18 = arith.constant 0 : index
    %c0_19 = arith.constant 0 : index
    %c2 = arith.constant 2 : index
    %c0_20 = arith.constant 0 : index
    %23 = vector.load %arg5[%c0_17, %c0_18, %c0_19, %c2, %c0_20] : memref<1x4x1x8x8xf32, #tpu.memory_space<vmem>>, vector<1x4x1x1x8xf32>
    %24 = vector.shape_cast %23 : vector<1x4x1x1x8xf32> to vector<4x8xf32>
    %25 = vector.shape_cast %22 : vector<4x8xf32> to vector<1x4x1x1x8xf32>
    tpu.vector_store %arg5[%c0_17, %c0_18, %c0_19, %c2, %c0_20], %25 {strides = array<i32>} : memref<1x4x1x8x8xf32, #tpu.memory_space<vmem>>, vector<1x4x1x1x8xf32>,
    %26 = vector.extract_strided_slice %13 {offsets = [0, 36], sizes = [4, 8], strides = [1, 1]} : vector<4x92xf32> to vector<4x8xf32>
    %c0_21 = arith.constant 0 : index
    %c0_22 = arith.constant 0 : index
    %c0_23 = arith.constant 0 : index
    %c3 = arith.constant 3 : index
    %c0_24 = arith.constant 0 : index
    %27 = vector.load %arg5[%c0_21, %c0_22, %c0_23, %c3, %c0_24] : memref<1x4x1x8x8xf32, #tpu.memory_space<vmem>>, vector<1x4x1x1x8xf32>
    %28 = vector.shape_cast %27 : vector<1x4x1x1x8xf32> to vector<4x8xf32>
    %29 = vector.shape_cast %26 : vector<4x8xf32> to vector<1x4x1x1x8xf32>
    tpu.vector_store %arg5[%c0_21, %c0_22, %c0_23, %c3, %c0_24], %29 {strides = array<i32>} : memref<1x4x1x8x8xf32, #tpu.memory_space<vmem>>, vector<1x4x1x1x8xf32>,
    %30 = vector.extract_strided_slice %13 {offsets = [0, 48], sizes = [4, 8], strides = [1, 1]} : vector<4x92xf32> to vector<4x8xf32>
    %c0_25 = arith.constant 0 : index
    %c0_26 = arith.constant 0 : index
    %c0_27 = arith.constant 0 : index
    %c4 = arith.constant 4 : index
    %c0_28 = arith.constant 0 : index
    %31 = vector.load %arg5[%c0_25, %c0_26, %c0_27, %c4, %c0_28] : memref<1x4x1x8x8xf32, #tpu.memory_space<vmem>>, vector<1x4x1x1x8xf32>
    %32 = vector.shape_cast %31 : vector<1x4x1x1x8xf32> to vector<4x8xf32>
    %33 = vector.shape_cast %30 : vector<4x8xf32> to vector<1x4x1x1x8xf32>
    tpu.vector_store %arg5[%c0_25, %c0_26, %c0_27, %c4, %c0_28], %33 {strides = array<i32>} : memref<1x4x1x8x8xf32, #tpu.memory_space<vmem>>, vector<1x4x1x1x8xf32>,
    %34 = vector.extract_strided_slice %13 {offsets = [0, 60], sizes = [4, 8], strides = [1, 1]} : vector<4x92xf32> to vector<4x8xf32>
    %c0_29 = arith.constant 0 : index
    %c0_30 = arith.constant 0 : index
    %c0_31 = arith.constant 0 : index
    %c5 = arith.constant 5 : index
    %c0_32 = arith.constant 0 : index
    %35 = vector.load %arg5[%c0_29, %c0_30, %c0_31, %c5, %c0_32] : memref<1x4x1x8x8xf32, #tpu.memory_space<vmem>>, vector<1x4x1x1x8xf32>
    %36 = vector.shape_cast %35 : vector<1x4x1x1x8xf32> to vector<4x8xf32>
    %37 = vector.shape_cast %34 : vector<4x8xf32> to vector<1x4x1x1x8xf32>
    tpu.vector_store %arg5[%c0_29, %c0_30, %c0_31, %c5, %c0_32], %37 {strides = array<i32>} : memref<1x4x1x8x8xf32, #tpu.memory_space<vmem>>, vector<1x4x1x1x8xf32>,
    %38 = vector.extract_strided_slice %13 {offsets = [0, 72], sizes = [4, 8], strides = [1, 1]} : vector<4x92xf32> to vector<4x8xf32>
    %c0_33 = arith.constant 0 : index
    %c0_34 = arith.constant 0 : index
    %c0_35 = arith.constant 0 : index
    %c6 = arith.constant 6 : index
    %c0_36 = arith.constant 0 : index
    %39 = vector.load %arg5[%c0_33, %c0_34, %c0_35, %c6, %c0_36] : memref<1x4x1x8x8xf32, #tpu.memory_space<vmem>>, vector<1x4x1x1x8xf32>
    %40 = vector.shape_cast %39 : vector<1x4x1x1x8xf32> to vector<4x8xf32>
    %41 = vector.shape_cast %38 : vector<4x8xf32> to vector<1x4x1x1x8xf32>
    tpu.vector_store %arg5[%c0_33, %c0_34, %c0_35, %c6, %c0_36], %41 {strides = array<i32>} : memref<1x4x1x8x8xf32, #tpu.memory_space<vmem>>, vector<1x4x1x1x8xf32>,
    %42 = vector.extract_strided_slice %13 {offsets = [0, 84], sizes = [4, 8], strides = [1, 1]} : vector<4x92xf32> to vector<4x8xf32>
    %c0_37 = arith.constant 0 : index
    %c0_38 = arith.constant 0 : index
    %c0_39 = arith.constant 0 : index
    %c7 = arith.constant 7 : index
    %c0_40 = arith.constant 0 : index
    %43 = vector.load %arg5[%c0_37, %c0_38, %c0_39, %c7, %c0_40] : memref<1x4x1x8x8xf32, #tpu.memory_space<vmem>>, vector<1x4x1x1x8xf32>
    %44 = vector.shape_cast %43 : vector<1x4x1x1x8xf32> to vector<4x8xf32>
    %45 = vector.shape_cast %42 : vector<4x8xf32> to vector<1x4x1x1x8xf32>
    tpu.vector_store %arg5[%c0_37, %c0_38, %c0_39, %c7, %c0_40], %45 {strides = array<i32>} : memref<1x4x1x8x8xf32, #tpu.memory_space<vmem>>, vector<1x4x1x1x8xf32>,
    return
  }
  func.func @transform_0(%arg0: i32, %arg1: i32) -> (i32, i32, i32, i32) {
    %c0_i32 = arith.constant 0 : i32
    %c0_i32_0 = arith.constant 0 : i32
    %c0_i32_1 = arith.constant 0 : i32
    return %arg0, %arg1, %c0_i32, %c0_i32_0 : i32, i32, i32, i32
  }
  func.func @transform_1(%arg0: i32, %arg1: i32) -> (i32, i32) {
    %c0_i32 = arith.constant 0 : i32
    %c0_i32_0 = arith.constant 0 : i32
    %c0_i32_1 = arith.constant 0 : i32
    return %c0_i32, %c0_i32_0 : i32, i32
  }
  func.func @transform_2(%arg0: i32, %arg1: i32) -> (i32, i32) {
    %c0_i32 = arith.constant 0 : i32
    %c0_i32_0 = arith.constant 0 : i32
    %c0_i32_1 = arith.constant 0 : i32
    return %c0_i32, %c0_i32_0 : i32, i32
  }
  func.func @transform_3(%arg0: i32, %arg1: i32) -> (i32, i32, i32, i32, i32) {
    %c0_i32 = arith.constant 0 : i32
    %c0_i32_0 = arith.constant 0 : i32
    %c0_i32_1 = arith.constant 0 : i32
    %c0_i32_2 = arith.constant 0 : i32
    return %arg0, %c0_i32, %arg1, %c0_i32_0, %c0_i32_1 : i32, i32, i32, i32, i32
  }
}

</mosaic_0001>

<bundles_post_ra>
// kernel: luconv_forward.3
= control target key start
LH: loop header
LB: loop body
LE: loop exit
PB: predicated region body
PF: predicated region fallthrough
CT: control target
= control target key end

     0   :  { %8 = vsyncpa [#allocation3], 0  ;;  %s873_s0 = inlined_call_operand.vmem [shape: f32[2,8,4,92], index: 0, kind: input, shape index: {}]   ;;  %s874_s1 = inlined_call_operand.vmem [shape: f32[4,1], index: 1, kind: input, shape index: {}]   ;;  %s875_s2 = inlined_call_operand.vmem [shape: f32[4,1], index: 2, kind: input, shape index: {}]   ;;  %s876_s3 = inlined_call_operand.hbm [shape: f32[2,4,8,8,8], index: 3, kind: output, shape index: {}]  }
   0x1   :  { %10 = vsyncpa [#allocation3 + $0x1], 0  ;;  %s666_s12 = smov 0   ;;  %s668_s13 = smov 0  }
   0x2   :  { %s670_s14 = smov 0   ;;  %s672_s15 = smov 0  }
   0x3   :  { %s674_s16 = smov 0   ;;  %s676_s17 = smov 0  }
   0x4   :  { %s678_s18 = smov 0   ;;  %s680_s19 = smov 0  }
   0x5 LB: > { %s440_s20 = sadd.s32 4294967295, %s633_s19   ;;  %s441_s21 = sadd.s32 4294967294, %s633_s19   ;;  %s633_s19 = sphi %s680_s19, %s16_s19   ;;  %s629_s18 = sphi %s678_s18, %s885_s18   ;;  %s625_s17 = sphi %s676_s17, %s884_s17   ;;  %s621_s16 = sphi %s674_s16, %s883_s16   ;;  %s617_s15 = sphi %s672_s15, %s882_s15   ;;  %s613_s14 = sphi %s670_s14, %s881_s14   ;;  %s609_s13 = sphi %s668_s13, %s880_s13   ;;  %s605_s12 = sphi %s666_s12, %s879_s12  }
   0x6   : > { %s25_s22 = sadd.s32 1, %s625_s17  ;;  %s28_s23 = sadd.s32 1, %s629_s18 }
   0x7   : > { %p26_p0 = scmp.ge.s32.totalorder %s25_s22, 8  ;;  %p117_p1 = scmp.ne.s32.totalorder %s613_s14, %s609_s13 }
   0x8   : > { %p118_p2 = scmp.eq.s32.totalorder %s440_s20, 15  ;;  %p123_p5 = scmp.ne.s32.totalorder %s609_s13, %s605_s12 }
   0x9   : > { %s887_s22 = smov (%p26_p0, %s25_s22), 0  ;;  %s889_s23 = smov (!%p26_p0, %s28_s23), %s629_s18 }
   0xa   : > { %s103_s24 = ssub.s32 %s625_s17, %s887_s22  ;;  %p717_p3 = por %p118_p2, %p117_p1 }
   0xb   : > { %p30_p4 = scmp.ge.s32.totalorder %s889_s23, 2  ;;  %p124_p6 = scmp.eq.s32.totalorder %s441_s21, 15 }
   0xc   : > { %p444_p7 = scmp.ge.s32.totalorder %s633_s19, 1  ;;  %p159_p9 = scmp.lt.s32.totalorder %s633_s19, 17 }
   0xd   : > { %s891_s23 = smov (%p30_p4, %s889_s23), 0  ;;  %p726_p8 = por %p124_p6, %p123_p5 }
   0xe   : > { %s102_s27 = ssub.s32 %s629_s18, %s891_s23  ;;  %s107_s28 = sadd.s32 1, %s613_s14 }
   0xf   : > { %s104_s29 = sor.u32 %s103_s24, %s102_s27  ;;  %p160_p10 = pnand %p444_p7, %p159_p9 }
  0x10   : > { %p105_p11 = scmp.eq.s32.totalorder %s104_s29, 0  ;;  %p186_p12 = scmp.lt.s32.totalorder (!%p160_p10), %s621_s16, 1 }
  0x11   : > { %163 = sbr.rel (%p160_p10) target bundleno = 356 (0x164), region = 32  ;;  %p188_p13 = scmp.lt.s32.totalorder (!%p160_p10), %s617_s15, 7 }
  0x12   : > { %s735_s30 = scalar_select %p105_p11, %s613_s14, %s107_s28  }
  0x13   : > { %s183_s28 = sand.u32 (!%p160_p10), 1, %s609_s13   ;;  %s636_s5 = smov (!%p160_p10), 80  }
  0x14   : > { %s445_s29 = sshll.u32 (!%p160_p10), %s183_s28, 5  ;;  %s637_s6 = smov (!%p160_p10), 104  }
  0x15   : > { %s753_s4 = scalar_lea.vmem (!%p160_p10), [#allocation2], %s445_s29  ;;  %s638_s7 = smov (!%p160_p10), 116  }
  0x16   : > { %v195_v0 = vld [vmem:[%s874_s1] sm:$0xf]  ;;  %v635_v1 = vmov 0   ;;  %s187_s8 = scalar_select %p186_p12, %s621_s16, 1  ;;  %vm221_vm0 = vcmask 57344  }
  0x17   : > { %536 = vset.pattern.permute.xlu0 %v635_v1  ;;  %v202_v2 = vld [vmem:[%s875_s2] sm:$0xf]  ;;  %s189_s9 = scalar_select %p188_p13, %s617_s15, 7 }
  0x18   : > { %198 = vperm.xlu0 %536, %v195_v0   ;;  %s446_s10 = sshll.u32 %s187_s8, 3  ;;  %s639_s8 = smov 44  }
  0x19   : > { %s191_s11 = sadd.s32 %s446_s10, %s189_s9  ;;  %s640_s9 = smov 68  }
  0x1a   : > { %s447_s20 = sshll.u32 %s191_s11, 2  ;;  %s641_s10 = smov 92  }
  0x1b   : > { %s193_s27 = scalar_lea.vmem %s873_s0, %s447_s20  ;;  %s642_s11 = smov 56  }
  0x1c   : > { %v194_v4 = vld [vmem:[%s193_s27] sm:$0xf]  ;;  %s450_s20 = sshll.u32 %s621_s16, 5  ;;  %s343_s16 = scalar_lea.sflag [#allocation3], %s183_s28 }
  0x1d   : > { %s353_s21 = sadd.s32 %s617_s15, %s450_s20 }
  0x1e   : > { %s451_s24 = sshll.u32 %s353_s21, 3 }
  0x20   : > { %205 = vperm.xlu0 %536, %v202_v2  }
  0x8a   : > { %v199_v3 = vpop.permute.xlu0 %198 }
  0x8b   : > { %v201_v5 = vmul.f32 %v199_v3, %v194_v4 }
  0x92   : > { %v206_v6 = vpop.permute.xlu0 %205 }
  0x93   : > { %v208_v7 = vadd.f32 %v206_v6, %v201_v5 }
  0x95   : > { %v210_v8 = vmul.f32 1.442695, %v208_v7  ;;  %vm209_vm1 = vcmp.gt.f32.partialorder %v208_v7, 0.0 }
  0x97   : > { %537 = vpow2.f32 %v210_v8 }
  0x9d   : > { %v538_v9 = vpop.eup %537 }
  0x9e   : > { %v448_v10 = vadd.f32 -1.0, %v538_v9 }
  0xa0   : > { %v213_v11 = vsel %vm209_vm1, %v208_v7, %v448_v10 }
  0xa1   : > { %v215_v12 = vrot.slane %v213_v11, 1  ;;  %v216_v13 = vrot.slane %v213_v11, 2  ;;  %v217_v14 = vrot.slane %v213_v11, 3  ;;  %222 = vst.msk [vmem:[%s753_s4] sm:$0x1] %vm221_vm0, %v213_v11  ;;  %v226_v15 = vperm.slane %v213_v11, 0 }
  0xa3   : > { %223 = vst.msk [vmem:[%s753_s4 + $0x8] sm:$0x1] %vm221_vm0, %v215_v12  ;;  %278 = vrot.lane.b32.xlu2 %v226_v15, %s636_s5  ;;  %246 = vrot.lane.b32.xlu0 %v226_v15, %s637_s6  ;;  %v228_v16 = vperm.slane %v216_v13, 0  ;;  %v229_v17 = vperm.slane %v217_v14, 0  ;;  %v227_v18 = vperm.slane %v215_v12, 0 }
  0xa4   : > { %224 = vst.msk [vmem:[%s753_s4 + $0x10] sm:$0x1] %vm221_vm0, %v216_v13  ;;  %230 = vrot.lane.b32.xlu1 %v226_v15, %s638_s7 }
  0xa5   : > { %225 = vst.msk [vmem:[%s753_s4 + $0x18] sm:$0x1] %vm221_vm0, %v217_v14 }
  0xab   : > { %326 = vrot.lane.b32.xlu2 %v226_v15, %s639_s8  ;;  %294 = vrot.lane.b32.xlu0 %v226_v15, %s640_s9 }
  0xac   : > { %262 = vrot.lane.b32.xlu1 %v226_v15, %s641_s10 }
  0xb3   : > { %252 = vrot.lane.b32.xlu0 %v229_v17, %s637_s6  ;;  %234 = vrot.lane.b32.xlu2 %v228_v16, %s638_s7 }
  0xb4   : > { %310 = vrot.lane.b32.xlu1 %v226_v15, %s642_s11 }
  0xbb   : > { %266 = vrot.lane.b32.xlu0 %v228_v16, %s641_s10  ;;  %236 = vrot.lane.b32.xlu2 %v229_v17, %s638_s7 }
  0xbc   : > { %232 = vrot.lane.b32.xlu1 %v227_v18, %s638_s7 }
  0xc3   : > { %250 = vrot.lane.b32.xlu2 %v228_v16, %s637_s6  ;;  %280 = vrot.lane.b32.xlu0 %v227_v18, %s636_s5 }
  0xc4   : > { %248 = vrot.lane.b32.xlu1 %v227_v18, %s637_s6  ;;  %s356_s6 = sshll.u32 %s753_s4, 4  ;;  %s357_s6 = int_to_ptr.vmem [resolvable:$true] %s356_s6 }
  0xcb   : > { %300 = vrot.lane.b32.xlu0 %v229_v17, %s640_s9  ;;  %264 = vrot.lane.b32.xlu2 %v227_v18, %s641_s10 }
  0xcc   : > { %268 = vrot.lane.b32.xlu1 %v229_v17, %s641_s10 }
  0xd3   : > { %314 = vrot.lane.b32.xlu0 %v228_v16, %s642_s11  ;;  %284 = vrot.lane.b32.xlu2 %v229_v17, %s636_s5 }
  0xd4   : > { %282 = vrot.lane.b32.xlu1 %v228_v16, %s636_s5  ;;  %s355_s5 = scalar_lea.hbm %s876_s3, %s451_s24 }
  0xd5   : > { %s358_s7 = sshll.u32 %s355_s5, 4  ;;  %s359_s7 = int_to_ptr.hbm [resolvable:$true] %s358_s7 }
  0xdb   : > { %328 = vrot.lane.b32.xlu0 %v227_v18, %s639_s8  ;;  %298 = vrot.lane.b32.xlu2 %v228_v16, %s640_s9 }
  0xdc   : > { %296 = vrot.lane.b32.xlu1 %v227_v18, %s640_s9 }
  0xe3   : > { %312 = vrot.lane.b32.xlu2 %v227_v18, %s642_s11 }
  0xe4   : > { %316 = vrot.lane.b32.xlu1 %v229_v17, %s642_s11  ;;  %s559_s11 = scalar_lea.hbm %s876_s3, 512 }
  0xeb   : > { %332 = vrot.lane.b32.xlu2 %v229_v17, %s639_s8 }
  0xec   : > { %330 = vrot.lane.b32.xlu1 %v228_v16, %s639_s8  ;;  %s553_s8 = sshra.s32 %s359_s7, 4  ;;  %s554_s8 = int_to_ptr.hbm [resolvable:$true] %s553_s8 }
  0xed   : > { %s555_s15 = scalar_lea.hbm %s554_s8, 32  ;;  %p560_p4 = scmp.lt.s32.totalorder %s554_s8, %s876_s3 }
  0xee   : > { %p556_p0 = scmp.ne.s32.totalorder %s554_s8, %s555_s15  ;;  %p561_p5 = scmp.lt.s32.totalorder %s559_s11, %s555_s15 }
  0xf0   : > { %p557_p1 = pnand %p556_p0, %p717_p3  ;;  %p562_p6 = por %p561_p5, %p560_p4 }
  0xf2   : > { %p558_p2 = pneg %p557_p1 }
  0xf4   : > { %p563_p7 = pnand %p562_p6, %p558_p2 }
  0xfd   : > { %v279_v19 = vpop.permute.xlu2 %278 }
  0xfe   : > { %290 = vst.msk [vmem:[%s753_s4 + $0x4] sm:$0x1] %vm221_vm0, %v279_v19 }
 0x105   : > { %v327_v20 = vpop.permute.xlu2 %326 }
 0x106   : > { %338 = vst.msk [vmem:[%s753_s4 + $0x7] sm:$0x1] %vm221_vm0, %v327_v20 }
 0x10d   : > { %v235_v21 = vpop.permute.xlu2 %234 }
 0x10e   : > { %244 = vst.msk [vmem:[%s753_s4 + $0x11] sm:$0x1] %vm221_vm0, %v235_v21 }
 0x115   : > { %v247_v22 = vpop.permute.xlu0 %246  ;;  %v237_v23 = vpop.permute.xlu2 %236 }
 0x116   : > { %258 = vst.msk [vmem:[%s753_s4 + $0x2] sm:$0x1] %vm221_vm0, %v247_v22  ;;  %v231_v24 = vpop.permute.xlu1 %230 }
 0x117   : > { %242 = vst.msk [vmem:[%s753_s4 + $0x1] sm:$0x1] %vm221_vm0, %v231_v24 }
 0x118   : > { %245 = vst.msk [vmem:[%s753_s4 + $0x19] sm:$0x1] %vm221_vm0, %v237_v23 }
 0x11d   : > { %v295_v25 = vpop.permute.xlu0 %294  ;;  %v251_v26 = vpop.permute.xlu2 %250 }
 0x11e   : > { %306 = vst.msk [vmem:[%s753_s4 + $0x5] sm:$0x1] %vm221_vm0, %v295_v25  ;;  %v263_v27 = vpop.permute.xlu1 %262 }
 0x11f   : > { %274 = vst.msk [vmem:[%s753_s4 + $0x3] sm:$0x1] %vm221_vm0, %v263_v27 }
 0x120   : > { %260 = vst.msk [vmem:[%s753_s4 + $0x12] sm:$0x1] %vm221_vm0, %v251_v26 }
 0x125   : > { %v253_v28 = vpop.permute.xlu0 %252  ;;  %v265_v29 = vpop.permute.xlu2 %264 }
 0x126   : > { %v311_v30 = vpop.permute.xlu1 %310  ;;  %261 = vst.msk [vmem:[%s753_s4 + $0x1a] sm:$0x1] %vm221_vm0, %v253_v28 }
 0x127   : > { %322 = vst.msk [vmem:[%s753_s4 + $0x6] sm:$0x1] %vm221_vm0, %v311_v30 }
 0x128   : > { %275 = vst.msk [vmem:[%s753_s4 + $0xb] sm:$0x1] %vm221_vm0, %v265_v29 }
 0x12d   : > { %v267_v31 = vpop.permute.xlu0 %266  ;;  %v285_v32 = vpop.permute.xlu2 %284 }
 0x12e   : > { %276 = vst.msk [vmem:[%s753_s4 + $0x13] sm:$0x1] %vm221_vm0, %v267_v31  ;;  %v233_v33 = vpop.permute.xlu1 %232 }
 0x12f   : > { %293 = vst.msk [vmem:[%s753_s4 + $0x1c] sm:$0x1] %vm221_vm0, %v285_v32 }
 0x130   : > { %243 = vst.msk [vmem:[%s753_s4 + $0x9] sm:$0x1] %vm221_vm0, %v233_v33 }
 0x135   : > { %v281_v34 = vpop.permute.xlu0 %280  ;;  %v299_v35 = vpop.permute.xlu2 %298 }
 0x136   : > { %291 = vst.msk [vmem:[%s753_s4 + $0xc] sm:$0x1] %vm221_vm0, %v281_v34  ;;  %v249_v36 = vpop.permute.xlu1 %248 }
 0x137   : > { %308 = vst.msk [vmem:[%s753_s4 + $0x15] sm:$0x1] %vm221_vm0, %v299_v35 }
 0x138   : > { %259 = vst.msk [vmem:[%s753_s4 + $0xa] sm:$0x1] %vm221_vm0, %v249_v36 }
 0x13d   : > { %v301_v37 = vpop.permute.xlu0 %300  ;;  %v313_v38 = vpop.permute.xlu2 %312 }
 0x13e   : > { %309 = vst.msk [vmem:[%s753_s4 + $0x1d] sm:$0x1] %vm221_vm0, %v301_v37  ;;  %v269_v39 = vpop.permute.xlu1 %268 }
 0x13f   : > { %323 = vst.msk [vmem:[%s753_s4 + $0xe] sm:$0x1] %vm221_vm0, %v313_v38 }
 0x140   : > { %277 = vst.msk [vmem:[%s753_s4 + $0x1b] sm:$0x1] %vm221_vm0, %v269_v39 }
 0x145   : > { %v315_v40 = vpop.permute.xlu0 %314  ;;  %v333_v41 = vpop.permute.xlu2 %332 }
 0x146   : > { %324 = vst.msk [vmem:[%s753_s4 + $0x16] sm:$0x1] %vm221_vm0, %v315_v40  ;;  %v283_v42 = vpop.permute.xlu1 %282 }
 0x147   : > { %341 = vst.msk [vmem:[%s753_s4 + $0x1f] sm:$0x1] %vm221_vm0, %v333_v41 }
 0x148   : > { %292 = vst.msk [vmem:[%s753_s4 + $0x14] sm:$0x1] %vm221_vm0, %v283_v42 }
 0x14d   : > { %v329_v43 = vpop.permute.xlu0 %328 }
 0x14e   : > { %339 = vst.msk [vmem:[%s753_s4 + $0xf] sm:$0x1] %vm221_vm0, %v329_v43  ;;  %v297_v44 = vpop.permute.xlu1 %296 }
 0x14f   : > { %307 = vst.msk [vmem:[%s753_s4 + $0xd] sm:$0x1] %vm221_vm0, %v297_v44 }
 0x156   : > { %v317_v45 = vpop.permute.xlu1 %316 }
 0x157   : > { %325 = vst.msk [vmem:[%s753_s4 + $0x1e] sm:$0x1] %vm221_vm0, %v317_v45 }
 0x15e   : > { %v331_v46 = vpop.permute.xlu1 %330 }
 0x15f   : > { %340 = vst.msk [vmem:[%s753_s4 + $0x17] sm:$0x1] %vm221_vm0, %v331_v46 }
 0x160   : > { %566 = shalt.err (!%p563_p7)
}
 0x161   : > { %s643_s28 = smov 128   ;;  %s644_s4 = smov 1024  }
 0x162   : > { %s645_s24 = smov 8  }
 0x163   : > { %454 = dma.vmem_to_hbm [thread:$0]  (%p717_p3), %s357_s6, 512, %s359_s7, %s343_s16, %s643_s28, %s644_s4, %s645_s24  }
 0x164 PF: > { %p460_p9 = scmp.ge.s32.totalorder %s633_s19, 2  ;;  %s373_s27 = sand.u32 1, %s605_s12  }
 0x165   : > { %s374_s29 = scalar_lea.sflag [#allocation3], %s373_s27 }
 0x166   : > { %p457_p10 = pnand %p460_p9, %p726_p8 }
 0x168   : > { %p458_p11 = pneg %p457_p10 }
 0x16a   : > { %600 = dma.done.wait (%p458_p11), %s374_s29, 512  }
 0x16b   : > { %602 = vsyncadd (%p458_p11), %s374_s29, 4294966784  ;;  %s16_s19 = sadd.s32 1, %s633_s19   ;;  %s879_s12 = smov %s609_s13 }
 0x16c   : > { %p13_p12 = scmp.ge.s32.totalorder %s16_s19, 18   ;;  %s880_s13 = smov %s613_s14 }
 0x16d   : > { %s881_s14 = smov %s735_s30  ;;  %s882_s15 = smov %s625_s17 }
 0x16e   : > { %s883_s16 = smov %s629_s18  ;;  %s884_s17 = smov %s887_s22 }
 0x16f   : > { %s885_s18 = smov %s891_s23  ;;  %15 = sbr.rel (!%p13_p12) target bundleno = 5 (0x5), region = 67 }
 0x174   :  { %380 = vsyncpa [#allocation3], 1 }
 0x175   :  { %382 = vsyncpa [#allocation3 + $0x1], 1 }

// kernel: luconv_forward.2
= control target key start
LH: loop header
LB: loop body
LE: loop exit
PB: predicated region body
PF: predicated region fallthrough
CT: control target
= control target key end

     0   :  { %s5550_s27 = smov 0   ;;  %s5552_s28 = smov 0   ;;  %s6911_s0 = inlined_call_operand.vmem [shape: f32[4,500], index: 0, kind: input, shape index: {}]   ;;  %s6912_s1 = inlined_call_operand.vmem [shape: f32[1,92], index: 1, kind: input, shape index: {}]   ;;  %s6913_s2 = inlined_call_operand.vmem [shape: f32[2,12,4,144], index: 2, kind: input, shape index: {}, may-alias: {2,3,4,5,6}]   ;;  %s6914_s3 = inlined_call_operand.vmem [shape: f32[2,12,4,144], index: 3, kind: input, shape index: {}, may-alias: {2,3,4,5,6}]   ;;  %s6915_s4 = inlined_call_operand.vmem [shape: f32[2,12,4,144], index: 4, kind: input, shape index: {}, may-alias: {2,3,4,5,6}]   ;;  %s6916_s5 = inlined_call_operand.vmem [shape: f32[2,12,4,144], index: 5, kind: input, shape index: {}, may-alias: {2,3,4,5,6}]   ;;  %s6917_s6 = inlined_call_operand.vmem [shape: f32[2,12,4,144], index: 6, kind: input, shape index: {}, may-alias: {2,3,4,5,6}]   ;;  %s6918_s7 = inlined_call_operand.vmem [shape: f32[2,8,4,92], index: 7, kind: output, shape index: {0}]   ;;  %s6919_s8 = inlined_call_operand.vmem [shape: f32[2,8,4,2], index: 8, kind: output, shape index: {1}]  }
   0x1   :  { %7040 = sst [smem:[#allocation61_spill]] %s6911_s0  ;;  %s5554_s29 = smov 0  }
   0x2   :  { %7041 = sst [smem:[#allocation62_spill]] %s6912_s1  ;;  %s5556_s30 = smov 0  }
   0x3   :  { %7042 = sst [smem:[#allocation63_spill]] %s6913_s2  ;;  %s5558_s9 = smov 0  }
   0x4   :  { %7043 = sst [smem:[#allocation64_spill]] %s6914_s3 }
   0x5   :  { %7044 = sst [smem:[#allocation65_spill]] %s6915_s4 }
   0x6   :  { %7045 = sst [smem:[#allocation66_spill]] %s6916_s5 }
   0x7   :  { %7046 = sst [smem:[#allocation67_spill]] %s6917_s6 }
   0x8   :  { %7047 = sst [smem:[#allocation68_spill]] %s6918_s7 }
   0x9   :  { %7048 = sst [smem:[#allocation69_spill]] %s6919_s8 }
   0xa LB: > { %7049 = sst [smem:[#allocation2_spill]] %s5441_s27  ;;  %s28_s10 = sadd.s32 1, %s5449_s29  ;;  %s5457_s9 = sphi %s5558_s9, %s19_s9   ;;  %s5453_s30 = sphi %s5556_s30, %s7267_s30   ;;  %s5449_s29 = sphi %s5554_s29, %s7266_s29   ;;  %s5445_s28 = sphi %s5552_s28, %s7265_s28   ;;  %s5441_s27 = sphi %s5550_s27, %s7264_s27  }
   0xb   : > { %7050 = sst [smem:[#allocation3_spill]] %s5449_s29  ;;  %s31_s11 = sadd.s32 1, %s5453_s30 }
   0xc   : > { %7051 = sst [smem:[#allocation4_spill]] %s5453_s30  ;;  %p29_p0 = scmp.ge.s32.totalorder %s28_s10, 8 }
   0xd   : > { %7052 = sst [smem:[#allocation5_spill]] %s5457_s9  ;;  %p5064_p1 = scmp.ge.s32.totalorder %s5457_s9, 1 }
   0xe   : > { %p367_p2 = scmp.lt.s32.totalorder %s5457_s9, 17  ;;  %s7269_s10 = smov (%p29_p0, %s28_s10), 0 }
   0xf   : > { %7053 = sst [smem:[#allocation6_spill]] %s7269_s10  ;;  %s7271_s11 = smov (!%p29_p0, %s31_s11), %s5453_s30 }
  0x10   : > { %p368_p3 = pnand %p5064_p1, %p367_p2  ;;  %p33_p4 = scmp.ge.s32.totalorder %s7271_s11, 2 }
  0x12   : > { %s7273_s11 = smov (%p33_p4, %s7271_s11), 0  ;;  %371 = sbr.rel (%p368_p3) target bundleno = 2343 (0x927), region = 48 }
  0x13   : > { %7054 = sst [smem:[#allocation7_spill]] %s7273_s11 }
  0x17   : > { %s7055_s0 = sld [smem:[#allocation61_spill]]  ;;  %p456_p5 = scmp.lt.s32.totalorder %s5445_s28, 1  ;;  %vm545_vm0 = vcmask 1043456   ;;  %vm542_vm1 = vcmask 31744   ;;  %vm1065_vm2 = vcmask 744448   ;;  %vm1141_vm3 = vcmask 728064  }
  0x18   : > { %p458_p6 = scmp.lt.s32.totalorder %s5441_s27, 11  ;;  %s7058_s2 = sld [smem:[#allocation63_spill]]  ;;  %vm1103_vm4 = vcmask 736256   ;;  %vm1179_vm5 = vcmask 719872   ;;  %vm1217_vm6 = vcmask 654336   ;;  %vm1293_vm7 = vcmask 637952  }
  0x19   : > { %s7275_s28 = smov (!%p456_p5, %s5445_s28), 1  ;;  %s7002_s22 = smov 124   ;;  %vm1255_vm8 = vcmask 646144   ;;  %vm1331_vm9 = vcmask 629760   ;;  %vm1369_vm10 = vcmask 621568   ;;  %vm4826_vm11 = vcmask 748544  }
  0x1a   : > { %7056 = sst [smem:[#allocation8_spill]] %s7275_s28  ;;  %s5593_s15 = smul.u32 24, %s7275_s28  ;;  %vm4835_vm12 = vcmask 7168   ;;  %vm4837_vm13 = vcmask 11264  }
  0x1b   : > { %s459_s14 = scalar_select %p458_p6, %s5441_s27, 11 }
  0x1c   : > { %7057 = sst [smem:[#allocation9_spill]] %s5593_s15  ;;  %s7008_s23 = smov 127  }
  0x1d   : > { %v5585_v0 = vld [vmem:[%s7055_s0] sm:$0xff]  ;;  %s5065_s16 = sshll.u32 %s459_s14, 1  ;;  %s6922_s24 = smov 120  }
  0x1e   : > { %533 = vst [vmem:[#allocation1] ss:$2 sm:$0xff] %v5585_v0  ;;  %s462_s17 = sadd.s32 %s5593_s15, %s5065_s16  ;;  %s7006_s25 = smov 126  }
  0x1f   : > { %s5066_s18 = sshll.u32 %s462_s17, 2  ;;  %s6986_s26 = smov 116  }
  0x20   : > { %s464_s21 = scalar_lea.vmem %s7058_s2, %s5066_s18  ;;  %s7004_s12 = smov 125  }
  0x21   : > { %v5600_v2 = vld [vmem:[%s464_s21] sm:$0xff]  ;;  %s6928_s13 = smov 112   ;;  %s6920_s14 = smov 108  }
  0x22   : > { %s6930_s16 = smov 104   ;;  %s6984_s17 = smov 115   ;;  %5081 = vmatpush.msk.msra.mxu1 %vm545_vm0, %v5600_v2 }
  0x23   : > { %s6982_s18 = smov 100   ;;  %s6936_s19 = smov 114   ;;  %5082 = vmatmul.msk.f32.vlgmr.msra.gmra.mxu1 %vm542_vm1, %v5585_v0 }
  0x24   : > { %s6924_s20 = smov 96   ;;  %s6926_s21 = smov 113  }
  0x25   : > { %v534_v1 = vld.sshfl [vmem:[#allocation1] sm:$0xff pattern:$0x75316420]  ;;  %s7059_s3 = sld [smem:[#allocation64_spill]]  ;;  %s7076_s2 = smov 91  }
  0x26   : > { %535 = vrot.lane.b32.xlu0 %v534_v1, %s7002_s22  ;;  %538 = vst [vmem:[#allocation1] ss:$2 sm:$0xff] %v5600_v2  ;;  %s7078_s11 = smov 90   ;;  %s7079_s10 = smov 84  }
  0x27   : > { %s7080_s30 = smov 89   ;;  %s7081_s29 = smov 80  }
  0x28   : > { %s7082_s9 = smov 76   ;;  %s7083_s8 = smov 72  }
  0x29   : > { %s7084_s7 = smov 79   ;;  %s7085_s1 = smov 68  }
  0x2a   : > { %s7086_s28 = smov 78   ;;  %s7087_s6 = smov 64  }
  0x2b   : > { %s7089_s5 = smov 60   ;;  %s7091_s4 = sld [smem:[#allocation65_spill]] }
  0x2d   : > { %v539_v3 = vld.sshfl [vmem:[#allocation1] sm:$0xff pattern:$0x75316420] }
  0x2e   : > { %592 = vst [vmem:[#allocation1] ss:$2 sm:$0xff] %v5585_v0  ;;  %540 = vrot.lane.b32.xlu0 %v539_v3, %s7008_s23 }
  0x35   : > { %v593_v4 = vld.sshfl [vmem:[#allocation1] sm:$0xff pattern:$0x75316420] }
  0x36   : > { %594 = vrot.lane.b32.xlu1 %v593_v4, %s6922_s24  ;;  %596 = vst [vmem:[#allocation1] ss:$2 sm:$0xff] %v5600_v2  ;;  %s6978_s24 = smov 88  }
  0x3d   : > { %v597_v5 = vld.sshfl [vmem:[#allocation1] sm:$0xff pattern:$0x75316420] }
  0x3e   : > { %598 = vrot.lane.b32.xlu1 %v597_v5, %s7006_s25  ;;  %625 = vst [vmem:[#allocation1] ss:$2 sm:$0xff] %v5585_v0 }
  0x45   : > { %v626_v6 = vld.sshfl [vmem:[#allocation1] sm:$0xff pattern:$0x75316420] }
  0x46   : > { %629 = vst [vmem:[#allocation1] ss:$2 sm:$0xff] %v5600_v2  ;;  %627 = vrot.lane.b32.xlu2 %v626_v6, %s6986_s26 }
  0x4d   : > { %v630_v7 = vld.sshfl [vmem:[#allocation1] sm:$0xff pattern:$0x75316420] }
  0x4e   : > { %658 = vst [vmem:[#allocation1] ss:$2 sm:$0xff] %v5585_v0  ;;  %631 = vrot.lane.b32.xlu2 %v630_v7, %s7004_s12 }
  0x55   : > { %v659_v8 = vld.sshfl [vmem:[#allocation1] sm:$0xff pattern:$0x75316420] }
  0x56   : > { %660 = vrot.lane.b32.xlu0 %v659_v8, %s6928_s13  ;;  %662 = vst [vmem:[#allocation1] ss:$2 sm:$0xff] %v5600_v2 }
  0x5d   : > { %v663_v9 = vld.sshfl [vmem:[#allocation1] sm:$0xff pattern:$0x75316420] }
  0x5e   : > { %664 = vrot.lane.b32.xlu1 %v663_v9, %s7002_s22  ;;  %691 = vst [vmem:[#allocation1] ss:$2 sm:$0xff] %v5585_v0 }
  0x65   : > { %v692_v10 = vld.sshfl [vmem:[#allocation1] sm:$0xff pattern:$0x75316420] }
  0x66   : > { %695 = vst [vmem:[#allocation1] ss:$2 sm:$0xff] %v5600_v2  ;;  %693 = vrot.lane.b32.xlu2 %v692_v10, %s6920_s14  ;;  %s6948_s14 = smov 92  }
  0x6d   : > { %v696_v11 = vld.sshfl [vmem:[#allocation1] sm:$0xff pattern:$0x75316420] }
  0x6e   : > { %697 = vrot.lane.b32.xlu0 %v696_v11, %s6986_s26  ;;  %724 = vst [vmem:[#allocation1] ss:$2 sm:$0xff] %v5585_v0  ;;  %s6998_s26 = smov 24  }
  0x75   : > { %v725_v12 = vld.sshfl [vmem:[#allocation1] sm:$0xff pattern:$0x75316420] }
  0x76   : > { %726 = vrot.lane.b32.xlu1 %v725_v12, %s6930_s16  ;;  %728 = vst [vmem:[#allocation1] ss:$2 sm:$0xff] %v5600_v2 }
  0x7d   : > { %v729_v13 = vld.sshfl [vmem:[#allocation1] sm:$0xff pattern:$0x75316420] }
  0x7e   : > { %757 = vst [vmem:[#allocation1] ss:$2 sm:$0xff] %v5585_v0  ;;  %730 = vrot.lane.b32.xlu2 %v729_v13, %s6984_s17 }
  0x85   : > { %v758_v14 = vld.sshfl [vmem:[#allocation1] sm:$0xff pattern:$0x75316420] }
  0x86   : > { %759 = vrot.lane.b32.xlu0 %v758_v14, %s6982_s18  ;;  %761 = vst [vmem:[#allocation1] ss:$2 sm:$0xff] %v5600_v2 }
  0x8d   : > { %v762_v15 = vld.sshfl [vmem:[#allocation1] sm:$0xff pattern:$0x75316420] }
  0x8e   : > { %763 = vrot.lane.b32.xlu1 %v762_v15, %s6936_s19  ;;  %790 = vst [vmem:[#allocation1] ss:$2 sm:$0xff] %v5585_v0  ;;  %s6942_s19 = smov 72  }
  0x95   : > { %v791_v16 = vld.sshfl [vmem:[#allocation1] sm:$0xff pattern:$0x75316420] }
  0x96   : > { %794 = vst [vmem:[#allocation1] ss:$2 sm:$0xff] %v5600_v2  ;;  %792 = vrot.lane.b32.xlu2 %v791_v16, %s6924_s20  ;;  %s6932_s20 = smov 84  }
  0x9d   : > { %v795_v17 = vld.sshfl [vmem:[#allocation1] sm:$0xff pattern:$0x75316420] }
  0x9e   : > { %796 = vrot.lane.b32.xlu0 %v795_v17, %s6926_s21  ;;  %823 = vst [vmem:[#allocation1] ss:$2 sm:$0xff] %v5585_v0  ;;  %s6934_s21 = smov 103  }
  0xa5   : > { %v824_v18 = vld.sshfl [vmem:[#allocation1] sm:$0xff pattern:$0x75316420] }
  0xa6   : > { %825 = vrot.lane.b32.xlu1 %v824_v18, %s6948_s14  ;;  %827 = vst [vmem:[#allocation1] ss:$2 sm:$0xff] %v5600_v2 }
  0xad   : > { %v828_v19 = vld.sshfl [vmem:[#allocation1] sm:$0xff pattern:$0x75316420] }
  0xae   : > { %856 = vst [vmem:[#allocation1] ss:$2 sm:$0xff] %v5585_v0  ;;  %829 = vrot.lane.b32.xlu2 %v828_v19, %s6928_s13  ;;  %s6964_s13 = smov 80  }
  0xb5   : > { %v857_v20 = vld.sshfl [vmem:[#allocation1] sm:$0xff pattern:$0x75316420] }
  0xb6   : > { %858 = vrot.lane.b32.xlu0 %v857_v20, %s6978_s24  ;;  %860 = vst [vmem:[#allocation1] ss:$2 sm:$0xff] %v5600_v2 }
  0xbd   : > { %v861_v21 = vld.sshfl [vmem:[#allocation1] sm:$0xff pattern:$0x75316420] }
  0xbe   : > { %862 = vrot.lane.b32.xlu1 %v861_v21, %s6930_s16  ;;  %889 = vst [vmem:[#allocation1] ss:$2 sm:$0xff] %v5585_v0  ;;  %s6938_s16 = smov 102  }
  0xc5   : > { %v890_v22 = vld.sshfl [vmem:[#allocation1] sm:$0xff pattern:$0x75316420] }
  0xc6   : > { %893 = vst [vmem:[#allocation1] ss:$2 sm:$0xff] %v5600_v2  ;;  %891 = vrot.lane.b32.xlu2 %v890_v22, %s6932_s20  ;;  %s7010_s20 = smov 76  }
  0xcd   : > { %v894_v23 = vld.sshfl [vmem:[#allocation1] sm:$0xff pattern:$0x75316420] }
  0xce   : > { %895 = vrot.lane.b32.xlu0 %v894_v23, %s6934_s21  ;;  %922 = vst [vmem:[#allocation1] ss:$2 sm:$0xff] %v5585_v0  ;;  %s6940_s21 = smov 101  }
  0xd5   : > { %v923_v24 = vld.sshfl [vmem:[#allocation1] sm:$0xff pattern:$0x75316420] }
  0xd6   : > { %924 = vrot.lane.b32.xlu1 %v923_v24, %s6964_s13  ;;  %926 = vst [vmem:[#allocation1] ss:$2 sm:$0xff] %v5600_v2 }
  0xdd   : > { %v927_v25 = vld.sshfl [vmem:[#allocation1] sm:$0xff pattern:$0x75316420] }
  0xde   : > { %955 = vst [vmem:[#allocation1] ss:$2 sm:$0xff] %v5585_v0  ;;  %928 = vrot.lane.b32.xlu2 %v927_v25, %s6938_s16  ;;  %s6944_s16 = smov 68  }
  0xe5   : > { %v956_v26 = vld.sshfl [vmem:[#allocation1] sm:$0xff pattern:$0x75316420] }
  0xe6   : > { %957 = vrot.lane.b32.xlu0 %v956_v26, %s7010_s20  ;;  %959 = vst [vmem:[#allocation1] ss:$2 sm:$0xff] %v5600_v2 }
  0xed   : > { %v960_v27 = vld.sshfl [vmem:[#allocation1] sm:$0xff pattern:$0x75316420] }
  0xee   : > { %961 = vrot.lane.b32.xlu1 %v960_v27, %s6940_s21  ;;  %988 = vst [vmem:[#allocation1] ss:$2 sm:$0xff] %v5585_v0  ;;  %s6946_s21 = smov 64  }
  0xf5   : > { %v989_v28 = vld.sshfl [vmem:[#allocation1] sm:$0xff pattern:$0x75316420] }
  0xf6   : > { %992 = vst [vmem:[#allocation1] ss:$2 sm:$0xff] %v5600_v2  ;;  %990 = vrot.lane.b32.xlu2 %v989_v28, %s6942_s19  ;;  %s6952_s19 = smov 91  }
  0xfd   : > { %v993_v29 = vld.sshfl [vmem:[#allocation1] sm:$0xff pattern:$0x75316420] }
  0xfe   : > { %994 = vrot.lane.b32.xlu0 %v993_v29, %s6982_s18  ;;  %1021 = vst [vmem:[#allocation1] ss:$2 sm:$0xff] %v5585_v0  ;;  %s7061_s18 = smov 116  }
 0x105   : > { %v1022_v30 = vld.sshfl [vmem:[#allocation1] sm:$0xff pattern:$0x75316420] }
 0x106   : > { %1023 = vrot.lane.b32.xlu1 %v1022_v30, %s6944_s16  ;;  %1025 = vst [vmem:[#allocation1] ss:$2 sm:$0xff] %v5600_v2  ;;  %s6950_s16 = smov 60  }
 0x10d   : > { %v1026_v31 = vld.sshfl [vmem:[#allocation1] sm:$0xff pattern:$0x75316420] }
 0x10e   : > { %1054 = vst [vmem:[#allocation1] ss:$2 sm:$0xff] %v5585_v0  ;;  %1027 = vrot.lane.b32.xlu2 %v1026_v31, %s6948_s14  ;;  %s6954_s14 = smov 56  }
 0x115   : > { %v1055_v32 = vld.sshfl [vmem:[#allocation1] sm:$0xff pattern:$0x75316420] }
 0x116   : > { %1056 = vrot.lane.b32.xlu0 %v1055_v32, %s6946_s21  ;;  %1058 = vst [vmem:[#allocation1] ss:$2 sm:$0xff] %v5600_v2  ;;  %s6970_s21 = smov 90  }
 0x11d   : > { %v1059_v33 = vld.sshfl [vmem:[#allocation1] sm:$0xff pattern:$0x75316420]  ;;  %v1060_v34 = vld.sshfl [vmem:[#allocation1 + $0x8] sm:$0xff pattern:$0x75316420] }
 0x11e   : > { %1061 = vrot.lane.b32.xlu1 %v1059_v33, %s6952_s19  ;;  %1092 = vst [vmem:[#allocation1] ss:$2 sm:$0xff] %v5585_v0  ;;  %1063 = vrot.lane.b32.xlu2 %v1060_v34, %s6952_s19  ;;  %s6956_s19 = smov 52  }
 0x125   : > { %v1093_v35 = vld.sshfl [vmem:[#allocation1] sm:$0xff pattern:$0x75316420] }
 0x126   : > { %1094 = vrot.lane.b32.xlu0 %v1093_v35, %s6950_s16  ;;  %1096 = vst [vmem:[#allocation1] ss:$2 sm:$0xff] %v5600_v2  ;;  %s6958_s16 = smov 89  }
 0x12d   : > { %v1097_v36 = vld.sshfl [vmem:[#allocation1] sm:$0xff pattern:$0x75316420]  ;;  %v1098_v37 = vld.sshfl [vmem:[#allocation1 + $0x8] sm:$0xff pattern:$0x75316420] }
 0x12e   : > { %1099 = vrot.lane.b32.xlu1 %v1097_v36, %s6970_s21  ;;  %1130 = vst [vmem:[#allocation1] ss:$2 sm:$0xff] %v5585_v0  ;;  %1101 = vrot.lane.b32.xlu2 %v1098_v37, %s6970_s21  ;;  %s6980_s21 = smov 32  }
 0x135   : > { %v1131_v38 = vld.sshfl [vmem:[#allocation1] sm:$0xff pattern:$0x75316420] }
 0x136   : > { %1132 = vrot.lane.b32.xlu0 %v1131_v38, %s6954_s14  ;;  %1134 = vst [vmem:[#allocation1] ss:$2 sm:$0xff] %v5600_v2  ;;  %s6960_s14 = smov 48  }
 0x13d   : > { %v1135_v39 = vld.sshfl [vmem:[#allocation1] sm:$0xff pattern:$0x75316420]  ;;  %v1136_v40 = vld.sshfl [vmem:[#allocation1 + $0x8] sm:$0xff pattern:$0x75316420] }
 0x13e   : > { %1137 = vrot.lane.b32.xlu1 %v1135_v39, %s6958_s16  ;;  %1168 = vst [vmem:[#allocation1] ss:$2 sm:$0xff] %v5585_v0  ;;  %1139 = vrot.lane.b32.xlu2 %v1136_v40, %s6958_s16  ;;  %s6968_s16 = smov 79  }
 0x145   : > { %v1169_v41 = vld.sshfl [vmem:[#allocation1] sm:$0xff pattern:$0x75316420] }
 0x146   : > { %1170 = vrot.lane.b32.xlu0 %v1169_v41, %s6956_s19  ;;  %1172 = vst [vmem:[#allocation1] ss:$2 sm:$0xff] %v5600_v2  ;;  %s6962_s19 = smov 44  }
 0x14d   : > { %v1173_v42 = vld.sshfl [vmem:[#allocation1] sm:$0xff pattern:$0x75316420]  ;;  %v1174_v43 = vld.sshfl [vmem:[#allocation1 + $0x8] sm:$0xff pattern:$0x75316420] }
 0x14e   : > { %1175 = vrot.lane.b32.xlu1 %v1173_v42, %s6978_s24  ;;  %1206 = vst [vmem:[#allocation1] ss:$2 sm:$0xff] %v5585_v0  ;;  %1177 = vrot.lane.b32.xlu2 %v1174_v43, %s6978_s24  ;;  %s7000_s24 = smov 28  }
 0x155   : > { %v1207_v44 = vld.sshfl [vmem:[#allocation1] sm:$0xff pattern:$0x75316420] }
 0x156   : > { %1208 = vrot.lane.b32.xlu0 %v1207_v44, %s6960_s14  ;;  %1210 = vst [vmem:[#allocation1] ss:$2 sm:$0xff] %v5600_v2  ;;  %s6966_s14 = smov 40  }
 0x15d   : > { %v1211_v45 = vld.sshfl [vmem:[#allocation1] sm:$0xff pattern:$0x75316420]  ;;  %v1212_v46 = vld.sshfl [vmem:[#allocation1 + $0x8] sm:$0xff pattern:$0x75316420] }
 0x15e   : > { %1213 = vrot.lane.b32.xlu1 %v1211_v45, %s6964_s13  ;;  %1244 = vst [vmem:[#allocation1] ss:$2 sm:$0xff] %v5585_v0  ;;  %1215 = vrot.lane.b32.xlu2 %v1212_v46, %s6964_s13  ;;  %s6972_s13 = smov 36  }
 0x165   : > { %v1245_v47 = vld.sshfl [vmem:[#allocation1] sm:$0xff pattern:$0x75316420] }
 0x166   : > { %1246 = vrot.lane.b32.xlu0 %v1245_v47, %s6962_s19  ;;  %1248 = vst [vmem:[#allocation1] ss:$2 sm:$0xff] %v5600_v2  ;;  %s6974_s19 = smov 78  }
 0x16d   : > { %v1249_v48 = vld.sshfl [vmem:[#allocation1] sm:$0xff pattern:$0x75316420]  ;;  %v1250_v49 = vld.sshfl [vmem:[#allocation1 + $0x8] sm:$0xff pattern:$0x75316420] }
 0x16e   : > { %1251 = vrot.lane.b32.xlu1 %v1249_v48, %s6968_s16  ;;  %1282 = vst [vmem:[#allocation1] ss:$2 sm:$0xff] %v5585_v0  ;;  %1253 = vrot.lane.b32.xlu2 %v1250_v49, %s6968_s16  ;;  %s465_s16 = sadd.s32 1, %s5441_s27 }
 0x16f   : > { %p468_p7 = scmp.lt.s32.totalorder %s465_s16, 11 }
 0x171   : > { %s7277_s16 = smov (!%p468_p7, %s465_s16), 11 }
 0x175   : > { %v1283_v50 = vld.sshfl [vmem:[#allocation1] sm:$0xff pattern:$0x75316420] }
 0x176   : > { %1284 = vrot.lane.b32.xlu0 %v1283_v50, %s6966_s14  ;;  %1286 = vst [vmem:[#allocation1] ss:$2 sm:$0xff] %v5600_v2  ;;  %s6976_s14 = smov 77  }
 0x17d   : > { %v1287_v51 = vld.sshfl [vmem:[#allocation1] sm:$0xff pattern:$0x75316420]  ;;  %v1288_v52 = vld.sshfl [vmem:[#allocation1 + $0x8] sm:$0xff pattern:$0x75316420] }
 0x17e   : > { %1289 = vrot.lane.b32.xlu1 %v1287_v51, %s6974_s19  ;;  %1320 = vst [vmem:[#allocation1] ss:$2 sm:$0xff] %v5585_v0  ;;  %1291 = vrot.lane.b32.xlu2 %v1288_v52, %s6974_s19 }
 0x185   : > { %v1321_v53 = vld.sshfl [vmem:[#allocation1] sm:$0xff pattern:$0x75316420] }
 0x186   : > { %1322 = vrot.lane.b32.xlu0 %v1321_v53, %s6972_s13  ;;  %1324 = vst [vmem:[#allocation1] ss:$2 sm:$0xff] %v5600_v2  ;;  %s5067_s13 = sshll.u32 %s7277_s16, 1  ;;  %s6992_s16 = smov 12  }
 0x187   : > { %s472_s19 = sadd.s32 %s5593_s15, %s5067_s13  ;;  %s6996_s13 = smov 20  }
 0x18d   : > { %v1325_v54 = vld.sshfl [vmem:[#allocation1] sm:$0xff pattern:$0x75316420]  ;;  %v1326_v55 = vld.sshfl [vmem:[#allocation1 + $0x8] sm:$0xff pattern:$0x75316420] }
 0x18e   : > { %1327 = vrot.lane.b32.xlu1 %v1325_v54, %s6976_s14  ;;  %1358 = vst [vmem:[#allocation1] ss:$2 sm:$0xff] %v5585_v0  ;;  %1329 = vrot.lane.b32.xlu2 %v1326_v55, %s6976_s14  ;;  %s5068_s14 = sshll.u32 %s472_s19, 2  ;;  %s6990_s19 = smov 4  }
 0x18f   : > { %s474_s17 = scalar_lea.vmem %s7059_s3, %s5068_s14  ;;  %s6994_s14 = smov 16  }
 0x190   : > { %v5713_v60 = vld [vmem:[%s474_s17] sm:$0xff]  ;;  %s6988_s17 = smov 8   ;;  %s7077_s3 = smov 88  }
 0x191   : > { %7060 = vst [vmem:[#allocation10_spill] sm:$0xff] %v5713_v60 }
 0x195   : > { %v1359_v56 = vld.sshfl [vmem:[#allocation1] sm:$0xff pattern:$0x75316420] }
 0x196   : > { %1360 = vrot.lane.b32.xlu0 %v1359_v56, %s6980_s21  ;;  %1362 = vst [vmem:[#allocation1] ss:$2 sm:$0xff] %v5600_v2  ;;  %s7062_s21 = smov 115  }
 0x19d   : > { %v1363_v57 = vld.sshfl [vmem:[#allocation1] sm:$0xff pattern:$0x75316420]  ;;  %v1364_v58 = vld.sshfl [vmem:[#allocation1 + $0x8] sm:$0xff pattern:$0x75316420] }
 0x19e   : > { %1365 = vrot.lane.b32.xlu1 %v1363_v57, %s7010_s20  ;;  %1396 = vst [vmem:[#allocation1] ss:$2 sm:$0xff] %v5585_v0  ;;  %1367 = vrot.lane.b32.xlu2 %v1364_v58, %s7010_s20  ;;  %s7075_s20 = smov 92  }
 0x1a5   : > { %v1397_v59 = vld.sshfl [vmem:[#allocation1] sm:$0xff pattern:$0x75316420] }
 0x1a6   : > { %1398 = vrot.lane.b32.xlu0 %v1397_v59, %s7000_s24  ;;  %1426 = vst [vmem:[#allocation1] ss:$2 sm:$0xff] %v5585_v0  ;;  %s7070_s24 = smov 108  }
 0x1ad   : > { %v1427_v61 = vld.sshfl [vmem:[#allocation1] sm:$0xff pattern:$0x75316420] }
 0x1ae   : > { %1428 = vrot.lane.b32.xlu1 %v1427_v61, %s6998_s26  ;;  %1430 = vst [vmem:[#allocation1] ss:$2 sm:$0xff] %v5713_v60  ;;  %s7069_s26 = smov 103   ;;  %v5832_v61 = vpop.permute.xlu1 %594 }
 0x1b5   : > { %v1431_v62 = vld.sshfl [vmem:[#allocation1] sm:$0xff pattern:$0x75316420] }
 0x1b6   : > { %1459 = vst [vmem:[#allocation1] ss:$2 sm:$0xff] %v5585_v0  ;;  %1432 = vrot.lane.b32.xlu2 %v1431_v62, %s7008_s23  ;;  %s7074_s23 = smov 96   ;;  %v5834_v62 = vpop.permute.xlu2 %627 }
 0x1bd   : > { %v1460_v63 = vld.sshfl [vmem:[#allocation1] sm:$0xff pattern:$0x75316420] }
 0x1be   : > { %1461 = vrot.lane.b32.xlu0 %v1460_v63, %s6996_s13  ;;  %1463 = vst [vmem:[#allocation1] ss:$2 sm:$0xff] %v5713_v60  ;;  %s7068_s13 = smov 104   ;;  %v5838_v63 = vpop.permute.xlu0 %535 }
 0x1c5   : > { %v1464_v1 = vld.sshfl [vmem:[#allocation1] sm:$0xff pattern:$0x75316420] }
 0x1c6   : > { %1465 = vrot.lane.b32.xlu1 %v1464_v1, %s7006_s25  ;;  %1492 = vst [vmem:[#allocation1] ss:$2 sm:$0xff] %v5585_v0  ;;  %s7073_s25 = smov 100  }
 0x1cd   : > { %v1493_v3 = vld.sshfl [vmem:[#allocation1] sm:$0xff pattern:$0x75316420] }
 0x1ce   : > { %1496 = vst [vmem:[#allocation1] ss:$2 sm:$0xff] %v5713_v60  ;;  %1494 = vrot.lane.b32.xlu2 %v1493_v3, %s6994_s14  ;;  %s7067_s14 = smov 112   ;;  %v5842_v3 = vpop.permute.xlu1 %598 }
 0x1cf   : > { %5083 = vmatpush.msk.msra.mxu2 %vm545_vm0, %v5842_v3 }
 0x1d0   : > { %5084 = vmatmul.msk.f32.vlgmr.msra.gmra.mxu2 %vm542_vm1, %v5832_v61 }
 0x1d5   : > { %v1497_v4 = vld.sshfl [vmem:[#allocation1] sm:$0xff pattern:$0x75316420] }
 0x1d6   : > { %1498 = vrot.lane.b32.xlu0 %v1497_v4, %s7004_s12  ;;  %1525 = vst [vmem:[#allocation1] ss:$2 sm:$0xff] %v5585_v0  ;;  %s7072_s12 = smov 101   ;;  %v5844_v4 = vpop.permute.xlu2 %631 }
 0x1d7   : > { %5085 = vmatpush.msk.msra.mxu3 %vm545_vm0, %v5844_v4 }
 0x1d8   : > { %5086 = vmatmul.msk.f32.vlgmr.msra.gmra.mxu3 %vm542_vm1, %v5834_v62 }
 0x1dd   : > { %v1526_v5 = vld.sshfl [vmem:[#allocation1] sm:$0xff pattern:$0x75316420] }
 0x1de   : > { %1527 = vrot.lane.b32.xlu1 %v1526_v5, %s6992_s16  ;;  %1529 = vst [vmem:[#allocation1] ss:$2 sm:$0xff] %v5713_v60  ;;  %s7066_s16 = smov 120   ;;  %v5846_v5 = vpop.permute.xlu0 %540 }
 0x1df   : > { %5079 = vmatpush.msk.msra.mxu0 %vm545_vm0, %v5846_v5 }
 0x1e0   : > { %5080 = vmatmul.msk.f32.vlgmr.msra.gmra.mxu0 %vm542_vm1, %v5838_v63 }
 0x1e5   : > { %v1530_v6 = vld.sshfl [vmem:[#allocation1] sm:$0xff pattern:$0x75316420] }
 0x1e6   : > { %1558 = vst [vmem:[#allocation1] ss:$2 sm:$0xff] %v5585_v0  ;;  %1531 = vrot.lane.b32.xlu2 %v1530_v6, %s7002_s22 }
 0x1ed   : > { %v1559_v7 = vld.sshfl [vmem:[#allocation1] sm:$0xff pattern:$0x75316420] }
 0x1ee   : > { %1560 = vrot.lane.b32.xlu0 %v1559_v7, %s6988_s17  ;;  %1562 = vst [vmem:[#allocation1] ss:$2 sm:$0xff] %v5713_v60  ;;  %s7064_s17 = smov 114   ;;  %v5850_v7 = vpop.permute.xlu1 %664 }
 0x1ef   : > { %5087 = vmatpush.msk.msrb.mxu0 %vm545_vm0, %v5850_v7 }
 0x1f5   : > { %v1563_v8 = vld.sshfl [vmem:[#allocation1] sm:$0xff pattern:$0x75316420] }
 0x1f6   : > { %1564 = vrot.lane.b32.xlu1 %v1563_v8, %s7061_s18  ;;  %1591 = vst [vmem:[#allocation1] ss:$2 sm:$0xff] %v5585_v0  ;;  %v5852_v8 = vpop.permute.xlu2 %693 }
 0x1fd   : > { %v1592_v9 = vld.sshfl [vmem:[#allocation1] sm:$0xff pattern:$0x75316420] }
 0x1fe   : > { %1595 = vst [vmem:[#allocation1] ss:$2 sm:$0xff] %v5713_v60  ;;  %1593 = vrot.lane.b32.xlu2 %v1592_v9, %s6990_s19  ;;  %s7065_s19 = smov 113  }
 0x205   : > { %v1596_v10 = vld.sshfl [vmem:[#allocation1] sm:$0xff pattern:$0x75316420] }
 0x206   : > { %1597 = vrot.lane.b32.xlu0 %v1596_v10, %s7062_s21  ;;  %1624 = vst [vmem:[#allocation1] ss:$2 sm:$0xff] %v5585_v0  ;;  %v5854_v10 = vpop.permute.xlu0 %660 }
 0x207   : > { %5088 = vmatmul.msk.f32.vlgmr.msrb.gmra.mxu0 %vm542_vm1, %v5854_v10 }
 0x20d   : > { %v5739_v11 = vld.sshfl [vmem:[#allocation1 + $0x8] sm:$0xff pattern:$0x75316420] }
 0x20e   : > { %7063 = vst [vmem:[#allocation11_spill] sm:$0xff] %v5739_v11 }
 0x20f   : > { %1626 = vst [vmem:[#allocation1] ss:$2 sm:$0xff] %v5713_v60 }
 0x216   : > { %v1627_v12 = vld.sshfl [vmem:[#allocation1] sm:$0xff pattern:$0x75316420] }
 0x217   : > { %1628 = vrot.lane.b32.xlu1 %v1627_v12, %s7064_s17  ;;  %1655 = vst [vmem:[#allocation1] ss:$2 sm:$0xff] %v5585_v0  ;;  %v5858_v12 = vpop.permute.xlu1 %726 }
 0x21e   : > { %v1656_v13 = vld.sshfl [vmem:[#allocation1 + $0x8] sm:$0xff pattern:$0x75316420] }
 0x21f   : > { %1659 = vst [vmem:[#allocation1] ss:$2 sm:$0xff] %v5713_v60  ;;  %1657 = vrot.lane.b32.xlu2 %v1656_v13, %s7002_s22  ;;  %s7071_s22 = smov 102   ;;  %v5860_v13 = vpop.permute.xlu2 %730 }
 0x220   : > { %5091 = vmatpush.msk.msrb.mxu2 %vm545_vm0, %v5860_v13 }
 0x221   : > { %5092 = vmatmul.msk.f32.vlgmr.msrb.gmra.mxu2 %vm542_vm1, %v5858_v12 }
 0x226   : > { %v1660_v14 = vld.sshfl [vmem:[#allocation1] sm:$0xff pattern:$0x75316420] }
 0x227   : > { %1661 = vrot.lane.b32.xlu0 %v1660_v14, %s7065_s19  ;;  %1688 = vst [vmem:[#allocation1] ss:$2 sm:$0xff] %v5585_v0 }
 0x22e   : > { %v1689_v15 = vld.sshfl [vmem:[#allocation1 + $0x8] sm:$0xff pattern:$0x75316420] }
 0x22f   : > { %1690 = vrot.lane.b32.xlu1 %v1689_v15, %s7066_s16  ;;  %1692 = vst [vmem:[#allocation1] ss:$2 sm:$0xff] %v5713_v60  ;;  %v5864_v15 = vpop.permute.xlu0 %697 }
 0x230   : > { %5089 = vmatpush.msk.msrb.mxu1 %vm545_vm0, %v5864_v15 }
 0x231   : > { %5090 = vmatmul.msk.f32.vlgmr.msrb.gmra.mxu1 %vm542_vm1, %v5852_v8 }
 0x236   : > { %v1693_v16 = vld.sshfl [vmem:[#allocation1] sm:$0xff pattern:$0x75316420] }
 0x237   : > { %1721 = vst [vmem:[#allocation1] ss:$2 sm:$0xff] %v5585_v0  ;;  %1694 = vrot.lane.b32.xlu2 %v1693_v16, %s7067_s14 }
 0x23e   : > { %v1722_v17 = vld.sshfl [vmem:[#allocation1 + $0x8] sm:$0xff pattern:$0x75316420] }
 0x23f   : > { %1723 = vrot.lane.b32.xlu0 %v1722_v17, %s7061_s18  ;;  %1725 = vst [vmem:[#allocation1] ss:$2 sm:$0xff] %v5713_v60  ;;  %v5866_v17 = vpop.permute.xlu1 %763 }
 0x240   : > { %5093 = vmatpush.msk.msrb.mxu3 %vm545_vm0, %v5866_v17 }
 0x246   : > { %v1726_v18 = vld.sshfl [vmem:[#allocation1] sm:$0xff pattern:$0x75316420] }
 0x247   : > { %1727 = vrot.lane.b32.xlu1 %v1726_v18, %s7068_s13  ;;  %1754 = vst [vmem:[#allocation1] ss:$2 sm:$0xff] %v5585_v0  ;;  %v5868_v18 = vpop.permute.xlu2 %792 }
 0x24e   : > { %v1755_v19 = vld.sshfl [vmem:[#allocation1 + $0x8] sm:$0xff pattern:$0x75316420] }
 0x24f   : > { %1758 = vst [vmem:[#allocation1] ss:$2 sm:$0xff] %v5713_v60  ;;  %1756 = vrot.lane.b32.xlu2 %v1755_v19, %s7067_s14  ;;  %v5872_v19 = vpop.permute.xlu0 %759 }
 0x250   : > { %5094 = vmatmul.msk.f32.vlgmr.msrb.gmra.mxu3 %vm542_vm1, %v5872_v19 }
 0x256   : > { %v1759_v20 = vld.sshfl [vmem:[#allocation1] sm:$0xff pattern:$0x75316420] }
 0x257   : > { %1760 = vrot.lane.b32.xlu0 %v1759_v20, %s7069_s26  ;;  %1787 = vst [vmem:[#allocation1] ss:$2 sm:$0xff] %v5585_v0 }
 0x25e   : > { %v1788_v21 = vld.sshfl [vmem:[#allocation1 + $0x8] sm:$0xff pattern:$0x75316420] }
 0x25f   : > { %1789 = vrot.lane.b32.xlu1 %v1788_v21, %s7070_s24  ;;  %1791 = vst [vmem:[#allocation1] ss:$2 sm:$0xff] %v5713_v60  ;;  %v5876_v21 = vpop.permute.xlu1 %825 }
 0x266   : > { %v1792_v22 = vld.sshfl [vmem:[#allocation1] sm:$0xff pattern:$0x75316420] }
 0x267   : > { %1820 = vst [vmem:[#allocation1] ss:$2 sm:$0xff] %v5585_v0  ;;  %1793 = vrot.lane.b32.xlu2 %v1792_v22, %s7071_s22  ;;  %v5878_v22 = vpop.permute.xlu2 %829 }
 0x268   : > { %5097 = vmatpush.msk.msra.mxu1 %vm545_vm0, %v5878_v22 }
 0x269   : > { %5098 = vmatmul.msk.f32.vlgmr.msra.gmra.mxu1 %vm542_vm1, %v5876_v21 }
 0x26e   : > { %v1821_v23 = vld.sshfl [vmem:[#allocation1 + $0x8] sm:$0xff pattern:$0x75316420] }
 0x26f   : > { %1822 = vrot.lane.b32.xlu0 %v1821_v23, %s7068_s13  ;;  %1824 = vst [vmem:[#allocation1] ss:$2 sm:$0xff] %v5713_v60  ;;  %v5880_v23 = vpop.permute.xlu0 %796 }
 0x270   : > { %5095 = vmatpush.msk.msra.mxu0 %vm545_vm0, %v5880_v23 }
 0x271   : > { %5096 = vmatmul.msk.f32.vlgmr.msra.gmra.mxu0 %vm542_vm1, %v5868_v18 }
 0x276   : > { %v1825_v24 = vld.sshfl [vmem:[#allocation1] sm:$0xff pattern:$0x75316420] }
 0x277   : > { %1826 = vrot.lane.b32.xlu1 %v1825_v24, %s7072_s12  ;;  %1853 = vst [vmem:[#allocation1] ss:$2 sm:$0xff] %v5585_v0 }
 0x27e   : > { %v1854_v25 = vld.sshfl [vmem:[#allocation1 + $0x8] sm:$0xff pattern:$0x75316420] }
 0x27f   : > { %1857 = vst [vmem:[#allocation1] ss:$2 sm:$0xff] %v5713_v60  ;;  %1855 = vrot.lane.b32.xlu2 %v1854_v25, %s7073_s25  ;;  %v5884_v25 = vpop.permute.xlu1 %862 }
 0x280   : > { %5099 = vmatpush.msk.msra.mxu2 %vm545_vm0, %v5884_v25 }
 0x286   : > { %v1858_v26 = vld.sshfl [vmem:[#allocation1] sm:$0xff pattern:$0x75316420] }
 0x287   : > { %1859 = vrot.lane.b32.xlu0 %v1858_v26, %s7073_s25  ;;  %1886 = vst [vmem:[#allocation1] ss:$2 sm:$0xff] %v5585_v0  ;;  %v5886_v26 = vpop.permute.xlu2 %891 }
 0x28e   : > { %v1887_v27 = vld.sshfl [vmem:[#allocation1 + $0x8] sm:$0xff pattern:$0x75316420] }
 0x28f   : > { %1888 = vrot.lane.b32.xlu1 %v1887_v27, %s7074_s23  ;;  %1890 = vst [vmem:[#allocation1] ss:$2 sm:$0xff] %v5713_v60 }
 0x296   : > { %v1891_v28 = vld.sshfl [vmem:[#allocation1] sm:$0xff pattern:$0x75316420] }
 0x297   : > { %1919 = vst [vmem:[#allocation1] ss:$2 sm:$0xff] %v5585_v0  ;;  %1892 = vrot.lane.b32.xlu2 %v1891_v28, %s7075_s20  ;;  %v5888_v28 = vpop.permute.xlu0 %858 }
 0x298   : > { %5100 = vmatmul.msk.f32.vlgmr.msra.gmra.mxu2 %vm542_vm1, %v5888_v28 }
 0x29e   : > { %v1920_v29 = vld.sshfl [vmem:[#allocation1 + $0x8] sm:$0xff pattern:$0x75316420] }
 0x29f   : > { %1921 = vrot.lane.b32.xlu0 %v1920_v29, %s7075_s20  ;;  %1923 = vst [vmem:[#allocation1] ss:$2 sm:$0xff] %v5713_v60  ;;  %v5892_v29 = vpop.permute.xlu1 %924 }
 0x2a6   : > { %v1924_v30 = vld.sshfl [vmem:[#allocation1] sm:$0xff pattern:$0x75316420]  ;;  %v1925_v31 = vld.sshfl [vmem:[#allocation1 + $0x8] sm:$0xff pattern:$0x75316420] }
 0x2a7   : > { %1926 = vrot.lane.b32.xlu1 %v1924_v30, %s7076_s2  ;;  %1956 = vst [vmem:[#allocation1] ss:$2 sm:$0xff] %v5585_v0  ;;  %1928 = vrot.lane.b32.xlu2 %v1925_v31, %s7076_s2  ;;  %v5894_v30 = vpop.permute.xlu2 %928 }
 0x2a8   : > { %5103 = vmatpush.msk.msrb.mxu0 %vm545_vm0, %v5894_v30 }
 0x2a9   : > { %5104 = vmatmul.msk.f32.vlgmr.msrb.gmra.mxu0 %vm542_vm1, %v5892_v29 }
 0x2ae   : > { %v1957_v32 = vld.sshfl [vmem:[#allocation1 + $0x8] sm:$0xff pattern:$0x75316420] }
 0x2af   : > { %1958 = vrot.lane.b32.xlu0 %v1957_v32, %s7077_s3  ;;  %1960 = vst [vmem:[#allocation1] ss:$2 sm:$0xff] %v5713_v60  ;;  %v5898_v32 = vpop.permute.xlu0 %895 }
 0x2b0   : > { %5101 = vmatpush.msk.msra.mxu3 %vm545_vm0, %v5898_v32 }
 0x2b1   : > { %5102 = vmatmul.msk.f32.vlgmr.msra.gmra.mxu3 %vm542_vm1, %v5886_v26 }
 0x2b6   : > { %v1961_v33 = vld.sshfl [vmem:[#allocation1] sm:$0xff pattern:$0x75316420]  ;;  %v1962_v34 = vld.sshfl [vmem:[#allocation1 + $0x8] sm:$0xff pattern:$0x75316420] }
 0x2b7   : > { %1963 = vrot.lane.b32.xlu1 %v1961_v33, %s7078_s11  ;;  %1993 = vst [vmem:[#allocation1] ss:$2 sm:$0xff] %v5585_v0  ;;  %1965 = vrot.lane.b32.xlu2 %v1962_v34, %s7078_s11  ;;  %v5900_v34 = vpop.permute.xlu1 %961 }
 0x2b8   : > { %5105 = vmatpush.msk.msrb.mxu1 %vm545_vm0, %v5900_v34 }
 0x2be   : > { %v1994_v35 = vld.sshfl [vmem:[#allocation1 + $0x8] sm:$0xff pattern:$0x75316420] }
 0x2bf   : > { %1995 = vrot.lane.b32.xlu0 %v1994_v35, %s7079_s10  ;;  %1997 = vst [vmem:[#allocation1] ss:$2 sm:$0xff] %v5713_v60  ;;  %v5902_v35 = vpop.permute.xlu2 %990 }
 0x2c6   : > { %v1998_v36 = vld.sshfl [vmem:[#allocation1] sm:$0xff pattern:$0x75316420]  ;;  %v1999_v37 = vld.sshfl [vmem:[#allocation1 + $0x8] sm:$0xff pattern:$0x75316420] }
 0x2c7   : > { %2000 = vrot.lane.b32.xlu1 %v1998_v36, %s7080_s30  ;;  %2030 = vst [vmem:[#allocation1] ss:$2 sm:$0xff] %v5585_v0  ;;  %2002 = vrot.lane.b32.xlu2 %v1999_v37, %s7080_s30  ;;  %v5906_v36 = vpop.permute.xlu0 %957 }
 0x2c8   : > { %5106 = vmatmul.msk.f32.vlgmr.msrb.gmra.mxu1 %vm542_vm1, %v5906_v36 }
 0x2ce   : > { %v2031_v38 = vld.sshfl [vmem:[#allocation1 + $0x8] sm:$0xff pattern:$0x75316420] }
 0x2cf   : > { %2032 = vrot.lane.b32.xlu0 %v2031_v38, %s7081_s29  ;;  %2034 = vst [vmem:[#allocation1] ss:$2 sm:$0xff] %v5713_v60  ;;  %v5910_v38 = vpop.permute.xlu1 %1023 }
 0x2d6   : > { %v2035_v39 = vld.sshfl [vmem:[#allocation1] sm:$0xff pattern:$0x75316420]  ;;  %v2036_v40 = vld.sshfl [vmem:[#allocation1 + $0x8] sm:$0xff pattern:$0x75316420] }
 0x2d7   : > { %2037 = vrot.lane.b32.xlu1 %v2035_v39, %s7077_s3  ;;  %2067 = vst [vmem:[#allocation1] ss:$2 sm:$0xff] %v5585_v0  ;;  %2039 = vrot.lane.b32.xlu2 %v2036_v40, %s7077_s3  ;;  %v5912_v39 = vpop.permute.xlu2 %1027  ;;  %v5914_v40 = vpop.permute.xlu0 %994 }
 0x2d8   : > { %5107 = vmatpush.msk.msrb.mxu2 %vm545_vm0, %v5914_v40  ;;  %5109 = vmatpush.msk.msrb.mxu3 %vm545_vm0, %v5912_v39 }
 0x2d9   : > { %5108 = vmatmul.msk.f32.vlgmr.msrb.gmra.mxu2 %vm542_vm1, %v5902_v35  ;;  %5110 = vmatmul.msk.f32.vlgmr.msrb.gmra.mxu3 %vm542_vm1, %v5910_v38 }
 0x2de   : > { %v2068_v41 = vld.sshfl [vmem:[#allocation1 + $0x8] sm:$0xff pattern:$0x75316420] }
 0x2df   : > { %2069 = vrot.lane.b32.xlu0 %v2068_v41, %s7082_s9  ;;  %2071 = vst [vmem:[#allocation1] ss:$2 sm:$0xff] %v5713_v60 }
 0x2e6   : > { %v2072_v42 = vld.sshfl [vmem:[#allocation1] sm:$0xff pattern:$0x75316420]  ;;  %v2073_v43 = vld.sshfl [vmem:[#allocation1 + $0x8] sm:$0xff pattern:$0x75316420] }
 0x2e7   : > { %2074 = vrot.lane.b32.xlu1 %v2072_v42, %s7081_s29  ;;  %2104 = vst [vmem:[#allocation1] ss:$2 sm:$0xff] %v5585_v0  ;;  %2076 = vrot.lane.b32.xlu2 %v2073_v43, %s7081_s29  ;;  %v5918_v42 = vpop.permute.xlu1 %1061  ;;  %v5920_v43 = vpop.permute.xlu2 %1063 }
 0x2e8   : > { %v1066_v12 = vsel %vm1065_vm2, %v5918_v42, %v5920_v43 }
 0x2e9   : > { %5111 = vmatpush.msk.msra.mxu0 %vm545_vm0, %v1066_v12 }
 0x2ee   : > { %v2105_v44 = vld.sshfl [vmem:[#allocation1 + $0x8] sm:$0xff pattern:$0x75316420] }
 0x2ef   : > { %2106 = vrot.lane.b32.xlu0 %v2105_v44, %s7083_s8  ;;  %2108 = vst [vmem:[#allocation1] ss:$2 sm:$0xff] %v5713_v60  ;;  %s7088_s8 = smov 77  }
 0x2f6   : > { %v2109_v45 = vld.sshfl [vmem:[#allocation1] sm:$0xff pattern:$0x75316420]  ;;  %v2110_v46 = vld.sshfl [vmem:[#allocation1 + $0x8] sm:$0xff pattern:$0x75316420] }
 0x2f7   : > { %2111 = vrot.lane.b32.xlu1 %v2109_v45, %s7084_s7  ;;  %2141 = vst [vmem:[#allocation1] ss:$2 sm:$0xff] %v5585_v0  ;;  %2113 = vrot.lane.b32.xlu2 %v2110_v46, %s7084_s7  ;;  %s7092_s7 = smov 52   ;;  %v5922_v45 = vpop.permute.xlu0 %1056  ;;  %v5926_v46 = vpop.permute.xlu1 %1099 }
 0x2f8   : > { %5112 = vmatmul.msk.f32.vlgmr.msra.gmra.mxu0 %vm542_vm1, %v5922_v45 }
 0x2fe   : > { %v2142_v47 = vld.sshfl [vmem:[#allocation1 + $0x8] sm:$0xff pattern:$0x75316420] }
 0x2ff   : > { %2143 = vrot.lane.b32.xlu0 %v2142_v47, %s7085_s1  ;;  %2145 = vst [vmem:[#allocation1] ss:$2 sm:$0xff] %v5713_v60  ;;  %s476_s1 = sadd.s32 2, %s5441_s27  ;;  %s7090_s27 = smov 56   ;;  %v5928_v47 = vpop.permute.xlu2 %1101 }
 0x300   : > { %p479_p8 = scmp.lt.s32.totalorder %s476_s1, 11  ;;  %v1104_v22 = vsel %vm1103_vm4, %v5926_v46, %v5928_v47  ;;  %v7169_v47 = vld [vmem:[#allocation10_spill] sm:$0xff] }
 0x301   : > { %5113 = vmatpush.msk.msra.mxu1 %vm545_vm0, %v1104_v22 }
 0x302   : > { %s7279_s1 = smov (!%p479_p8, %s476_s1), 11 }
 0x306   : > { %v2146_v48 = vld.sshfl [vmem:[#allocation1] sm:$0xff pattern:$0x75316420]  ;;  %v2147_v49 = vld.sshfl [vmem:[#allocation1 + $0x8] sm:$0xff pattern:$0x75316420] }
 0x307   : > { %2148 = vrot.lane.b32.xlu1 %v2146_v48, %s7086_s28  ;;  %2178 = vst [vmem:[#allocation1] ss:$2 sm:$0xff] %v5585_v0  ;;  %2150 = vrot.lane.b32.xlu2 %v2147_v49, %s7086_s28  ;;  %s7097_s28 = smov 125   ;;  %v5932_v49 = vpop.permute.xlu0 %1094 }
 0x308   : > { %7104 = vst [vmem:[#allocation12_spill] sm:$0xff] %v5932_v49 }
 0x30e   : > { %v2179_v50 = vld.sshfl [vmem:[#allocation1 + $0x8] sm:$0xff pattern:$0x75316420] }
 0x30f   : > { %2180 = vrot.lane.b32.xlu0 %v2179_v50, %s7087_s6  ;;  %2182 = vst [vmem:[#allocation1] ss:$2 sm:$0xff] %v5713_v60  ;;  %s5069_s6 = sshll.u32 %s7279_s1, 1  ;;  %s7093_s1 = smov 127   ;;  %v7166_v42 = vld [vmem:[#allocation12_spill] sm:$0xff] }
 0x310   : > { %s483_s10 = sadd.s32 %s5593_s15, %s5069_s6  ;;  %s7095_s6 = smov 126   ;;  %5114 = vmatmul.msk.f32.vlgmr.msra.gmra.mxu1 %vm542_vm1, %v7166_v42 }
 0x316   : > { %v2183_v51 = vld.sshfl [vmem:[#allocation1] sm:$0xff pattern:$0x75316420]  ;;  %v2184_v52 = vld.sshfl [vmem:[#allocation1 + $0x8] sm:$0xff pattern:$0x75316420] }
 0x317   : > { %2185 = vrot.lane.b32.xlu1 %v2183_v51, %s7088_s8  ;;  %2215 = vst [vmem:[#allocation1] ss:$2 sm:$0xff] %v5585_v0  ;;  %2187 = vrot.lane.b32.xlu2 %v2184_v52, %s7088_s8  ;;  %s5070_s8 = sshll.u32 %s483_s10, 2  ;;  %s7098_s10 = smov 40   ;;  %v5934_v51 = vpop.permute.xlu1 %1137  ;;  %v5936_v52 = vpop.permute.xlu2 %1139 }
 0x318   : > { %s485_s23 = scalar_lea.vmem %s7091_s4, %s5070_s8  ;;  %s7096_s8 = smov 44   ;;  %v1142_v19 = vsel %vm1141_vm3, %v5934_v51, %v5936_v52 }
 0x319   : > { %v5828_v57 = vld [vmem:[%s485_s23] sm:$0xff]  ;;  %s7099_s23 = smov 124   ;;  %s7100_s4 = smov 36   ;;  %5115 = vmatpush.msk.msra.mxu2 %vm545_vm0, %v1142_v19 }
 0x31e   : > { %v2216_v53 = vld.sshfl [vmem:[#allocation1 + $0x8] sm:$0xff pattern:$0x75316420] }
 0x31f   : > { %2217 = vrot.lane.b32.xlu0 %v2216_v53, %s7089_s5  ;;  %2219 = vst [vmem:[#allocation1] ss:$2 sm:$0xff] %v5713_v60  ;;  %s7094_s5 = smov 48   ;;  %v5940_v53 = vpop.permute.xlu0 %1132 }
 0x320   : > { %5116 = vmatmul.msk.f32.vlgmr.msra.gmra.mxu2 %vm542_vm1, %v5940_v53 }
 0x326   : > { %v2220_v54 = vld.sshfl [vmem:[#allocation1] sm:$0xff pattern:$0x75316420]  ;;  %v2221_v55 = vld.sshfl [vmem:[#allocation1 + $0x8] sm:$0xff pattern:$0x75316420] }
 0x327   : > { %2222 = vrot.lane.b32.xlu1 %v2220_v54, %s7082_s9  ;;  %2252 = vst [vmem:[#allocation1] ss:$2 sm:$0xff] %v5585_v0  ;;  %2224 = vrot.lane.b32.xlu2 %v2221_v55, %s7082_s9  ;;  %v5944_v55 = vpop.permute.xlu1 %1175 }
 0x32e   : > { %v2253_v56 = vld.sshfl [vmem:[#allocation1 + $0x8] sm:$0xff pattern:$0x75316420] }
 0x32f   : > { %2254 = vrot.lane.b32.xlu0 %v2253_v56, %s7090_s27  ;;  %2282 = vst [vmem:[#allocation1] ss:$2 sm:$0xff] %v5585_v0  ;;  %v5946_v56 = vpop.permute.xlu2 %1177 }
 0x330   : > { %v1180_v23 = vsel %vm1179_vm5, %v5944_v55, %v5946_v56 }
 0x331   : > { %5117 = vmatpush.msk.msra.mxu3 %vm545_vm0, %v1180_v23 }
 0x336   : > { %v2283_v58 = vld.sshfl [vmem:[#allocation1 + $0x8] sm:$0xff pattern:$0x75316420] }
 0x337   : > { %2284 = vrot.lane.b32.xlu1 %v2283_v58, %s7092_s7  ;;  %2286 = vst [vmem:[#allocation1] ss:$2 sm:$0xff] %v5828_v57  ;;  %v5948_v58 = vpop.permute.xlu0 %1170 }
 0x338   : > { %7106 = vst [vmem:[#allocation13_spill] sm:$0xff] %v5948_v58 }
 0x33e   : > { %v2287_v59 = vld.sshfl [vmem:[#allocation1] sm:$0xff pattern:$0x75316420] }
 0x33f   : > { %2315 = vst [vmem:[#allocation1] ss:$2 sm:$0xff] %v5585_v0  ;;  %2288 = vrot.lane.b32.xlu2 %v2287_v59, %s7093_s1  ;;  %v7165_v40 = vld [vmem:[#allocation13_spill] sm:$0xff] }
 0x340   : > { %5118 = vmatmul.msk.f32.vlgmr.msra.gmra.mxu3 %vm542_vm1, %v7165_v40 }
 0x346   : > { %v2316_v1 = vld.sshfl [vmem:[#allocation1 + $0x8] sm:$0xff pattern:$0x75316420] }
 0x347   : > { %2317 = vrot.lane.b32.xlu0 %v2316_v1, %s7094_s5  ;;  %2319 = vst [vmem:[#allocation1] ss:$2 sm:$0xff] %v5828_v57  ;;  %v5952_v1 = vpop.permute.xlu1 %1213 }
 0x34e   : > { %v2320_v6 = vld.sshfl [vmem:[#allocation1] sm:$0xff pattern:$0x75316420] }
 0x34f   : > { %2321 = vrot.lane.b32.xlu1 %v2320_v6, %s7095_s6  ;;  %2348 = vst [vmem:[#allocation1] ss:$2 sm:$0xff] %v5585_v0  ;;  %v5954_v6 = vpop.permute.xlu2 %1215 }
 0x350   : > { %v1218_v21 = vsel %vm1217_vm6, %v5952_v1, %v5954_v6 }
 0x351   : > { %5119 = vmatpush.msk.msrb.mxu0 %vm545_vm0, %v1218_v21 }
 0x356   : > { %v2349_v9 = vld.sshfl [vmem:[#allocation1 + $0x8] sm:$0xff pattern:$0x75316420] }
 0x357   : > { %2352 = vst [vmem:[#allocation1] ss:$2 sm:$0xff] %v5828_v57  ;;  %2350 = vrot.lane.b32.xlu2 %v2349_v9, %s7096_s8 }
 0x35e   : > { %v2353_v14 = vld.sshfl [vmem:[#allocation1] sm:$0xff pattern:$0x75316420] }
 0x35f   : > { %2354 = vrot.lane.b32.xlu0 %v2353_v14, %s7097_s28  ;;  %2381 = vst [vmem:[#allocation1] ss:$2 sm:$0xff] %v5585_v0  ;;  %v5956_v14 = vpop.permute.xlu0 %1208 }
 0x360   : > { %7108 = vst [vmem:[#allocation14_spill] sm:$0xff] %v5956_v14  ;;  %v6005_v14 = vld [vmem:[%s7055_s0 + $0x8] sm:$0xff]  ;;  %s7160_s0 = smov 78  }
 0x366   : > { %v2382_v16 = vld.sshfl [vmem:[#allocation1 + $0x8] sm:$0xff pattern:$0x75316420] }
 0x367   : > { %2383 = vrot.lane.b32.xlu1 %v2382_v16, %s7098_s10  ;;  %2385 = vst [vmem:[#allocation1] ss:$2 sm:$0xff] %v5828_v57  ;;  %s7102_s10 = smov 28   ;;  %v5960_v16 = vpop.permute.xlu1 %1251  ;;  %v7171_v55 = vld [vmem:[#allocation14_spill] sm:$0xff] }
 0x368   : > { %5120 = vmatmul.msk.f32.vlgmr.msrb.gmra.mxu0 %vm542_vm1, %v7171_v55 }
 0x36e   : > { %v2386_v20 = vld.sshfl [vmem:[#allocation1] sm:$0xff pattern:$0x75316420] }
 0x36f   : > { %2414 = vst [vmem:[#allocation1] ss:$2 sm:$0xff] %v5585_v0  ;;  %2387 = vrot.lane.b32.xlu2 %v2386_v20, %s7099_s23  ;;  %v5962_v20 = vpop.permute.xlu2 %1253 }
 0x370   : > { %v1256_v32 = vsel %vm1255_vm8, %v5960_v16, %v5962_v20 }
 0x371   : > { %5121 = vmatpush.msk.msrb.mxu1 %vm545_vm0, %v1256_v32 }
 0x373   : > { %5129 = vmatpush.msk.msra.mxu1 %vm545_vm0, %v7169_v47 }
 0x376   : > { %v2415_v24 = vld.sshfl [vmem:[#allocation1 + $0x8] sm:$0xff pattern:$0x75316420] }
 0x377   : > { %2416 = vrot.lane.b32.xlu0 %v2415_v24, %s7100_s4  ;;  %2418 = vst [vmem:[#allocation1] ss:$2 sm:$0xff] %v5828_v57  ;;  %s7101_s4 = smov 32  }
 0x37e   : > { %v2419_v27 = vld.sshfl [vmem:[#allocation1] sm:$0xff pattern:$0x75316420] }
 0x37f   : > { %2420 = vrot.lane.b32.xlu1 %v2419_v27, %s7061_s18  ;;  %2447 = vst [vmem:[#allocation1] ss:$2 sm:$0xff] %v5585_v0  ;;  %v5966_v27 = vpop.permute.xlu0 %1246 }
 0x380   : > { %7110 = vst [vmem:[#allocation15_spill] sm:$0xff] %v5966_v27 }
 0x386   : > { %v2448_v31 = vld.sshfl [vmem:[#allocation1 + $0x8] sm:$0xff pattern:$0x75316420] }
 0x387   : > { %2451 = vst [vmem:[#allocation1] ss:$2 sm:$0xff] %v5828_v57  ;;  %2449 = vrot.lane.b32.xlu2 %v2448_v31, %s7101_s4  ;;  %s7107_s4 = smov 16   ;;  %v7173_v1 = vld [vmem:[#allocation15_spill] sm:$0xff] }
 0x388   : > { %5122 = vmatmul.msk.f32.vlgmr.msrb.gmra.mxu1 %vm542_vm1, %v7173_v1 }
 0x38e   : > { %v2452_v33 = vld.sshfl [vmem:[#allocation1] sm:$0xff pattern:$0x75316420] }
 0x38f   : > { %2453 = vrot.lane.b32.xlu0 %v2452_v33, %s7062_s21  ;;  %2480 = vst [vmem:[#allocation1] ss:$2 sm:$0xff] %v5585_v0  ;;  %v5968_v33 = vpop.permute.xlu1 %1289 }
 0x396   : > { %v2481_v37 = vld.sshfl [vmem:[#allocation1 + $0x8] sm:$0xff pattern:$0x75316420] }
 0x397   : > { %2482 = vrot.lane.b32.xlu1 %v2481_v37, %s7102_s10  ;;  %2484 = vst [vmem:[#allocation1] ss:$2 sm:$0xff] %v5828_v57  ;;  %s7103_s10 = smov 24   ;;  %v5970_v37 = vpop.permute.xlu2 %1291 }
 0x398   : > { %v1294_v26 = vsel %vm1293_vm7, %v5968_v33, %v5970_v37 }
 0x399   : > { %5123 = vmatpush.msk.msrb.mxu2 %vm545_vm0, %v1294_v26 }
 0x39e   : > { %v2485_v41 = vld.sshfl [vmem:[#allocation1] sm:$0xff pattern:$0x75316420] }
 0x39f   : > { %2513 = vst [vmem:[#allocation1] ss:$2 sm:$0xff] %v5585_v0  ;;  %2486 = vrot.lane.b32.xlu2 %v2485_v41, %s7064_s17  ;;  %v5974_v41 = vpop.permute.xlu0 %1284 }
 0x3a0   : > { %7111 = vst [vmem:[#allocation16_spill] sm:$0xff] %v5974_v41 }
 0x3a6   : > { %v2514_v44 = vld.sshfl [vmem:[#allocation1 + $0x8] sm:$0xff pattern:$0x75316420] }
 0x3a7   : > { %2515 = vrot.lane.b32.xlu0 %v2514_v44, %s7103_s10  ;;  %2517 = vst [vmem:[#allocation1] ss:$2 sm:$0xff] %v5828_v57  ;;  %s7105_s10 = smov 20   ;;  %v7170_v53 = vld [vmem:[#allocation16_spill] sm:$0xff] }
 0x3a8   : > { %5124 = vmatmul.msk.f32.vlgmr.msrb.gmra.mxu2 %vm542_vm1, %v7170_v53 }
 0x3ae   : > { %v2518_v48 = vld.sshfl [vmem:[#allocation1] sm:$0xff pattern:$0x75316420] }
 0x3af   : > { %2519 = vrot.lane.b32.xlu1 %v2518_v48, %s7065_s19  ;;  %2546 = vst [vmem:[#allocation1] ss:$2 sm:$0xff] %v5585_v0  ;;  %v5978_v48 = vpop.permute.xlu1 %1327 }
 0x3b6   : > { %v2547_v50 = vld.sshfl [vmem:[#allocation1 + $0x8] sm:$0xff pattern:$0x75316420] }
 0x3b7   : > { %2550 = vst [vmem:[#allocation1] ss:$2 sm:$0xff] %v5828_v57  ;;  %2548 = vrot.lane.b32.xlu2 %v2547_v50, %s7105_s10  ;;  %s7109_s10 = smov 12   ;;  %v5980_v50 = vpop.permute.xlu2 %1329 }
 0x3b8   : > { %v1332_v34 = vsel %vm1331_vm9, %v5978_v48, %v5980_v50 }
 0x3b9   : > { %5125 = vmatpush.msk.msrb.mxu3 %vm545_vm0, %v1332_v34 }
 0x3be   : > { %v2551_v54 = vld.sshfl [vmem:[#allocation1] sm:$0xff pattern:$0x75316420] }
 0x3bf   : > { %2552 = vrot.lane.b32.xlu0 %v2551_v54, %s7067_s14  ;;  %2579 = vst [vmem:[#allocation1] ss:$2 sm:$0xff] %v5585_v0  ;;  %v5982_v54 = vpop.permute.xlu0 %1322 }
 0x3c0   : > { %7113 = vst [vmem:[#allocation17_spill] sm:$0xff] %v5982_v54 }
 0x3c6   : > { %v2580_v59 = vld.sshfl [vmem:[#allocation1 + $0x8] sm:$0xff pattern:$0x75316420] }
 0x3c7   : > { %2581 = vrot.lane.b32.xlu1 %v2580_v59, %s7107_s4  ;;  %2583 = vst [vmem:[#allocation1] ss:$2 sm:$0xff] %v5828_v57  ;;  %s7112_s4 = smov 8   ;;  %v5990_v11 = vpop.permute.xlu0 %1360  ;;  %v7172_v56 = vld [vmem:[#allocation17_spill] sm:$0xff] }
 0x3c8   : > { %7114 = vst [vmem:[#allocation18_spill] sm:$0xff] %v5990_v11  ;;  %5126 = vmatmul.msk.f32.vlgmr.msrb.gmra.mxu3 %vm542_vm1, %v7172_v56 }
 0x3ce   : > { %v2584_v9 = vld.sshfl [vmem:[#allocation1] sm:$0xff pattern:$0x75316420] }
 0x3cf   : > { %2612 = vst [vmem:[#allocation1] ss:$2 sm:$0xff] %v5585_v0  ;;  %2585 = vrot.lane.b32.xlu2 %v2584_v9, %s7068_s13  ;;  %v5986_v9 = vpop.permute.xlu1 %1365 }
 0x3d6   : > { %v2613_v24 = vld.sshfl [vmem:[#allocation1 + $0x8] sm:$0xff pattern:$0x75316420] }
 0x3d7   : > { %2614 = vrot.lane.b32.xlu0 %v2613_v24, %s7109_s10  ;;  %2616 = vst [vmem:[#allocation1] ss:$2 sm:$0xff] %v5828_v57  ;;  %v5988_v24 = vpop.permute.xlu2 %1367  ;;  %s7115_s10 = smov 4  }
 0x3d8   : > { %v1370_v38 = vsel %vm1369_vm10, %v5986_v9, %v5988_v24  ;;  %v7180_v9 = vld [vmem:[#allocation18_spill] sm:$0xff] }
 0x3d9   : > { %5127 = vmatpush.msk.msra.mxu0 %vm545_vm0, %v1370_v38 }
 0x3da   : > { %5128 = vmatmul.msk.f32.vlgmr.msra.gmra.mxu0 %vm542_vm1, %v7180_v9 }
 0x3de   : > { %v2617_v31 = vld.sshfl [vmem:[#allocation1] sm:$0xff pattern:$0x75316420] }
 0x3df   : > { %2618 = vrot.lane.b32.xlu1 %v2617_v31, %s7069_s26  ;;  %2645 = vst [vmem:[#allocation1] ss:$2 sm:$0xff] %v5585_v0  ;;  %v5996_v27 = vpop.permute.xlu2 %1432 }
 0x3e0   : > { %7117 = vst [vmem:[#allocation20_spill] sm:$0xff] %v5996_v27 }
 0x3e6   : > { %v2646_v44 = vld.sshfl [vmem:[#allocation1 + $0x8] sm:$0xff pattern:$0x75316420] }
 0x3e7   : > { %2649 = vst [vmem:[#allocation1] ss:$2 sm:$0xff] %v5828_v57  ;;  %2647 = vrot.lane.b32.xlu2 %v2646_v44, %s7112_s4  ;;  %v5994_v44 = vpop.permute.xlu1 %1428  ;;  %v6009_v41 = vpop.permute.xlu2 %1494  ;;  %s7154_s4 = smov 79   ;;  %v7167_v43 = vld [vmem:[#allocation20_spill] sm:$0xff] }
 0x3e8   : > { %7116 = vst [vmem:[#allocation19_spill] sm:$0xff] %v5994_v44  ;;  %5131 = vmatpush.msk.msra.mxu2 %vm545_vm0, %v7167_v43 }
 0x3e9   : > { %7120 = vst [vmem:[#allocation23_spill] sm:$0xff] %v6009_v41 }
 0x3ee   : > { %v2650_v59 = vld.sshfl [vmem:[#allocation1] sm:$0xff pattern:$0x75316420] }
 0x3ef   : > { %2651 = vrot.lane.b32.xlu0 %v2650_v59, %s7071_s22  ;;  %2678 = vst [vmem:[#allocation1] ss:$2 sm:$0xff] %v5585_v0  ;;  %v6000_v59 = vpop.permute.xlu0 %1398  ;;  %s7158_s22 = smov 96   ;;  %v7179_v50 = vld [vmem:[#allocation19_spill] sm:$0xff] }
 0x3f0   : > { %7118 = vst [vmem:[#allocation21_spill] sm:$0xff] %v6000_v59  ;;  %v6019_v59 = vpop.permute.xlu2 %1531  ;;  %5132 = vmatmul.msk.f32.vlgmr.msra.gmra.mxu2 %vm542_vm1, %v7179_v50  ;;  %v7188_v22 = vld [vmem:[#allocation23_spill] sm:$0xff] }
 0x3f1   : > { %7123 = vst [vmem:[#allocation26_spill] sm:$0xff] %v6019_v59 }
 0x3f6   : > { %v2679_v31 = vld.sshfl [vmem:[#allocation1 + $0x8] sm:$0xff pattern:$0x75316420] }
 0x3f7   : > { %2680 = vrot.lane.b32.xlu1 %v2679_v31, %s7115_s10  ;;  %2682 = vst [vmem:[#allocation1] ss:$2 sm:$0xff] %v5828_v57  ;;  %v6007_v31 = vpop.permute.xlu1 %1465  ;;  %v6013_v44 = vpop.permute.xlu0 %1461 }
 0x3f8   : > { %7119 = vst [vmem:[#allocation22_spill] sm:$0xff] %v6007_v31  ;;  %v6027_v41 = vpop.permute.xlu2 %1593  ;;  %v7177_v37 = vld [vmem:[#allocation26_spill] sm:$0xff] }
 0x3f9   : > { %7121 = vst [vmem:[#allocation24_spill] sm:$0xff] %v6013_v44  ;;  %5137 = vmatpush.msk.msrb.mxu1 %vm545_vm0, %v7177_v37 }
 0x3fa   : > { %7126 = vst [vmem:[#allocation29_spill] sm:$0xff] %v6027_v41 }
 0x3fe   : > { %v2683_v54 = vld.sshfl [vmem:[#allocation1] sm:$0xff pattern:$0x75316420] }
 0x3ff   : > { %2711 = vst [vmem:[#allocation1] ss:$2 sm:$0xff] %v5828_v57  ;;  %2684 = vrot.lane.b32.xlu2 %v2683_v54, %s7072_s12  ;;  %v6017_v54 = vpop.permute.xlu1 %1527  ;;  %v6021_v27 = vpop.permute.xlu0 %1498  ;;  %v7168_v46 = vld [vmem:[#allocation22_spill] sm:$0xff] }
 0x400   : > { %7122 = vst [vmem:[#allocation25_spill] sm:$0xff] %v6017_v54  ;;  %v6035_v54 = vpop.permute.xlu2 %1657  ;;  %5133 = vmatpush.msk.msra.mxu3 %vm545_vm0, %v7168_v46 }
 0x401   : > { %7124 = vst [vmem:[#allocation27_spill] sm:$0xff] %v6021_v27  ;;  %v7189_v23 = vld [vmem:[#allocation29_spill] sm:$0xff] }
 0x402   : > { %7129 = vst [vmem:[#allocation32_spill] sm:$0xff] %v6035_v54 }
 0x406   : > { %v2712_v11 = vld.sshfl [vmem:[#allocation1] sm:$0xff pattern:$0x75316420] }
 0x407   : > { %2713 = vrot.lane.b32.xlu0 %v2712_v11, %s7073_s25  ;;  %2741 = vst [vmem:[#allocation1] ss:$2 sm:$0xff] %v6005_v14  ;;  %v6025_v11 = vpop.permute.xlu1 %1564  ;;  %v6029_v49 = vpop.permute.xlu0 %1560 }
 0x408   : > { %7125 = vst [vmem:[#allocation28_spill] sm:$0xff] %v6025_v11  ;;  %v7175_v16 = vld [vmem:[#allocation27_spill] sm:$0xff] }
 0x409   : > { %7127 = vst [vmem:[#allocation30_spill] sm:$0xff] %v6029_v49  ;;  %5135 = vmatpush.msk.msrb.mxu0 %vm545_vm0, %v7175_v16 }
 0x40a   : > { %5136 = vmatmul.msk.f32.vlgmr.msrb.gmra.mxu0 %vm542_vm1, %v7188_v22 }
 0x40e   : > { %v2742_v60 = vld.sshfl [vmem:[#allocation1] sm:$0xff pattern:$0x75316420] }
 0x40f   : > { %2743 = vrot.lane.b32.xlu1 %v2742_v60, %s7099_s23  ;;  %2745 = vst [vmem:[#allocation1] ss:$2 sm:$0xff] %v5828_v57  ;;  %v6033_v60 = vpop.permute.xlu1 %1628  ;;  %v7174_v6 = vld [vmem:[#allocation28_spill] sm:$0xff] }
 0x410   : > { %7128 = vst [vmem:[#allocation31_spill] sm:$0xff] %v6033_v60  ;;  %5139 = vmatpush.msk.msrb.mxu2 %vm545_vm0, %v7174_v6  ;;  %v7187_v19 = vld [vmem:[#allocation30_spill] sm:$0xff] }
 0x411   : > { %5140 = vmatmul.msk.f32.vlgmr.msrb.gmra.mxu2 %vm542_vm1, %v7187_v19 }
 0x416   : > { %v2746_v31 = vld.sshfl [vmem:[#allocation1] sm:$0xff pattern:$0x75316420] }
 0x417   : > { %2774 = vst [vmem:[#allocation1] ss:$2 sm:$0xff] %v6005_v14  ;;  %2747 = vrot.lane.b32.xlu2 %v2746_v31, %s7075_s20  ;;  %v6040_v31 = vpop.permute.xlu0 %1597  ;;  %v6042_v49 = vpop.permute.xlu1 %1690 }
 0x418   : > { %7130 = vst [vmem:[#allocation33_spill] sm:$0xff] %v6040_v31 }
 0x419   : > { %7131 = vst [vmem:[#allocation34_spill] sm:$0xff] %v6042_v49 }
 0x41e   : > { %v2775_v44 = vld.sshfl [vmem:[#allocation1] sm:$0xff pattern:$0x75316420] }
 0x41f   : > { %2776 = vrot.lane.b32.xlu0 %v2775_v44, %s7066_s16  ;;  %2778 = vst [vmem:[#allocation1] ss:$2 sm:$0xff] %v5828_v57  ;;  %v6044_v44 = vpop.permute.xlu2 %1694  ;;  %v6048_v54 = vpop.permute.xlu0 %1661  ;;  %v7176_v33 = vld [vmem:[#allocation33_spill] sm:$0xff] }
 0x420   : > { %7132 = vst [vmem:[#allocation35_spill] sm:$0xff] %v6044_v44  ;;  %5141 = vmatpush.msk.msrb.mxu3 %vm545_vm0, %v7176_v33  ;;  %v7202_v16 = vld [vmem:[#allocation34_spill] sm:$0xff]  ;;  %v7203_v33 = vld [vmem:[#allocation11_spill] sm:$0xff] }
 0x421   : > { %7133 = vst [vmem:[#allocation36_spill] sm:$0xff] %v6048_v54 }
 0x426   : > { %v2779_v59 = vld.sshfl [vmem:[#allocation1] sm:$0xff pattern:$0x75316420]  ;;  %v2780_v27 = vld.sshfl [vmem:[#allocation1 + $0x8] sm:$0xff pattern:$0x75316420] }
 0x427   : > { %2781 = vrot.lane.b32.xlu1 %v2779_v59, %s7076_s2  ;;  %2811 = vst [vmem:[#allocation1] ss:$2 sm:$0xff] %v6005_v14  ;;  %2783 = vrot.lane.b32.xlu2 %v2780_v27, %s7076_s2  ;;  %v6053_v27 = vpop.permute.xlu1 %1727  ;;  %v6055_v59 = vpop.permute.xlu2 %1756 }
 0x428   : > { %7134 = vst [vmem:[#allocation37_spill] sm:$0xff] %v6053_v27  ;;  %v6057_v49 = vpop.permute.xlu0 %1723 }
 0x429   : > { %7135 = vst [vmem:[#allocation38_spill] sm:$0xff] %v6055_v59 }
 0x42a   : > { %7136 = vst [vmem:[#allocation39_spill] sm:$0xff] %v6057_v49 }
 0x42e   : > { %v2812_v41 = vld.sshfl [vmem:[#allocation1] sm:$0xff pattern:$0x75316420] }
 0x42f   : > { %2813 = vrot.lane.b32.xlu0 %v2812_v41, %s7061_s18  ;;  %2815 = vst [vmem:[#allocation1] ss:$2 sm:$0xff] %v5828_v57  ;;  %v6061_v41 = vpop.permute.xlu1 %1789  ;;  %v6063_v54 = vpop.permute.xlu2 %1793 }
 0x430   : > { %7137 = vst [vmem:[#allocation40_spill] sm:$0xff] %v6061_v41  ;;  %v6065_v58 = vpop.permute.xlu0 %1760 }
 0x431   : > { %7138 = vst [vmem:[#allocation41_spill] sm:$0xff] %v6063_v54  ;;  %v7204_v37 = vld [vmem:[#allocation39_spill] sm:$0xff] }
 0x432   : > { %7139 = vst [vmem:[#allocation42_spill] sm:$0xff] %v6065_v58 }
 0x436   : > { %v2816_v60 = vld.sshfl [vmem:[#allocation1] sm:$0xff pattern:$0x75316420]  ;;  %v2817_v11 = vld.sshfl [vmem:[#allocation1 + $0x8] sm:$0xff pattern:$0x75316420] }
 0x437   : > { %2818 = vrot.lane.b32.xlu1 %v2816_v60, %s7078_s11  ;;  %2848 = vst [vmem:[#allocation1] ss:$2 sm:$0xff] %v6005_v14  ;;  %2820 = vrot.lane.b32.xlu2 %v2817_v11, %s7078_s11  ;;  %v6070_v11 = vpop.permute.xlu1 %1826  ;;  %v6072_v59 = vpop.permute.xlu2 %1855 }
 0x438   : > { %7140 = vst [vmem:[#allocation43_spill] sm:$0xff] %v6070_v11  ;;  %v6076_v41 = vpop.permute.xlu0 %1822  ;;  %v7194_v38 = vld [vmem:[#allocation41_spill] sm:$0xff] }
 0x439   : > { %7141 = vst [vmem:[#allocation44_spill] sm:$0xff] %v6072_v59  ;;  %v7192_v26 = vld [vmem:[#allocation42_spill] sm:$0xff] }
 0x43a   : > { %7142 = vst [vmem:[#allocation45_spill] sm:$0xff] %v6076_v41 }
 0x43e   : > { %v2849_v44 = vld.sshfl [vmem:[#allocation1] sm:$0xff pattern:$0x75316420] }
 0x43f   : > { %2850 = vrot.lane.b32.xlu0 %v2849_v44, %s7067_s14  ;;  %2852 = vst [vmem:[#allocation1] ss:$2 sm:$0xff] %v5828_v57  ;;  %v6078_v58 = vpop.permute.xlu1 %1888  ;;  %v7191_v21 = vld [vmem:[#allocation43_spill] sm:$0xff] }
 0x440   : > { %7143 = vst [vmem:[#allocation46_spill] sm:$0xff] %v6078_v58 }
 0x441   : > { %v7209_v22 = vld [vmem:[#allocation45_spill] sm:$0xff] }
 0x446   : > { %v2853_v60 = vld.sshfl [vmem:[#allocation1] sm:$0xff pattern:$0x75316420]  ;;  %v2854_v31 = vld.sshfl [vmem:[#allocation1 + $0x8] sm:$0xff pattern:$0x75316420] }
 0x447   : > { %2855 = vrot.lane.b32.xlu1 %v2853_v60, %s7080_s30  ;;  %2885 = vst [vmem:[#allocation1] ss:$2 sm:$0xff] %v6005_v14  ;;  %2857 = vrot.lane.b32.xlu2 %v2854_v31, %s7080_s30  ;;  %v6080_v60 = vpop.permute.xlu2 %1892  ;;  %v6085_v31 = vpop.permute.xlu0 %1859 }
 0x448   : > { %7144 = vst [vmem:[#allocation47_spill] sm:$0xff] %v6080_v60 }
 0x449   : > { %7145 = vst [vmem:[#allocation48_spill] sm:$0xff] %v6085_v31 }
 0x44e   : > { %v2886_v44 = vld.sshfl [vmem:[#allocation1] sm:$0xff pattern:$0x75316420] }
 0x44f   : > { %2887 = vrot.lane.b32.xlu0 %v2886_v44, %s7070_s24  ;;  %2889 = vst [vmem:[#allocation1] ss:$2 sm:$0xff] %v5828_v57  ;;  %v6089_v44 = vpop.permute.xlu1 %1926  ;;  %v6091_v41 = vpop.permute.xlu2 %1928  ;;  %s7162_s24 = smov 77   ;;  %v7206_v50 = vld [vmem:[#allocation47_spill] sm:$0xff] }
 0x450   : > { %7146 = vst [vmem:[#allocation49_spill] sm:$0xff] %v6089_v44  ;;  %v6093_v58 = vpop.permute.xlu0 %1921 }
 0x451   : > { %7147 = vst [vmem:[#allocation50_spill] sm:$0xff] %v6091_v41 }
 0x452   : > { %7148 = vst [vmem:[#allocation51_spill] sm:$0xff] %v6093_v58 }
 0x456   : > { %v2890_v49 = vld.sshfl [vmem:[#allocation1] sm:$0xff pattern:$0x75316420]  ;;  %v2891_v54 = vld.sshfl [vmem:[#allocation1 + $0x8] sm:$0xff pattern:$0x75316420] }
 0x457   : > { %2892 = vrot.lane.b32.xlu1 %v2890_v49, %s7077_s3  ;;  %2922 = vst [vmem:[#allocation1] ss:$2 sm:$0xff] %v6005_v14  ;;  %2894 = vrot.lane.b32.xlu2 %v2891_v54, %s7077_s3  ;;  %v6098_v49 = vpop.permute.xlu1 %1963  ;;  %v6100_v54 = vpop.permute.xlu2 %1965  ;;  %v7199_v53 = vld [vmem:[#allocation49_spill] sm:$0xff] }
 0x458   : > { %7149 = vst [vmem:[#allocation52_spill] sm:$0xff] %v6098_v49  ;;  %v6102_v31 = vpop.permute.xlu0 %1958 }
 0x459   : > { %7150 = vst [vmem:[#allocation53_spill] sm:$0xff] %v6100_v54 }
 0x45a   : > { %7151 = vst [vmem:[#allocation54_spill] sm:$0xff] %v6102_v31 }
 0x45e   : > { %v2923_v59 = vld.sshfl [vmem:[#allocation1] sm:$0xff pattern:$0x75316420] }
 0x45f   : > { %2924 = vrot.lane.b32.xlu0 %v2923_v59, %s7068_s13  ;;  %2926 = vst [vmem:[#allocation1] ss:$2 sm:$0xff] %v5828_v57  ;;  %v6106_v58 = vpop.permute.xlu1 %2000  ;;  %v6108_v44 = vpop.permute.xlu2 %2002  ;;  %v7196_v43 = vld [vmem:[#allocation52_spill] sm:$0xff] }
 0x460   : > { %7152 = vst [vmem:[#allocation55_spill] sm:$0xff] %v6106_v58  ;;  %v7195_v42 = vld [vmem:[#allocation53_spill] sm:$0xff] }
 0x461   : > { %7153 = vst [vmem:[#allocation56_spill] sm:$0xff] %v6108_v44  ;;  %v1967_v46 = vsel %vm1103_vm4, %v7196_v43, %v7195_v42 }
 0x466   : > { %v2927_v60 = vld.sshfl [vmem:[#allocation1] sm:$0xff pattern:$0x75316420]  ;;  %v2928_v11 = vld.sshfl [vmem:[#allocation1 + $0x8] sm:$0xff pattern:$0x75316420] }
 0x467   : > { %2929 = vrot.lane.b32.xlu1 %v2927_v60, %s7081_s29  ;;  %2959 = vst [vmem:[#allocation1] ss:$2 sm:$0xff] %v6005_v14  ;;  %2931 = vrot.lane.b32.xlu2 %v2928_v11, %s7081_s29  ;;  %v6113_v11 = vpop.permute.xlu0 %1995  ;;  %v6115_v31 = vpop.permute.xlu1 %2037  ;;  %v7201_v1 = vld [vmem:[#allocation55_spill] sm:$0xff] }
 0x468   : > { %7155 = vst [vmem:[#allocation57_spill] sm:$0xff] %v6113_v11  ;;  %v7200_v56 = vld [vmem:[#allocation56_spill] sm:$0xff] }
 0x469   : > { %7156 = vst [vmem:[#allocation58_spill] sm:$0xff] %v6115_v31  ;;  %v2004_v6 = vsel %vm1141_vm3, %v7201_v1, %v7200_v56 }
 0x46e   : > { %v2960_v59 = vld.sshfl [vmem:[#allocation1] sm:$0xff pattern:$0x75316420] }
 0x46f   : > { %2961 = vrot.lane.b32.xlu0 %v2960_v59, %s7073_s25  ;;  %2963 = vst [vmem:[#allocation1] ss:$2 sm:$0xff] %v5828_v57  ;;  %v6117_v59 = vpop.permute.xlu2 %2039  ;;  %v6121_v58 = vpop.permute.xlu0 %2032 }
 0x470   : > { %7157 = vst [vmem:[#allocation59_spill] sm:$0xff] %v6117_v59 }
 0x471   : > { %7159 = vst [vmem:[#allocation60_spill] sm:$0xff] %v6121_v58 }
 0x476   : > { %v2964_v60 = vld.sshfl [vmem:[#allocation1] sm:$0xff pattern:$0x75316420]  ;;  %v2965_v41 = vld.sshfl [vmem:[#allocation1 + $0x8] sm:$0xff pattern:$0x75316420] }
 0x477   : > { %2966 = vrot.lane.b32.xlu1 %v2964_v60, %s7154_s4  ;;  %2996 = vst [vmem:[#allocation1] ss:$2 sm:$0xff] %v6005_v14  ;;  %2968 = vrot.lane.b32.xlu2 %v2965_v41, %s7154_s4  ;;  %v6126_v41 = vpop.permute.xlu1 %2074  ;;  %v6128_v60 = vpop.permute.xlu2 %2076  ;;  %s7164_s4 = sld [smem:[#allocation66_spill]] }
 0x478   : > { %v6130_v11 = vpop.permute.xlu0 %2069 }
 0x47e   : > { %v2997_v49 = vld.sshfl [vmem:[#allocation1] sm:$0xff pattern:$0x75316420] }
 0x47f   : > { %2998 = vrot.lane.b32.xlu0 %v2997_v49, %s7158_s22  ;;  %3000 = vst [vmem:[#allocation1] ss:$2 sm:$0xff] %v5828_v57  ;;  %v6134_v49 = vpop.permute.xlu1 %2111  ;;  %v6136_v58 = vpop.permute.xlu2 %2113  ;;  %s7161_s22 = sld [smem:[#allocation2_spill]] }
 0x480   : > { %v6138_v27 = vpop.permute.xlu0 %2106 }
 0x486   : > { %v3001_v44 = vld.sshfl [vmem:[#allocation1] sm:$0xff pattern:$0x75316420]  ;;  %v3002_v54 = vld.sshfl [vmem:[#allocation1 + $0x8] sm:$0xff pattern:$0x75316420] }
 0x487   : > { %3003 = vrot.lane.b32.xlu1 %v3001_v44, %s7160_s0  ;;  %3033 = vst [vmem:[#allocation1] ss:$2 sm:$0xff] %v6005_v14  ;;  %3005 = vrot.lane.b32.xlu2 %v3002_v54, %s7160_s0  ;;  %v6160_v3 = vpop.permute.xlu1 %2148  ;;  %v6162_v5 = vpop.permute.xlu2 %2150  ;;  %s7163_s0 = smov 84  }
 0x488   : > { %v6166_v2 = vpop.permute.xlu0 %2143  ;;  %v2152_v19 = vsel %vm1293_vm7, %v6160_v3, %v6162_v5 }
 0x48e   : > { %v3034_v31 = vld.sshfl [vmem:[#allocation1] sm:$0xff pattern:$0x75316420] }
 0x48f   : > { %3035 = vrot.lane.b32.xlu0 %v3034_v31, %s7075_s20  ;;  %3037 = vst [vmem:[#allocation1] ss:$2 sm:$0xff] %v5828_v57  ;;  %v6168_v17 = vpop.permute.xlu1 %2185  ;;  %v6170_v15 = vpop.permute.xlu2 %2187 }
 0x490   : > { %v6188_v31 = vpop.permute.xlu0 %2180 }
 0x496   : > { %v3038_v44 = vld.sshfl [vmem:[#allocation1] sm:$0xff pattern:$0x75316420]  ;;  %v3039_v59 = vld.sshfl [vmem:[#allocation1 + $0x8] sm:$0xff pattern:$0x75316420] }
 0x497   : > { %3040 = vrot.lane.b32.xlu1 %v3038_v44, %s7162_s24  ;;  %3070 = vst [vmem:[#allocation1] ss:$2 sm:$0xff] %v6005_v14  ;;  %3042 = vrot.lane.b32.xlu2 %v3039_v59, %s7162_s24  ;;  %s487_s24 = sadd.s32 3, %s7161_s22  ;;  %v6203_v0 = vpop.permute.xlu1 %2222  ;;  %v6205_v62 = vpop.permute.xlu2 %2224  ;;  %v7181_v59 = vld [vmem:[#allocation24_spill] sm:$0xff]  ;;  %v7182_v44 = vld [vmem:[#allocation21_spill] sm:$0xff] }
 0x498   : > { %p490_p9 = scmp.lt.s32.totalorder %s487_s24, 11  ;;  %v6221_v10 = vpop.permute.xlu0 %2217  ;;  %5134 = vmatmul.msk.f32.vlgmr.msra.gmra.mxu3 %vm542_vm1, %v7181_v59  ;;  %5130 = vmatmul.msk.f32.vlgmr.msra.gmra.mxu1 %vm542_vm1, %v7182_v44 }
 0x49a   : > { %s7281_s24 = smov (!%p490_p9, %s487_s24), 11 }
 0x49b   : > { %s5071_s16 = sshll.u32 %s7281_s24, 1 }
 0x49c   : > { %s494_s22 = sadd.s32 %s5593_s15, %s5071_s16  ;;  %s7178_s15 = smov 72  }
 0x49d   : > { %s5072_s24 = sshll.u32 %s494_s22, 2  ;;  %s7219_s22 = smov 60  }
 0x49e   : > { %v3071_v4 = vld.sshfl [vmem:[#allocation1] sm:$0xff pattern:$0x75316420]  ;;  %s496_s10 = scalar_lea.vmem %s7164_s4, %s5072_s24  ;;  %s7213_s4 = smov 64  }
 0x49f   : > { %3072 = vrot.lane.b32.xlu0 %v3071_v4, %s7077_s3  ;;  %3074 = vst [vmem:[#allocation1] ss:$2 sm:$0xff] %v5828_v57  ;;  %v6219_v63 = vld [vmem:[%s496_s10] sm:$0xff]  ;;  %v6247_v25 = vpop.permute.xlu1 %2284  ;;  %v6249_v30 = vpop.permute.xlu2 %2288  ;;  %v7183_v4 = vld [vmem:[#allocation35_spill] sm:$0xff]  ;;  %s7197_s10 = smov 68   ;;  %s7220_s24 = smov 40  }
 0x4a0   : > { %v6259_v28 = vpop.permute.xlu0 %2254  ;;  %5147 = vmatpush.msk.msra.mxu2 %vm545_vm0, %v7183_v4  ;;  %5142 = vmatmul.msk.f32.vlgmr.msrb.gmra.mxu3 %vm542_vm1, %v7189_v23  ;;  %v7207_v4 = vld [vmem:[#allocation59_spill] sm:$0xff]  ;;  %v7210_v23 = vld [vmem:[#allocation38_spill] sm:$0xff]  ;;  %s7221_s16 = smov 36  }
 0x4a1   : > { %5148 = vmatmul.msk.f32.vlgmr.msra.gmra.mxu2 %vm542_vm1, %v7202_v16 }
 0x4a2   : > { %5155 = vmatpush.msk.msrb.mxu2 %vm545_vm0, %v7191_v21  ;;  %v2226_v21 = vsel %vm1369_vm10, %v6203_v0, %v6205_v62  ;;  %v7218_v62 = vld [vmem:[#allocation60_spill] sm:$0xff] }
 0x4a4   : > { %5163 = vmatpush.msk.msra.mxu2 %vm545_vm0, %v1967_v46 }
 0x4a6   : > { %v3075_v7 = vld.sshfl [vmem:[#allocation1] sm:$0xff pattern:$0x75316420]  ;;  %v3076_v13 = vld.sshfl [vmem:[#allocation1 + $0x8] sm:$0xff pattern:$0x75316420] }
 0x4a7   : > { %3077 = vrot.lane.b32.xlu1 %v3075_v7, %s7082_s9  ;;  %3107 = vst [vmem:[#allocation1] ss:$2 sm:$0xff] %v6005_v14  ;;  %3079 = vrot.lane.b32.xlu2 %v3076_v13, %s7082_s9  ;;  %v6281_v39 = vpop.permute.xlu1 %2321  ;;  %v6283_v35 = vpop.permute.xlu2 %2350  ;;  %v7184_v7 = vld [vmem:[#allocation31_spill] sm:$0xff]  ;;  %v7185_v13 = vld [vmem:[#allocation37_spill] sm:$0xff] }
 0x4a8   : > { %v6294_v36 = vpop.permute.xlu0 %2317  ;;  %5143 = vmatpush.msk.msra.mxu0 %vm545_vm0, %v7184_v7  ;;  %5149 = vmatpush.msk.msra.mxu3 %vm545_vm0, %v7185_v13  ;;  %v7208_v7 = vld [vmem:[#allocation58_spill] sm:$0xff] }
 0x4a9   : > { %5144 = vmatmul.msk.f32.vlgmr.msra.gmra.mxu0 %vm542_vm1, %v7203_v33  ;;  %5150 = vmatmul.msk.f32.vlgmr.msra.gmra.mxu3 %vm542_vm1, %v7204_v37  ;;  %v2041_v13 = vsel %vm1179_vm5, %v7208_v7, %v7207_v4 }
 0x4aa   : > { %5151 = vmatpush.msk.msrb.mxu0 %vm545_vm0, %v7192_v26  ;;  %5156 = vmatmul.msk.f32.vlgmr.msrb.gmra.mxu2 %vm542_vm1, %v7209_v22  ;;  %v7214_v26 = vld [vmem:[#allocation54_spill] sm:$0xff] }
 0x4ac   : > { %5159 = vmatpush.msk.msra.mxu0 %vm545_vm0, %v7206_v50 }
 0x4ae   : > { %v3108_v61 = vld.sshfl [vmem:[#allocation1] sm:$0xff pattern:$0x75316420] }
 0x4af   : > { %3109 = vrot.lane.b32.xlu0 %v3108_v61, %s7163_s0  ;;  %3137 = vst [vmem:[#allocation1] ss:$2 sm:$0xff] %v6005_v14  ;;  %v6307_v51 = vpop.permute.xlu1 %2383  ;;  %v6309_v52 = vpop.permute.xlu2 %2387  ;;  %v7186_v61 = vld [vmem:[#allocation36_spill] sm:$0xff] }
 0x4b0   : > { %v6325_v20 = vpop.permute.xlu0 %2354  ;;  %5145 = vmatpush.msk.msra.mxu1 %vm545_vm0, %v7186_v61  ;;  %v2115_v61 = vsel %vm1255_vm8, %v6134_v49, %v6136_v58  ;;  %v7211_v58 = vld [vmem:[#allocation44_spill] sm:$0xff] }
 0x4b1   : > { %5152 = vmatmul.msk.f32.vlgmr.msrb.gmra.mxu0 %vm542_vm1, %v7210_v23  ;;  %v7212_v49 = vld [vmem:[#allocation40_spill] sm:$0xff]  ;;  %5171 = vmatpush.msk.msrb.mxu2 %vm545_vm0, %v2115_v61 }
 0x4b2   : > { %5167 = vmatpush.msk.msrb.mxu0 %vm545_vm0, %v2041_v13  ;;  %5164 = vmatmul.msk.f32.vlgmr.msra.gmra.mxu2 %vm542_vm1, %v7214_v26 }
 0x4b3   : > { %5179 = vmatpush.msk.msra.mxu2 %vm545_vm0, %v5828_v57 }
 0x4b6   : > { %v3138_v8 = vld.sshfl [vmem:[#allocation1] sm:$0xff pattern:$0x75316420] }
 0x4b7   : > { %3139 = vrot.lane.b32.xlu1 %v3138_v8, %s7081_s29  ;;  %3141 = vst [vmem:[#allocation1] ss:$2 sm:$0xff] %v6219_v63  ;;  %v6337_v24 = vpop.permute.xlu1 %2420  ;;  %v6339_v54 = vpop.permute.xlu2 %2449 }
 0x4b8   : > { %v6353_v8 = vpop.permute.xlu0 %2416 }
 0x4ba   : > { %5172 = vmatmul.msk.f32.vlgmr.msrb.gmra.mxu2 %vm542_vm1, %v6138_v27 }
 0x4bb   : > { %5187 = vmatpush.msk.msrb.mxu2 %vm545_vm0, %v6309_v52 }
 0x4be   : > { %v3142_v18 = vld.sshfl [vmem:[#allocation1] sm:$0xff pattern:$0x75316420] }
 0x4bf   : > { %3170 = vst [vmem:[#allocation1] ss:$2 sm:$0xff] %v6005_v14  ;;  %3143 = vrot.lane.b32.xlu2 %v3142_v18, %s7093_s1  ;;  %v7190_v18 = vld [vmem:[#allocation25_spill] sm:$0xff]  ;;  %v6369_v32 = vpop.permute.xlu1 %2482  ;;  %v6371_v34 = vpop.permute.xlu2 %2486 }
 0x4c0   : > { %5138 = vmatmul.msk.f32.vlgmr.msrb.gmra.mxu1 %vm542_vm1, %v7190_v18  ;;  %v6380_v47 = vpop.permute.xlu0 %2453 }
 0x4c1   : > { %5153 = vmatpush.msk.msrb.mxu1 %vm545_vm0, %v7194_v38  ;;  %v7216_v38 = vld [vmem:[#allocation57_spill] sm:$0xff] }
 0x4c2   : > { %5180 = vmatmul.msk.f32.vlgmr.msra.gmra.mxu2 %vm542_vm1, %v6259_v28 }
 0x4c6   : > { %v3171_v29 = vld.sshfl [vmem:[#allocation1] sm:$0xff pattern:$0x75316420] }
 0x4c7   : > { %3172 = vrot.lane.b32.xlu0 %v3171_v29, %s7082_s9  ;;  %3174 = vst [vmem:[#allocation1] ss:$2 sm:$0xff] %v6219_v63  ;;  %v7193_v29 = vld [vmem:[#allocation48_spill] sm:$0xff]  ;;  %v2520_v9 = vpop.permute.xlu1 %2519  ;;  %v6403_v59 = vpop.permute.xlu2 %2548 }
 0x4c8   : > { %5157 = vmatpush.msk.msrb.mxu3 %vm545_vm0, %v7193_v29  ;;  %v6423_v18 = vpop.permute.xlu0 %2515  ;;  %v7215_v29 = vld [vmem:[#allocation46_spill] sm:$0xff]  ;;  %5195 = vmatpush.msk.msra.mxu2 %vm545_vm0, %v2520_v9 }
 0x4c9   : > { %5158 = vmatmul.msk.f32.vlgmr.msrb.gmra.mxu3 %vm542_vm1, %v7211_v58  ;;  %5160 = vmatmul.msk.f32.vlgmr.msra.gmra.mxu0 %vm542_vm1, %v7215_v29 }
 0x4ca   : > { %5165 = vmatpush.msk.msra.mxu3 %vm545_vm0, %v2004_v6  ;;  %5188 = vmatmul.msk.f32.vlgmr.msrb.gmra.mxu2 %vm542_vm1, %v6307_v51 }
 0x4cc   : > { %5173 = vmatpush.msk.msrb.mxu3 %vm545_vm0, %v2152_v19 }
 0x4ce   : > { %v3175_v45 = vld.sshfl [vmem:[#allocation1] sm:$0xff pattern:$0x75316420] }
 0x4cf   : > { %3176 = vrot.lane.b32.xlu1 %v3175_v45, %s7095_s6  ;;  %3203 = vst [vmem:[#allocation1] ss:$2 sm:$0xff] %v6005_v14  ;;  %v7198_v45 = vld [vmem:[#allocation50_spill] sm:$0xff]  ;;  %v6436_v3 = vpop.permute.xlu1 %2581  ;;  %v2586_v5 = vpop.permute.xlu2 %2585 }
 0x4d0   : > { %v1930_v55 = vsel %vm1065_vm2, %v7199_v53, %v7198_v45 }
 0x4d1   : > { %5166 = vmatmul.msk.f32.vlgmr.msra.gmra.mxu3 %vm542_vm1, %v7216_v38  ;;  %5168 = vmatmul.msk.f32.vlgmr.msrb.gmra.mxu0 %vm542_vm1, %v7218_v62 }
 0x4d2   : > { %5181 = vmatpush.msk.msra.mxu3 %vm545_vm0, %v6249_v30  ;;  %5196 = vmatmul.msk.f32.vlgmr.msra.gmra.mxu2 %vm542_vm1, %v6423_v18 }
 0x4d6   : > { %v3204_v48 = vld.sshfl [vmem:[#allocation1] sm:$0xff pattern:$0x75316420] }
 0x4d7   : > { %3207 = vst [vmem:[#allocation1] ss:$2 sm:$0xff] %v6219_v63  ;;  %3205 = vrot.lane.b32.xlu2 %v3204_v48, %s7178_s15  ;;  %v7205_v48 = vld [vmem:[#allocation32_spill] sm:$0xff]  ;;  %v2619_v57 = vpop.permute.xlu1 %2618 }
 0x4d8   : > { %5146 = vmatmul.msk.f32.vlgmr.msra.gmra.mxu1 %vm542_vm1, %v7205_v48 }
 0x4d9   : > { %5161 = vmatpush.msk.msra.mxu1 %vm545_vm0, %v1930_v55  ;;  %5174 = vmatmul.msk.f32.vlgmr.msrb.gmra.mxu3 %vm542_vm1, %v6166_v2 }
 0x4da   : > { %5189 = vmatpush.msk.msrb.mxu3 %vm545_vm0, %v6337_v24 }
 0x4de   : > { %v3208_v12 = vld.sshfl [vmem:[#allocation1] sm:$0xff pattern:$0x75316420] }
 0x4df   : > { %3209 = vrot.lane.b32.xlu0 %v3208_v12, %s7097_s28  ;;  %3236 = vst [vmem:[#allocation1] ss:$2 sm:$0xff] %v6005_v14  ;;  %v2078_v12 = vsel %vm1217_vm6, %v6126_v41, %v6128_v60  ;;  %v2189_v60 = vsel %vm1331_vm9, %v6168_v17, %v6170_v15  ;;  %v7217_v17 = vld [vmem:[#allocation51_spill] sm:$0xff]  ;;  %v2553_v15 = vpop.permute.xlu0 %2552 }
 0x4e0   : > { %5154 = vmatmul.msk.f32.vlgmr.msrb.gmra.mxu1 %vm542_vm1, %v7212_v49  ;;  %5175 = vmatpush.msk.msra.mxu0 %vm545_vm0, %v2189_v60 }
 0x4e1   : > { %5169 = vmatpush.msk.msrb.mxu1 %vm545_vm0, %v2078_v12  ;;  %5176 = vmatmul.msk.f32.vlgmr.msra.gmra.mxu0 %vm542_vm1, %v6188_v31 }
 0x4e2   : > { %5183 = vmatpush.msk.msrb.mxu0 %vm545_vm0, %v6281_v39  ;;  %5182 = vmatmul.msk.f32.vlgmr.msra.gmra.mxu3 %vm542_vm1, %v6247_v25 }
 0x4e3   : > { %5197 = vmatpush.msk.msra.mxu3 %vm545_vm0, %v2553_v15 }
 0x4e4   : > { %5191 = vmatpush.msk.msra.mxu0 %vm545_vm0, %v6380_v47 }
 0x4e6   : > { %v3237_v40 = vld.sshfl [vmem:[#allocation1] sm:$0xff pattern:$0x75316420] }
 0x4e7   : > { %3238 = vrot.lane.b32.xlu1 %v3237_v40, %s7197_s10  ;;  %3240 = vst [vmem:[#allocation1] ss:$2 sm:$0xff] %v6219_v63  ;;  %v2648_v40 = vpop.permute.xlu2 %2647  ;;  %v2615_v27 = vpop.permute.xlu0 %2614 }
 0x4e8   : > { %5162 = vmatmul.msk.f32.vlgmr.msra.gmra.mxu1 %vm542_vm1, %v7217_v17 }
 0x4e9   : > { %5177 = vmatpush.msk.msra.mxu1 %vm545_vm0, %v2226_v21  ;;  %5184 = vmatmul.msk.f32.vlgmr.msrb.gmra.mxu0 %vm542_vm1, %v6294_v36 }
 0x4ea   : > { %5190 = vmatmul.msk.f32.vlgmr.msrb.gmra.mxu3 %vm542_vm1, %v6353_v8  ;;  %5199 = vmatpush.msk.msrb.mxu0 %vm545_vm0, %v2586_v5 }
 0x4ee   : > { %v3241_v44 = vld.sshfl [vmem:[#allocation1] sm:$0xff pattern:$0x75316420] }
 0x4ef   : > { %3269 = vst [vmem:[#allocation1] ss:$2 sm:$0xff] %v6005_v14  ;;  %3242 = vrot.lane.b32.xlu2 %v3241_v44, %s7099_s23  ;;  %v2685_v2 = vpop.permute.xlu2 %2684  ;;  %v2652_v31 = vpop.permute.xlu0 %2651 }
 0x4f0   : > { %5170 = vmatmul.msk.f32.vlgmr.msrb.gmra.mxu1 %vm542_vm1, %v6130_v11  ;;  %v2681_v11 = vpop.permute.xlu1 %2680  ;;  %5203 = vmatpush.msk.msrb.mxu2 %vm545_vm0, %v2652_v31 }
 0x4f1   : > { %5185 = vmatpush.msk.msrb.mxu1 %vm545_vm0, %v6325_v20  ;;  %5205 = vmatpush.msk.msrb.mxu3 %vm545_vm0, %v2685_v2 }
 0x4f2   : > { %5192 = vmatmul.msk.f32.vlgmr.msra.gmra.mxu0 %vm542_vm1, %v6339_v54  ;;  %5198 = vmatmul.msk.f32.vlgmr.msra.gmra.mxu3 %vm542_vm1, %v6403_v59 }
 0x4f3   : > { %5204 = vmatmul.msk.f32.vlgmr.msrb.gmra.mxu2 %vm542_vm1, %v2648_v40 }
 0x4f6   : > { %v3270_v41 = vld.sshfl [vmem:[#allocation1] sm:$0xff pattern:$0x75316420] }
 0x4f7   : > { %3271 = vrot.lane.b32.xlu0 %v3270_v41, %s7213_s4  ;;  %3273 = vst [vmem:[#allocation1] ss:$2 sm:$0xff] %v6219_v63  ;;  %v2748_v25 = vpop.permute.xlu2 %2747 }
 0x4f8   : > { %5178 = vmatmul.msk.f32.vlgmr.msra.gmra.mxu1 %vm542_vm1, %v6221_v10  ;;  %v2744_v10 = vpop.permute.xlu1 %2743 }
 0x4f9   : > { %5193 = vmatpush.msk.msra.mxu1 %vm545_vm0, %v6371_v34 }
 0x4fa   : > { %5200 = vmatmul.msk.f32.vlgmr.msrb.gmra.mxu0 %vm542_vm1, %v6436_v3  ;;  %5206 = vmatmul.msk.f32.vlgmr.msrb.gmra.mxu3 %vm542_vm1, %v2681_v11 }
 0x4fe   : > { %v3274_v0 = vld.sshfl [vmem:[#allocation1] sm:$0xff pattern:$0x75316420] }
 0x4ff   : > { %3275 = vrot.lane.b32.xlu1 %v3274_v0, %s7061_s18  ;;  %3302 = vst [vmem:[#allocation1] ss:$2 sm:$0xff] %v6005_v14  ;;  %v2784_v52 = vpop.permute.xlu2 %2783 }
 0x500   : > { %5186 = vmatmul.msk.f32.vlgmr.msrb.gmra.mxu1 %vm542_vm1, %v6283_v35  ;;  %v2714_v35 = vpop.permute.xlu0 %2713  ;;  %v2782_v51 = vpop.permute.xlu1 %2781 }
 0x501   : > { %5201 = vmatpush.msk.msrb.mxu1 %vm545_vm0, %v2619_v57  ;;  %5207 = vmatpush.msk.msra.mxu0 %vm545_vm0, %v2714_v35  ;;  %v2785_v20 = vsel %vm1065_vm2, %v2782_v51, %v2784_v52 }
 0x502   : > { %5211 = vmatpush.msk.msra.mxu2 %vm545_vm0, %v2785_v20  ;;  %5208 = vmatmul.msk.f32.vlgmr.msra.gmra.mxu0 %vm542_vm1, %v6005_v14 }
 0x506   : > { %v3303_v30 = vld.sshfl [vmem:[#allocation1] sm:$0xff pattern:$0x75316420] }
 0x507   : > { %3306 = vst [vmem:[#allocation1] ss:$2 sm:$0xff] %v6219_v63  ;;  %3304 = vrot.lane.b32.xlu2 %v3303_v30, %s7219_s22  ;;  %v2821_v43 = vpop.permute.xlu2 %2820 }
 0x508   : > { %5194 = vmatmul.msk.f32.vlgmr.msra.gmra.mxu1 %vm542_vm1, %v6369_v32  ;;  %v2777_v54 = vpop.permute.xlu0 %2776  ;;  %v2819_v42 = vpop.permute.xlu1 %2818 }
 0x509   : > { %5209 = vmatpush.msk.msra.mxu1 %vm545_vm0, %v2748_v25  ;;  %5212 = vmatmul.msk.f32.vlgmr.msra.gmra.mxu2 %vm542_vm1, %v2777_v54  ;;  %v2822_v46 = vsel %vm1103_vm4, %v2819_v42, %v2821_v43 }
 0x50a   : > { %5213 = vmatpush.msk.msra.mxu3 %vm545_vm0, %v2822_v46 }
 0x50e   : > { %v3307_v28 = vld.sshfl [vmem:[#allocation1] sm:$0xff pattern:$0x75316420] }
 0x50f   : > { %3308 = vrot.lane.b32.xlu0 %v3307_v28, %s7062_s21  ;;  %3335 = vst [vmem:[#allocation1] ss:$2 sm:$0xff] %v6005_v14  ;;  %v2858_v56 = vpop.permute.xlu2 %2857 }
 0x510   : > { %5202 = vmatmul.msk.f32.vlgmr.msrb.gmra.mxu1 %vm542_vm1, %v2615_v27  ;;  %v2814_v32 = vpop.permute.xlu0 %2813  ;;  %v2856_v53 = vpop.permute.xlu1 %2855 }
 0x511   : > { %5214 = vmatmul.msk.f32.vlgmr.msra.gmra.mxu3 %vm542_vm1, %v2814_v32  ;;  %v2859_v6 = vsel %vm1141_vm3, %v2856_v53, %v2858_v56 }
 0x512   : > { %5215 = vmatpush.msk.msrb.mxu0 %vm545_vm0, %v2859_v6 }
 0x516   : > { %v3336_v39 = vld.sshfl [vmem:[#allocation1] sm:$0xff pattern:$0x75316420] }
 0x517   : > { %3337 = vrot.lane.b32.xlu1 %v3336_v39, %s7090_s27  ;;  %3339 = vst [vmem:[#allocation1] ss:$2 sm:$0xff] %v6219_v63  ;;  %v2895_v37 = vpop.permute.xlu2 %2894  ;;  %s7237_s27 = sld [smem:[#allocation67_spill]] }
 0x518   : > { %5210 = vmatmul.msk.f32.vlgmr.msra.gmra.mxu1 %vm542_vm1, %v2744_v10  ;;  %v2851_v47 = vpop.permute.xlu0 %2850  ;;  %v2893_v16 = vpop.permute.xlu1 %2892 }
 0x519   : > { %5216 = vmatmul.msk.f32.vlgmr.msrb.gmra.mxu0 %vm542_vm1, %v2851_v47  ;;  %v2896_v50 = vsel %vm1179_vm5, %v2893_v16, %v2895_v37 }
 0x51a   : > { %5217 = vmatpush.msk.msrb.mxu1 %vm545_vm0, %v2896_v50 }
 0x51e   : > { %v3340_v36 = vld.sshfl [vmem:[#allocation1] sm:$0xff pattern:$0x75316420] }
 0x51f   : > { %3368 = vst [vmem:[#allocation1] ss:$2 sm:$0xff] %v6005_v14  ;;  %3341 = vrot.lane.b32.xlu2 %v3340_v36, %s7064_s17  ;;  %v2932_v44 = vpop.permute.xlu2 %2931 }
 0x520   : > { %v2888_v1 = vpop.permute.xlu0 %2887  ;;  %v2930_v59 = vpop.permute.xlu1 %2929 }
 0x521   : > { %5218 = vmatmul.msk.f32.vlgmr.msrb.gmra.mxu1 %vm542_vm1, %v2888_v1  ;;  %v2933_v7 = vsel %vm1217_vm6, %v2930_v59, %v2932_v44 }
 0x522   : > { %5219 = vmatpush.msk.msrb.mxu2 %vm545_vm0, %v2933_v7 }
 0x526   : > { %v3369_v24 = vld.sshfl [vmem:[#allocation1] sm:$0xff pattern:$0x75316420] }
 0x527   : > { %3370 = vrot.lane.b32.xlu0 %v3369_v24, %s7092_s7  ;;  %3372 = vst [vmem:[#allocation1] ss:$2 sm:$0xff] %v6219_v63  ;;  %v2969_v12 = vpop.permute.xlu2 %2968  ;;  %s7241_s7 = smov 56  }
 0x528   : > { %v2925_v48 = vpop.permute.xlu0 %2924  ;;  %v2967_v61 = vpop.permute.xlu1 %2966 }
 0x529   : > { %5220 = vmatmul.msk.f32.vlgmr.msrb.gmra.mxu2 %vm542_vm1, %v2925_v48  ;;  %v2970_v22 = vsel %vm1255_vm8, %v2967_v61, %v2969_v12 }
 0x52a   : > { %5221 = vmatpush.msk.msrb.mxu3 %vm545_vm0, %v2970_v22 }
 0x52c   : > { %5229 = vmatpush.msk.msra.mxu3 %vm545_vm0, %v6219_v63 }
 0x52e   : > { %v3373_v8 = vld.sshfl [vmem:[#allocation1] sm:$0xff pattern:$0x75316420] }
 0x52f   : > { %3374 = vrot.lane.b32.xlu1 %v3373_v8, %s7065_s19  ;;  %3401 = vst [vmem:[#allocation1] ss:$2 sm:$0xff] %v6005_v14  ;;  %v3006_v58 = vpop.permute.xlu2 %3005 }
 0x530   : > { %v2962_v4 = vpop.permute.xlu0 %2961  ;;  %v3004_v18 = vpop.permute.xlu1 %3003 }
 0x531   : > { %5222 = vmatmul.msk.f32.vlgmr.msrb.gmra.mxu3 %vm542_vm1, %v2962_v4  ;;  %v3007_v41 = vsel %vm1293_vm7, %v3004_v18, %v3006_v58 }
 0x532   : > { %5223 = vmatpush.msk.msra.mxu0 %vm545_vm0, %v3007_v41 }
 0x536   : > { %v3402_v34 = vld.sshfl [vmem:[#allocation1] sm:$0xff pattern:$0x75316420] }
 0x537   : > { %3405 = vst [vmem:[#allocation1] ss:$2 sm:$0xff] %v6219_v63  ;;  %3403 = vrot.lane.b32.xlu2 %v3402_v34, %s7094_s5  ;;  %v3043_v5 = vpop.permute.xlu2 %3042  ;;  %s7259_s5 = sld [smem:[#allocation8_spill]] }
 0x538   : > { %v2999_v19 = vpop.permute.xlu0 %2998  ;;  %v3041_v3 = vpop.permute.xlu1 %3040 }
 0x539   : > { %5224 = vmatmul.msk.f32.vlgmr.msra.gmra.mxu0 %vm542_vm1, %v2999_v19  ;;  %v3044_v26 = vsel %vm1331_vm9, %v3041_v3, %v3043_v5 }
 0x53a   : > { %5225 = vmatpush.msk.msra.mxu1 %vm545_vm0, %v3044_v26 }
 0x53e   : > { %v3406_v45 = vld.sshfl [vmem:[#allocation1] sm:$0xff pattern:$0x75316420] }
 0x53f   : > { %3407 = vrot.lane.b32.xlu0 %v3406_v45, %s7067_s14  ;;  %3434 = vst [vmem:[#allocation1] ss:$2 sm:$0xff] %v6005_v14  ;;  %v3080_v17 = vpop.permute.xlu2 %3079 }
 0x540   : > { %v3036_v49 = vpop.permute.xlu0 %3035  ;;  %v3078_v38 = vpop.permute.xlu1 %3077 }
 0x541   : > { %5226 = vmatmul.msk.f32.vlgmr.msra.gmra.mxu1 %vm542_vm1, %v3036_v49  ;;  %v3081_v0 = vsel %vm1369_vm10, %v3078_v38, %v3080_v17 }
 0x542   : > { %5227 = vmatpush.msk.msra.mxu2 %vm545_vm0, %v3081_v0 }
 0x546   : > { %v3435_v55 = vld.sshfl [vmem:[#allocation1] sm:$0xff pattern:$0x75316420] }
 0x547   : > { %3436 = vrot.lane.b32.xlu1 %v3435_v55, %s7096_s8  ;;  %3438 = vst [vmem:[#allocation1] ss:$2 sm:$0xff] %v6219_v63  ;;  %v3144_v40 = vpop.permute.xlu2 %3143  ;;  %s7228_s8 = smov 12  }
 0x548   : > { %v3073_v21 = vpop.permute.xlu0 %3072  ;;  %v3140_v57 = vpop.permute.xlu1 %3139  ;;  %5231 = vmatpush.msk.msrb.mxu0 %vm545_vm0, %v3144_v40 }
 0x549   : > { %5228 = vmatmul.msk.f32.vlgmr.msra.gmra.mxu2 %vm542_vm1, %v3073_v21  ;;  %5232 = vmatmul.msk.f32.vlgmr.msrb.gmra.mxu0 %vm542_vm1, %v3140_v57 }
 0x54e   : > { %v3439_v33 = vld.sshfl [vmem:[#allocation1] sm:$0xff pattern:$0x75316420] }
 0x54f   : > { %3467 = vst [vmem:[#allocation1] ss:$2 sm:$0xff] %v6005_v14  ;;  %3440 = vrot.lane.b32.xlu2 %v3439_v33, %s7068_s13  ;;  %v3206_v2 = vpop.permute.xlu2 %3205 }
 0x550   : > { %v3110_v15 = vpop.permute.xlu0 %3109  ;;  %v3177_v11 = vpop.permute.xlu1 %3176 }
 0x551   : > { %5230 = vmatmul.msk.f32.vlgmr.msra.gmra.mxu3 %vm542_vm1, %v3110_v15  ;;  %5233 = vmatpush.msk.msrb.mxu1 %vm545_vm0, %v3177_v11 }
 0x556   : > { %v3468_v9 = vld.sshfl [vmem:[#allocation1] sm:$0xff pattern:$0x75316420] }
 0x557   : > { %3469 = vrot.lane.b32.xlu0 %v3468_v9, %s7220_s24  ;;  %3471 = vst [vmem:[#allocation1] ss:$2 sm:$0xff] %v6219_v63  ;;  %s7222_s24 = smov 102   ;;  %v3243_v25 = vpop.permute.xlu2 %3242 }
 0x558   : > { %v3173_v27 = vpop.permute.xlu0 %3172  ;;  %5237 = vmatpush.msk.msrb.mxu3 %vm545_vm0, %v3243_v25 }
 0x559   : > { %5234 = vmatmul.msk.f32.vlgmr.msrb.gmra.mxu1 %vm542_vm1, %v3173_v27  ;;  %v3239_v10 = vpop.permute.xlu1 %3238 }
 0x55a   : > { %5238 = vmatmul.msk.f32.vlgmr.msrb.gmra.mxu3 %vm542_vm1, %v3239_v10 }
 0x55e   : > { %v3472_v13 = vld.sshfl [vmem:[#allocation1] sm:$0xff pattern:$0x75316420] }
 0x55f   : > { %3473 = vrot.lane.b32.xlu1 %v3472_v13, %s7069_s26  ;;  %3500 = vst [vmem:[#allocation1] ss:$2 sm:$0xff] %v6005_v14 }
 0x560   : > { %v3210_v28 = vpop.permute.xlu0 %3209 }
 0x561   : > { %5235 = vmatpush.msk.msrb.mxu2 %vm545_vm0, %v3210_v28  ;;  %v3305_v51 = vpop.permute.xlu2 %3304 }
 0x562   : > { %5236 = vmatmul.msk.f32.vlgmr.msrb.gmra.mxu2 %vm542_vm1, %v3206_v2 }
 0x566   : > { %v3501_v23 = vld.sshfl [vmem:[#allocation1] sm:$0xff pattern:$0x75316420] }
 0x567   : > { %3502 = vrot.lane.b32.xlu0 %v3501_v23, %s7221_s16  ;;  %3504 = vst [vmem:[#allocation1] ss:$2 sm:$0xff] %v6219_v63  ;;  %s7223_s16 = smov 32  }
 0x569   : > { %v3272_v39 = vpop.permute.xlu0 %3271 }
 0x56e   : > { %v3505_v60 = vld.sshfl [vmem:[#allocation1] sm:$0xff pattern:$0x75316420] }
 0x56f   : > { %3533 = vst [vmem:[#allocation1] ss:$2 sm:$0xff] %v6005_v14  ;;  %3506 = vrot.lane.b32.xlu2 %v3505_v60, %s7222_s24 }
 0x571   : > { %v3276_v36 = vpop.permute.xlu1 %3275 }
 0x572   : > { %5239 = vmatpush.msk.msra.mxu0 %vm545_vm0, %v3276_v36 }
 0x573   : > { %5240 = vmatmul.msk.f32.vlgmr.msra.gmra.mxu0 %vm542_vm1, %v3272_v39 }
 0x576   : > { %v3534_v29 = vld.sshfl [vmem:[#allocation1] sm:$0xff pattern:$0x75316420] }
 0x577   : > { %3535 = vrot.lane.b32.xlu0 %v3534_v29, %s7223_s16  ;;  %3537 = vst [vmem:[#allocation1] ss:$2 sm:$0xff] %v6219_v63  ;;  %s7224_s16 = smov 28  }
 0x579   : > { %v3342_v54 = vpop.permute.xlu2 %3341 }
 0x57a   : > { %5243 = vmatpush.msk.msra.mxu2 %vm545_vm0, %v3342_v54 }
 0x57e   : > { %v3538_v62 = vld.sshfl [vmem:[#allocation1] sm:$0xff pattern:$0x75316420] }
 0x57f   : > { %3566 = vst [vmem:[#allocation1] ss:$2 sm:$0xff] %v6005_v14  ;;  %3539 = vrot.lane.b32.xlu2 %v3538_v62, %s7072_s12  ;;  %s7238_s12 = smov 108  }
 0x581   : > { %v3309_v52 = vpop.permute.xlu0 %3308 }
 0x582   : > { %5241 = vmatpush.msk.msra.mxu1 %vm545_vm0, %v3309_v52 }
 0x583   : > { %5242 = vmatmul.msk.f32.vlgmr.msra.gmra.mxu1 %vm542_vm1, %v3305_v51 }
 0x586   : > { %v3567_v30 = vld.sshfl [vmem:[#allocation1] sm:$0xff pattern:$0x75316420] }
 0x587   : > { %3568 = vrot.lane.b32.xlu0 %v3567_v30, %s7224_s16  ;;  %3570 = vst [vmem:[#allocation1] ss:$2 sm:$0xff] %v6219_v63  ;;  %s7225_s16 = smov 24  }
 0x589   : > { %v3338_v24 = vpop.permute.xlu1 %3337 }
 0x58a   : > { %5244 = vmatmul.msk.f32.vlgmr.msra.gmra.mxu2 %vm542_vm1, %v3338_v24 }
 0x58e   : > { %v3571_v31 = vld.sshfl [vmem:[#allocation1] sm:$0xff pattern:$0x75316420] }
 0x58f   : > { %3572 = vrot.lane.b32.xlu2 %v3571_v31, %s7073_s25  ;;  %3599 = vst [vmem:[#allocation1] ss:$2 sm:$0xff] %v6005_v14 }
 0x591   : > { %v3404_v42 = vpop.permute.xlu2 %3403 }
 0x596   : > { %v3600_v35 = vld.sshfl [vmem:[#allocation1] sm:$0xff pattern:$0x75316420] }
 0x597   : > { %3603 = vst [vmem:[#allocation1] ss:$2 sm:$0xff] %v6219_v63  ;;  %3601 = vrot.lane.b32.xlu2 %v3600_v35, %s7225_s16  ;;  %s7226_s16 = smov 20  }
 0x599   : > { %v3371_v34 = vpop.permute.xlu0 %3370 }
 0x59e   : > { %v3604_v20 = vld.sshfl [vmem:[#allocation1] sm:$0xff pattern:$0x75316420] }
 0x59f   : > { %3605 = vrot.lane.b32.xlu1 %v3604_v20, %s7075_s20  ;;  %3632 = vst [vmem:[#allocation1] ss:$2 sm:$0xff] %v6005_v14 }
 0x5a1   : > { %v3375_v32 = vpop.permute.xlu1 %3374 }
 0x5a2   : > { %5245 = vmatpush.msk.msra.mxu3 %vm545_vm0, %v3375_v32 }
 0x5a3   : > { %5246 = vmatmul.msk.f32.vlgmr.msra.gmra.mxu3 %vm542_vm1, %v3371_v34 }
 0x5a6   : > { %v3633_v8 = vld.sshfl [vmem:[#allocation1] sm:$0xff pattern:$0x75316420] }
 0x5a7   : > { %3634 = vrot.lane.b32.xlu1 %v3633_v8, %s7226_s16  ;;  %3636 = vst [vmem:[#allocation1] ss:$2 sm:$0xff] %v6219_v63  ;;  %s7227_s16 = smov 16  }
 0x5a9   : > { %v3441_v47 = vpop.permute.xlu2 %3440 }
 0x5aa   : > { %5249 = vmatpush.msk.msrb.mxu1 %vm545_vm0, %v3441_v47 }
 0x5ae   : > { %v3638_v43 = vld.sshfl [vmem:[#allocation1 + $0x8] sm:$0xff pattern:$0x75316420]  ;;  %v3637_v46 = vld.sshfl [vmem:[#allocation1] sm:$0xff pattern:$0x75316420] }
 0x5af   : > { %3641 = vrot.lane.b32.xlu1 %v3638_v43, %s7076_s2  ;;  %3669 = vst [vmem:[#allocation1] ss:$2 sm:$0xff] %v6005_v14  ;;  %3639 = vrot.lane.b32.xlu0 %v3637_v46, %s7076_s2 }
 0x5b1   : > { %v3408_v45 = vpop.permute.xlu0 %3407 }
 0x5b2   : > { %5247 = vmatpush.msk.msrb.mxu0 %vm545_vm0, %v3408_v45 }
 0x5b3   : > { %5248 = vmatmul.msk.f32.vlgmr.msrb.gmra.mxu0 %vm542_vm1, %v3404_v42 }
 0x5b6   : > { %v3670_v53 = vld.sshfl [vmem:[#allocation1] sm:$0xff pattern:$0x75316420] }
 0x5b7   : > { %3673 = vst [vmem:[#allocation1] ss:$2 sm:$0xff] %v6219_v63  ;;  %3671 = vrot.lane.b32.xlu2 %v3670_v53, %s7227_s16  ;;  %s7230_s16 = smov 4  }
 0x5b9   : > { %v3437_v55 = vpop.permute.xlu1 %3436 }
 0x5ba   : > { %5250 = vmatmul.msk.f32.vlgmr.msrb.gmra.mxu1 %vm542_vm1, %v3437_v55 }
 0x5be   : > { %v3675_v56 = vld.sshfl [vmem:[#allocation1 + $0x8] sm:$0xff pattern:$0x75316420]  ;;  %v3674_v1 = vld.sshfl [vmem:[#allocation1] sm:$0xff pattern:$0x75316420] }
 0x5bf   : > { %3678 = vrot.lane.b32.xlu1 %v3675_v56, %s7078_s11  ;;  %3676 = vrot.lane.b32.xlu0 %v3674_v1, %s7078_s11  ;;  %3706 = vst [vmem:[#allocation1] ss:$2 sm:$0xff] %v6005_v14  ;;  %s7235_s11 = smov 77  }
 0x5c6   : > { %v3707_v6 = vld.sshfl [vmem:[#allocation1] sm:$0xff pattern:$0x75316420] }
 0x5c7   : > { %3708 = vrot.lane.b32.xlu0 %v3707_v6, %s7228_s8  ;;  %3710 = vst [vmem:[#allocation1] ss:$2 sm:$0xff] %v6219_v63  ;;  %s7229_s8 = smov 8  }
 0x5c9   : > { %v3507_v16 = vpop.permute.xlu2 %3506  ;;  %v3470_v48 = vpop.permute.xlu0 %3469 }
 0x5ca   : > { %5253 = vmatpush.msk.msrb.mxu3 %vm545_vm0, %v3507_v16  ;;  %v6705_v16 = vpop.f32.mrf.mxu0 }
 0x5ce   : > { %v3712_v33 = vld.sshfl [vmem:[#allocation1 + $0x8] sm:$0xff pattern:$0x75316420]  ;;  %v3711_v37 = vld.sshfl [vmem:[#allocation1] sm:$0xff pattern:$0x75316420] }
 0x5cf   : > { %3715 = vrot.lane.b32.xlu1 %v3712_v33, %s7080_s30  ;;  %3743 = vst [vmem:[#allocation1] ss:$2 sm:$0xff] %v6005_v14  ;;  %3713 = vrot.lane.b32.xlu0 %v3711_v37, %s7080_s30  ;;  %s7233_s30 = sld [smem:[#allocation2_spill]] }
 0x5d1   : > { %v3474_v50 = vpop.permute.xlu1 %3473 }
 0x5d2   : > { %5251 = vmatpush.msk.msrb.mxu2 %vm545_vm0, %v3474_v50 }
 0x5d3   : > { %5252 = vmatmul.msk.f32.vlgmr.msrb.gmra.mxu2 %vm542_vm1, %v3470_v48 }
 0x5d6   : > { %v3744_v9 = vld.sshfl [vmem:[#allocation1] sm:$0xff pattern:$0x75316420] }
 0x5d7   : > { %3747 = vst [vmem:[#allocation1] ss:$2 sm:$0xff] %v6219_v63  ;;  %3745 = vrot.lane.b32.xlu2 %v3744_v9, %s7229_s8  ;;  %s7232_s8 = smov 78  }
 0x5d9   : > { %v3503_v59 = vpop.permute.xlu0 %3502  ;;  %v3540_v44 = vpop.permute.xlu2 %3539 }
 0x5da   : > { %5254 = vmatmul.msk.f32.vlgmr.msrb.gmra.mxu3 %vm542_vm1, %v3503_v59  ;;  %5255 = vmatpush.msk.msra.mxu0 %vm545_vm0, %v3540_v44  ;;  %v6717_v59 = vpop.f32.mrf.mxu1 }
 0x5de   : > { %v3748_v4 = vld.sshfl [vmem:[#allocation1] sm:$0xff pattern:$0x75316420]  ;;  %v3749_v7 = vld.sshfl [vmem:[#allocation1 + $0x8] sm:$0xff pattern:$0x75316420] }
 0x5df   : > { %3750 = vrot.lane.b32.xlu1 %v3748_v4, %s7077_s3  ;;  %3780 = vst [vmem:[#allocation1] ss:$2 sm:$0xff] %v6005_v14  ;;  %3752 = vrot.lane.b32.xlu2 %v3749_v7, %s7077_s3 }
 0x5e6   : > { %v3781_v13 = vld.sshfl [vmem:[#allocation1] sm:$0xff pattern:$0x75316420] }
 0x5e7   : > { %3784 = vst [vmem:[#allocation1] ss:$2 sm:$0xff] %v6219_v63  ;;  %3782 = vrot.lane.b32.xlu2 %v3781_v13, %s7230_s16  ;;  %s7231_s16 = smov 79  }
 0x5e9   : > { %v3536_v61 = vpop.permute.xlu0 %3535  ;;  %v3573_v12 = vpop.permute.xlu2 %3572 }
 0x5ea   : > { %5256 = vmatmul.msk.f32.vlgmr.msra.gmra.mxu0 %vm542_vm1, %v3536_v61  ;;  %5257 = vmatpush.msk.msra.mxu1 %vm545_vm0, %v3573_v12 }
 0x5ee   : > { %v3786_v19 = vld.sshfl [vmem:[#allocation1 + $0x8] sm:$0xff pattern:$0x75316420]  ;;  %v3785_v22 = vld.sshfl [vmem:[#allocation1] sm:$0xff pattern:$0x75316420] }
 0x5ef   : > { %3789 = vrot.lane.b32.xlu1 %v3786_v19, %s7081_s29  ;;  %3817 = vst [vmem:[#allocation1] ss:$2 sm:$0xff] %v6005_v14  ;;  %3787 = vrot.lane.b32.xlu0 %v3785_v22, %s7081_s29  ;;  %v6726_v19 = vpop.f32.mrf.mxu2 }
 0x5f1   : > { %v3602_v5 = vpop.permute.xlu2 %3601 }
 0x5f6   : > { %v6641_v23 = vld.sshfl [vmem:[#allocation1 + $0x8] sm:$0xff pattern:$0x75316420] }
 0x5f7   : > { %3819 = vst [vmem:[#allocation1] ss:$2 sm:$0xff] %v6219_v63 }
 0x5f9   : > { %v3569_v18 = vpop.permute.xlu0 %3568 }
 0x5fa   : > { %5258 = vmatmul.msk.f32.vlgmr.msra.gmra.mxu1 %vm542_vm1, %v3569_v18 }
 0x5fe   : > { %v3821_v58 = vld.sshfl [vmem:[#allocation1 + $0x8] sm:$0xff pattern:$0x75316420]  ;;  %v3820_v49 = vld.sshfl [vmem:[#allocation1] sm:$0xff pattern:$0x75316420] }
 0x5ff   : > { %3824 = vrot.lane.b32.xlu1 %v3821_v58, %s7231_s16  ;;  %3852 = vst [vmem:[#allocation1] ss:$2 sm:$0xff] %v6005_v14  ;;  %3822 = vrot.lane.b32.xlu0 %v3820_v49, %s7231_s16  ;;  %s7234_s16 = smov 120  }
 0x606   : > { %v3853_v41 = vld.sshfl [vmem:[#allocation1 + $0x8] sm:$0xff pattern:$0x75316420] }
 0x607   : > { %3856 = vst [vmem:[#allocation1] ss:$2 sm:$0xff] %v6219_v63  ;;  %3854 = vrot.lane.b32.xlu2 %v3853_v41, %s7099_s23 }
 0x60e   : > { %v3858_v60 = vld.sshfl [vmem:[#allocation1 + $0x8] sm:$0xff pattern:$0x75316420]  ;;  %v3857_v3 = vld.sshfl [vmem:[#allocation1] sm:$0xff pattern:$0x75316420] }
 0x60f   : > { %3861 = vrot.lane.b32.xlu0 %v3858_v60, %s7232_s8  ;;  %3889 = vst [vmem:[#allocation1] ss:$2 sm:$0xff] %v6005_v14  ;;  %3859 = vrot.lane.b32.xlu2 %v3857_v3, %s7232_s8  ;;  %s498_s8 = sadd.s32 4, %s7233_s30  ;;  %v6736_v3 = vpop.f32.mrf.mxu3 }
 0x610   : > { %p501_p10 = scmp.lt.s32.totalorder %s498_s8, 11 }
 0x611   : > { %v3606_v21 = vpop.permute.xlu1 %3605  ;;  %v3672_v30 = vpop.permute.xlu2 %3671 }
 0x612   : > { %5259 = vmatpush.msk.msra.mxu2 %vm545_vm0, %v3606_v21  ;;  %s7283_s8 = smov (!%p501_p10, %s498_s8), 11 }
 0x613   : > { %5260 = vmatmul.msk.f32.vlgmr.msra.gmra.mxu2 %vm542_vm1, %v3602_v5 }
 0x616   : > { %v3890_v26 = vld.sshfl [vmem:[#allocation1 + $0x8] sm:$0xff pattern:$0x75316420] }
 0x617   : > { %3893 = vst [vmem:[#allocation1] ss:$2 sm:$0xff] %v6219_v63  ;;  %3891 = vrot.lane.b32.xlu2 %v3890_v26, %s7234_s16  ;;  %s7236_s16 = sld [smem:[#allocation9_spill]]  ;;  %v6741_v26 = vpop.f32.mrf.mxu0 }
 0x619   : > { %v3635_v29 = vpop.permute.xlu1 %3634 }
 0x61e   : > { %v3894_v38 = vld.sshfl [vmem:[#allocation1] sm:$0xff pattern:$0x75316420]  ;;  %v3895_v17 = vld.sshfl [vmem:[#allocation1 + $0x8] sm:$0xff pattern:$0x75316420] }
 0x61f   : > { %3896 = vrot.lane.b32.xlu1 %v3894_v38, %s7235_s11  ;;  %3926 = vst [vmem:[#allocation1] ss:$2 sm:$0xff] %v6005_v14  ;;  %3898 = vrot.lane.b32.xlu2 %v3895_v17, %s7235_s11  ;;  %s5073_s11 = sshll.u32 %s7283_s8, 1  ;;  %v6746_v17 = vpop.f32.mrf.mxu1 }
 0x620   : > { %s505_s30 = sadd.s32 %s7236_s16, %s5073_s11  ;;  %s7244_s11 = smov 91  }
 0x621   : > { %v3642_v15 = vpop.permute.xlu1 %3641  ;;  %v3640_v0 = vpop.permute.xlu0 %3639  ;;  %s5074_s2 = sshll.u32 %s505_s30, 2  ;;  %s7243_s30 = smov 48  }
 0x622   : > { %v3643_v62 = vsel %vm1065_vm2, %v3640_v0, %v3642_v15  ;;  %s507_s8 = scalar_lea.vmem %s7237_s27, %s5074_s2  ;;  %s7239_s2 = smov 96  }
 0x623   : > { %5261 = vmatpush.msk.msra.mxu3 %vm545_vm0, %v3643_v62  ;;  %v6678_v10 = vld [vmem:[%s507_s8] sm:$0xff]  ;;  %s7242_s27 = smov 52   ;;  %s7261_s16 = sld [smem:[#allocation68_spill]] }
 0x624   : > { %5262 = vmatmul.msk.f32.vlgmr.msra.gmra.mxu3 %vm542_vm1, %v3635_v29 }
 0x626   : > { %v3927_v57 = vld.sshfl [vmem:[#allocation1 + $0x8] sm:$0xff pattern:$0x75316420] }
 0x627   : > { %3928 = vrot.lane.b32.xlu1 %v3927_v57, %s7061_s18  ;;  %3930 = vst [vmem:[#allocation1] ss:$2 sm:$0xff] %v6219_v63 }
 0x62e   : > { %v3932_v40 = vld.sshfl [vmem:[#allocation1 + $0x8] sm:$0xff pattern:$0x75316420]  ;;  %v3931_v27 = vld.sshfl [vmem:[#allocation1] sm:$0xff pattern:$0x75316420] }
 0x62f   : > { %3935 = vrot.lane.b32.xlu1 %v3932_v40, %s7082_s9  ;;  %3933 = vrot.lane.b32.xlu0 %v3931_v27, %s7082_s9  ;;  %3963 = vst [vmem:[#allocation1] ss:$2 sm:$0xff] %v6005_v14 }
 0x631   : > { %v3679_v11 = vpop.permute.xlu1 %3678  ;;  %v3677_v2 = vpop.permute.xlu0 %3676 }
 0x632   : > { %v3680_v28 = vsel %vm1103_vm4, %v3677_v2, %v3679_v11  ;;  %v3746_v51 = vpop.permute.xlu2 %3745 }
 0x633   : > { %5263 = vmatpush.msk.msrb.mxu0 %vm545_vm0, %v3680_v28  ;;  %v786_v28 = vpop.f32.mrf.mxu3 }
 0x634   : > { %5264 = vmatmul.msk.f32.vlgmr.msrb.gmra.mxu0 %vm542_vm1, %v3672_v30  ;;  %v753_v30 = vpop.f32.mrf.mxu2 }
 0x636   : > { %v3964_v63 = vld.sshfl [vmem:[#allocation1 + $0x8] sm:$0xff pattern:$0x75316420] }
 0x637   : > { %3965 = vrot.lane.b32.xlu0 %v3964_v63, %s7067_s14  ;;  %3993 = vst [vmem:[#allocation1] ss:$2 sm:$0xff] %v6005_v14 }
 0x639   : > { %v3709_v31 = vpop.permute.xlu0 %3708 }
 0x63a   : > { %v3753_v24 = vpop.permute.xlu2 %3752 }
 0x63e   : > { %v3994_v25 = vld.sshfl [vmem:[#allocation1 + $0x8] sm:$0xff pattern:$0x75316420] }
 0x63f   : > { %3995 = vrot.lane.b32.xlu0 %v3994_v25, %s7238_s12  ;;  %3997 = vst [vmem:[#allocation1] ss:$2 sm:$0xff] %v6678_v10  ;;  %s7247_s12 = smov 40  }
 0x641   : > { %v3716_v39 = vpop.permute.xlu1 %3715  ;;  %v3714_v35 = vpop.permute.xlu0 %3713 }
 0x642   : > { %v3717_v36 = vsel %vm1141_vm3, %v3714_v35, %v3716_v39  ;;  %v3783_v42 = vpop.permute.xlu2 %3782 }
 0x643   : > { %5265 = vmatpush.msk.msrb.mxu1 %vm545_vm0, %v3717_v36  ;;  %v819_v36 = vpop.f32.mrf.mxu0 }
 0x644   : > { %5266 = vmatmul.msk.f32.vlgmr.msrb.gmra.mxu1 %vm542_vm1, %v3709_v31 }
 0x646   : > { %v3998_v52 = vld.sshfl [vmem:[#allocation1] sm:$0xff pattern:$0x75316420] }
 0x647   : > { %3999 = vrot.lane.b32.xlu2 %v3998_v52, %s7093_s1  ;;  %4026 = vst [vmem:[#allocation1] ss:$2 sm:$0xff] %v6005_v14  ;;  %s7257_s1 = smov 16  }
 0x64e   : > { %v4027_v20 = vld.sshfl [vmem:[#allocation1 + $0x8] sm:$0xff pattern:$0x75316420] }
 0x64f   : > { %4028 = vrot.lane.b32.xlu1 %v4027_v20, %s7068_s13  ;;  %4030 = vst [vmem:[#allocation1] ss:$2 sm:$0xff] %v6678_v10 }
 0x651   : > { %v3751_v54 = vpop.permute.xlu1 %3750 }
 0x652   : > { %v3754_v8 = vsel %vm1179_vm5, %v3751_v54, %v3753_v24  ;;  %v852_v54 = vpop.f32.mrf.mxu1 }
 0x653   : > { %5267 = vmatpush.msk.msrb.mxu2 %vm545_vm0, %v3754_v8 }
 0x654   : > { %5268 = vmatmul.msk.f32.vlgmr.msrb.gmra.mxu2 %vm542_vm1, %v3746_v51 }
 0x656   : > { %v4031_v32 = vld.sshfl [vmem:[#allocation1] sm:$0xff pattern:$0x75316420] }
 0x657   : > { %4032 = vrot.lane.b32.xlu0 %v4031_v32, %s7095_s6  ;;  %4059 = vst [vmem:[#allocation1] ss:$2 sm:$0xff] %v6005_v14  ;;  %v590_v32 = vadd.f32 %v6717_v59, %v6705_v16  ;;  %s5075_s6 = sshll.u32 %s7259_s5, 3 }
 0x65e   : > { %v4060_v34 = vld.sshfl [vmem:[#allocation1 + $0x8] sm:$0xff pattern:$0x75316420] }
 0x65f   : > { %4061 = vrot.lane.b32.xlu1 %v4060_v34, %s7073_s25  ;;  %4063 = vst [vmem:[#allocation1] ss:$2 sm:$0xff] %v6678_v10  ;;  %v624_v34 = vadd.f32 %v6726_v19, %v590_v32 }
 0x661   : > { %v3790_v43 = vpop.permute.xlu1 %3789  ;;  %v3788_v46 = vpop.permute.xlu0 %3787 }
 0x662   : > { %v3791_v47 = vsel %vm1217_vm6, %v3788_v46, %v3790_v43  ;;  %v3855_v55 = vpop.permute.xlu2 %3854  ;;  %v657_v43 = vadd.f32 %v6736_v3, %v624_v34 }
 0x663   : > { %5269 = vmatpush.msk.msrb.mxu3 %vm545_vm0, %v3791_v47 }
 0x664   : > { %5270 = vmatmul.msk.f32.vlgmr.msrb.gmra.mxu3 %vm542_vm1, %v3783_v42 }
 0x666   : > { %v4064_v45 = vld.sshfl [vmem:[#allocation1] sm:$0xff pattern:$0x75316420] }
 0x667   : > { %4065 = vrot.lane.b32.xlu2 %v4064_v45, %s7097_s28  ;;  %4092 = vst [vmem:[#allocation1] ss:$2 sm:$0xff] %v6005_v14  ;;  %v885_v45 = vpop.f32.mrf.mxu2 }
 0x66a   : > { %v3860_v37 = vpop.permute.xlu2 %3859 }
 0x66e   : > { %v4093_v53 = vld.sshfl [vmem:[#allocation1 + $0x8] sm:$0xff pattern:$0x75316420] }
 0x66f   : > { %4096 = vst [vmem:[#allocation1] ss:$2 sm:$0xff] %v6678_v10  ;;  %4094 = vrot.lane.b32.xlu2 %v4093_v53, %s7239_s2  ;;  %v690_v53 = vadd.f32 %v6741_v26, %v657_v43 }
 0x671   : > { %v3825_v56 = vpop.permute.xlu1 %3824  ;;  %v3823_v1 = vpop.permute.xlu0 %3822 }
 0x672   : > { %v3826_v6 = vsel %vm1255_vm8, %v3823_v1, %v3825_v56  ;;  %v3892_v44 = vpop.permute.xlu2 %3891  ;;  %v723_v56 = vadd.f32 %v6746_v17, %v690_v53 }
 0x673   : > { %5271 = vmatpush.msk.msra.mxu0 %vm545_vm0, %v3826_v6 }
 0x674   : > { %5272 = vmatmul.msk.f32.vlgmr.msra.gmra.mxu0 %vm542_vm1, %v6641_v23  ;;  %v756_v6 = vadd.f32 %v753_v30, %v723_v56 }
 0x675   : > { %5279 = vmatpush.msk.msrb.mxu0 %vm545_vm0, %v6678_v10 }
 0x676   : > { %v4097_v33 = vld.sshfl [vmem:[#allocation1] sm:$0xff pattern:$0x75316420] }
 0x677   : > { %4098 = vrot.lane.b32.xlu0 %v4097_v33, %s7099_s23  ;;  %4125 = vst [vmem:[#allocation1] ss:$2 sm:$0xff] %v6005_v14  ;;  %v789_v33 = vadd.f32 %v786_v28, %v756_v6 }
 0x67a   : > { %v3899_v13 = vpop.permute.xlu2 %3898 }
 0x67e   : > { %v4126_v48 = vld.sshfl [vmem:[#allocation1 + $0x8] sm:$0xff pattern:$0x75316420] }
 0x67f   : > { %4129 = vst [vmem:[#allocation1] ss:$2 sm:$0xff] %v6678_v10  ;;  %4127 = vrot.lane.b32.xlu2 %v4126_v48, %s7075_s20 }
 0x681   : > { %v3862_v50 = vpop.permute.xlu0 %3861 }
 0x682   : > { %v3863_v9 = vsel %vm1293_vm7, %v3860_v37, %v3862_v50  ;;  %v918_v50 = vpop.f32.mrf.mxu3 }
 0x683   : > { %5273 = vmatpush.msk.msra.mxu1 %vm545_vm0, %v3863_v9  ;;  %v822_v9 = vadd.f32 %v819_v36, %v789_v33 }
 0x684   : > { %5274 = vmatmul.msk.f32.vlgmr.msra.gmra.mxu1 %vm542_vm1, %v3855_v55 }
 0x686   : > { %v4130_v4 = vld.sshfl [vmem:[#allocation1] sm:$0xff pattern:$0x75316420] }
 0x687   : > { %4131 = vrot.lane.b32.xlu1 %v4130_v4, %s7061_s18  ;;  %4158 = vst [vmem:[#allocation1] ss:$2 sm:$0xff] %v6005_v14  ;;  %s7254_s18 = smov 20  }
 0x68e   : > { %v4159_v7 = vld.sshfl [vmem:[#allocation1 + $0x8] sm:$0xff pattern:$0x75316420] }
 0x68f   : > { %4162 = vst [vmem:[#allocation1] ss:$2 sm:$0xff] %v6678_v10  ;;  %4160 = vrot.lane.b32.xlu2 %v4159_v7, %s7077_s3  ;;  %v951_v7 = vpop.f32.mrf.mxu0 }
 0x691   : > { %v3897_v61 = vpop.permute.xlu1 %3896 }
 0x692   : > { %v3900_v12 = vsel %vm1331_vm9, %v3897_v61, %v3899_v13 }
 0x693   : > { %5275 = vmatpush.msk.msra.mxu2 %vm545_vm0, %v3900_v12 }
 0x694   : > { %5276 = vmatmul.msk.f32.vlgmr.msra.gmra.mxu2 %vm542_vm1, %v3892_v44  ;;  %v855_v44 = vadd.f32 %v852_v54, %v822_v9 }
 0x696   : > { %v4163_v22 = vld.sshfl [vmem:[#allocation1] sm:$0xff pattern:$0x75316420]  ;;  %v888_v13 = vadd.f32 %v885_v45, %v855_v44 }
 0x697   : > { %4164 = vrot.lane.b32.xlu1 %v4163_v22, %s7062_s21  ;;  %4191 = vst [vmem:[#allocation1] ss:$2 sm:$0xff] %v6005_v14  ;;  %v984_v22 = vpop.f32.mrf.mxu1  ;;  %v1088_v26 = vpop.f32.mrf.mxu0  ;;  %s7256_s21 = smov 28  }
 0x698   : > { %v921_v12 = vadd.f32 %v918_v50, %v888_v13 }
 0x699   : > { %v3929_v23 = vpop.permute.xlu1 %3928 }
 0x69a   : > { %v954_v19 = vadd.f32 %v951_v7, %v921_v12 }
 0x69e   : > { %v4192_v18 = vld.sshfl [vmem:[#allocation1 + $0x8] sm:$0xff pattern:$0x75316420] }
 0x69f   : > { %4195 = vst [vmem:[#allocation1] ss:$2 sm:$0xff] %v6678_v10  ;;  %4193 = vrot.lane.b32.xlu0 %v4192_v18, %s7163_s0  ;;  %s7240_s0 = smov 101   ;;  %v987_v18 = vadd.f32 %v984_v22, %v954_v19  ;;  %v1126_v17 = vpop.f32.mrf.mxu1  ;;  %v1240_v28 = vpop.f32.mrf.mxu0 }
 0x6a1   : > { %v3936_v58 = vpop.permute.xlu1 %3935  ;;  %v3934_v49 = vpop.permute.xlu0 %3933 }
 0x6a2   : > { %v3937_v41 = vsel %vm1369_vm10, %v3934_v49, %v3936_v58  ;;  %v4000_v60 = vpop.permute.xlu2 %3999  ;;  %v1017_v58 = vpop.f32.mrf.mxu2 }
 0x6a3   : > { %5277 = vmatpush.msk.msra.mxu3 %vm545_vm0, %v3937_v41  ;;  %5281 = vmatpush.msk.msrb.mxu1 %vm545_vm0, %v4000_v60  ;;  %v1020_v49 = vadd.f32 %v1017_v58, %v987_v18  ;;  %v1050_v41 = vpop.f32.mrf.mxu3 }
 0x6a4   : > { %5278 = vmatmul.msk.f32.vlgmr.msra.gmra.mxu3 %vm542_vm1, %v3929_v23 }
 0x6a6   : > { %v4196_v5 = vld.sshfl [vmem:[#allocation1] sm:$0xff pattern:$0x75316420] }
 0x6a7   : > { %4197 = vrot.lane.b32.xlu1 %v4196_v5, %s7064_s17  ;;  %4224 = vst [vmem:[#allocation1] ss:$2 sm:$0xff] %v6005_v14  ;;  %v1053_v5 = vadd.f32 %v1050_v41, %v1020_v49  ;;  %v1392_v32 = vpop.f32.mrf.mxu0  ;;  %s7253_s17 = smov 78  }
 0x6a9   : > { %v3966_v21 = vpop.permute.xlu0 %3965 }
 0x6aa   : > { %5280 = vmatmul.msk.f32.vlgmr.msrb.gmra.mxu0 %vm542_vm1, %v3966_v21 }
 0x6ae   : > { %v4225_v29 = vld.sshfl [vmem:[#allocation1 + $0x8] sm:$0xff pattern:$0x75316420] }
 0x6af   : > { %4226 = vrot.lane.b32.xlu1 %v4225_v29, %s7081_s29  ;;  %4228 = vst [vmem:[#allocation1] ss:$2 sm:$0xff] %v6678_v10 }
 0x6b1   : > { %v3996_v38 = vpop.permute.xlu0 %3995 }
 0x6b2   : > { %5282 = vmatmul.msk.f32.vlgmr.msrb.gmra.mxu1 %vm542_vm1, %v3996_v38  ;;  %v1091_v38 = vadd.f32 %v1088_v26, %v1053_v5 }
 0x6b6   : > { %v4229_v15 = vld.sshfl [vmem:[#allocation1] sm:$0xff pattern:$0x75316420] }
 0x6b7   : > { %4230 = vrot.lane.b32.xlu2 %v4229_v15, %s7065_s19  ;;  %4257 = vst [vmem:[#allocation1] ss:$2 sm:$0xff] %v6005_v14  ;;  %s7255_s19 = smov 77  }
 0x6be   : > { %v4258_v0 = vld.sshfl [vmem:[#allocation1 + $0x8] sm:$0xff pattern:$0x75316420] }
 0x6bf   : > { %4261 = vst [vmem:[#allocation1] ss:$2 sm:$0xff] %v6678_v10  ;;  %4259 = vrot.lane.b32.xlu1 %v4258_v0, %s7082_s9  ;;  %v1129_v0 = vadd.f32 %v1126_v17, %v1091_v38 }
 0x6c1   : > { %v4066_v62 = vpop.permute.xlu2 %4065  ;;  %v4029_v40 = vpop.permute.xlu1 %4028 }
 0x6c2   : > { %5285 = vmatpush.msk.msrb.mxu3 %vm545_vm0, %v4066_v62  ;;  %v1164_v62 = vpop.f32.mrf.mxu2 }
 0x6c6   : > { %v4262_v57 = vld.sshfl [vmem:[#allocation1] sm:$0xff pattern:$0x75316420] }
 0x6c7   : > { %4263 = vrot.lane.b32.xlu0 %v4262_v57, %s7067_s14  ;;  %4290 = vst [vmem:[#allocation1] ss:$2 sm:$0xff] %v6005_v14  ;;  %v1167_v57 = vadd.f32 %v1164_v62, %v1129_v0  ;;  %s7250_s14 = smov 32  }
 0x6c9   : > { %v4033_v27 = vpop.permute.xlu0 %4032  ;;  %v4095_v39 = vpop.permute.xlu2 %4094 }
 0x6ca   : > { %5283 = vmatpush.msk.msrb.mxu2 %vm545_vm0, %v4033_v27  ;;  %v1316_v36 = vpop.f32.mrf.mxu2 }
 0x6cb   : > { %5284 = vmatmul.msk.f32.vlgmr.msrb.gmra.mxu2 %vm542_vm1, %v4029_v40  ;;  %v1202_v40 = vpop.f32.mrf.mxu3 }
 0x6ce   : > { %v4291_v11 = vld.sshfl [vmem:[#allocation1 + $0x8] sm:$0xff pattern:$0x75316420] }
 0x6cf   : > { %4294 = vst [vmem:[#allocation1] ss:$2 sm:$0xff] %v6678_v10  ;;  %4292 = vrot.lane.b32.xlu1 %v4291_v11, %s7178_s15  ;;  %v1205_v11 = vadd.f32 %v1202_v40, %v1167_v57 }
 0x6d1   : > { %v4062_v2 = vpop.permute.xlu1 %4061 }
 0x6d2   : > { %5286 = vmatmul.msk.f32.vlgmr.msrb.gmra.mxu3 %vm542_vm1, %v4062_v2  ;;  %v1455_v45 = vpop.f32.mrf.mxu2 }
 0x6d6   : > { %v4295_v63 = vld.sshfl [vmem:[#allocation1] sm:$0xff pattern:$0x75316420] }
 0x6d7   : > { %4296 = vrot.lane.b32.xlu0 %v4295_v63, %s7068_s13  ;;  %4323 = vst [vmem:[#allocation1] ss:$2 sm:$0xff] %v6005_v14  ;;  %s7249_s13 = smov 36  }
 0x6d9   : > { %v4128_v20 = vpop.permute.xlu2 %4127 }
 0x6de   : > { %v4324_v31 = vld.sshfl [vmem:[#allocation1 + $0x8] sm:$0xff pattern:$0x75316420] }
 0x6df   : > { %4327 = vst [vmem:[#allocation1] ss:$2 sm:$0xff] %v6678_v10  ;;  %4325 = vrot.lane.b32.xlu2 %v4324_v31, %s7197_s10  ;;  %v1243_v31 = vadd.f32 %v1240_v28, %v1205_v11 }
 0x6e6   : > { %v4328_v25 = vld.sshfl [vmem:[#allocation1] sm:$0xff pattern:$0x75316420] }
 0x6e7   : > { %4329 = vrot.lane.b32.xlu0 %v4328_v25, %s7069_s26  ;;  %4356 = vst [vmem:[#allocation1] ss:$2 sm:$0xff] %v6005_v14  ;;  %s7246_s26 = smov 90   ;;  %v1278_v25 = vpop.f32.mrf.mxu1 }
 0x6e9   : > { %v4099_v35 = vpop.permute.xlu0 %4098  ;;  %v4161_v46 = vpop.permute.xlu2 %4160 }
 0x6ea   : > { %5287 = vmatpush.msk.msra.mxu0 %vm545_vm0, %v4099_v35  ;;  %v1281_v35 = vadd.f32 %v1278_v25, %v1243_v31 }
 0x6eb   : > { %5288 = vmatmul.msk.f32.vlgmr.msra.gmra.mxu0 %vm542_vm1, %v4095_v39 }
 0x6ee   : > { %v4357_v51 = vld.sshfl [vmem:[#allocation1 + $0x8] sm:$0xff pattern:$0x75316420] }
 0x6ef   : > { %4358 = vrot.lane.b32.xlu0 %v4357_v51, %s7213_s4  ;;  %4360 = vst [vmem:[#allocation1] ss:$2 sm:$0xff] %v6678_v10  ;;  %v1319_v51 = vadd.f32 %v1316_v36, %v1281_v35  ;;  %v1422_v43 = vpop.f32.mrf.mxu1  ;;  %s7260_s4 = sld [smem:[#allocation62_spill]] }
 0x6f6   : > { %v4361_v52 = vld.sshfl [vmem:[#allocation1] sm:$0xff pattern:$0x75316420] }
 0x6f7   : > { %4362 = vrot.lane.b32.xlu1 %v4361_v52, %s7222_s24  ;;  %4389 = vst [vmem:[#allocation1] ss:$2 sm:$0xff] %v6005_v14  ;;  %v1354_v52 = vpop.f32.mrf.mxu3  ;;  %v1554_v9 = vpop.f32.mrf.mxu1 }
 0x6f8   : > { %v1357_v54 = vadd.f32 %v1354_v52, %v1319_v51 }
 0x6f9   : > { %v4132_v24 = vpop.permute.xlu1 %4131 }
 0x6fa   : > { %5289 = vmatpush.msk.msra.mxu1 %vm545_vm0, %v4132_v24 }
 0x6fb   : > { %5290 = vmatmul.msk.f32.vlgmr.msra.gmra.mxu1 %vm542_vm1, %v4128_v20 }
 0x6fe   : > { %v4390_v8 = vld.sshfl [vmem:[#allocation1 + $0x8] sm:$0xff pattern:$0x75316420] }
 0x6ff   : > { %4391 = vrot.lane.b32.xlu0 %v4390_v8, %s7219_s22  ;;  %4393 = vst [vmem:[#allocation1] ss:$2 sm:$0xff] %v6678_v10  ;;  %v1488_v56 = vpop.f32.mrf.mxu3  ;;  %v1684_v49 = vpop.f32.mrf.mxu1 }
 0x706   : > { %v4394_v42 = vld.sshfl [vmem:[#allocation1] sm:$0xff pattern:$0x75316420] }
 0x707   : > { %4422 = vst [vmem:[#allocation1] ss:$2 sm:$0xff] %v6005_v14  ;;  %4395 = vrot.lane.b32.xlu2 %v4394_v42, %s7240_s0  ;;  %v1395_v42 = vadd.f32 %v1392_v32, %v1357_v54  ;;  %v1620_v12 = vpop.f32.mrf.mxu3  ;;  %v1816_v57 = vpop.f32.mrf.mxu1 }
 0x709   : > { %v4165_v47 = vpop.permute.xlu1 %4164 }
 0x70a   : > { %5291 = vmatpush.msk.msra.mxu2 %vm545_vm0, %v4165_v47  ;;  %v1425_v47 = vadd.f32 %v1422_v43, %v1395_v42 }
 0x70b   : > { %5292 = vmatmul.msk.f32.vlgmr.msra.gmra.mxu2 %vm542_vm1, %v4161_v46 }
 0x70e   : > { %v4423_v55 = vld.sshfl [vmem:[#allocation1 + $0x8] sm:$0xff pattern:$0x75316420] }
 0x70f   : > { %4424 = vrot.lane.b32.xlu0 %v4423_v55, %s7241_s7  ;;  %4426 = vst [vmem:[#allocation1] ss:$2 sm:$0xff] %v6678_v10  ;;  %v1458_v55 = vadd.f32 %v1455_v45, %v1425_v47  ;;  %v1952_v36 = vpop.f32.mrf.mxu1  ;;  %s7262_s7 = sld [smem:[#allocation69_spill]] }
 0x711   : > { %v4231_v1 = vpop.permute.xlu2 %4230  ;;  %v4194_v37 = vpop.permute.xlu0 %4193  ;;  %v1491_v33 = vadd.f32 %v1488_v56, %v1458_v55 }
 0x712   : > { %5295 = vmatpush.msk.msrb.mxu0 %vm545_vm0, %v4231_v1 }
 0x716   : > { %v4427_v16 = vld.sshfl [vmem:[#allocation1] sm:$0xff pattern:$0x75316420] }
 0x717   : > { %4455 = vst [vmem:[#allocation1] ss:$2 sm:$0xff] %v6005_v14  ;;  %4428 = vrot.lane.b32.xlu2 %v4427_v16, %s7073_s25  ;;  %s7245_s25 = smov 44   ;;  %v2100_v55 = vpop.f32.mrf.mxu1 }
 0x719   : > { %v4198_v48 = vpop.permute.xlu1 %4197 }
 0x71a   : > { %5293 = vmatpush.msk.msra.mxu3 %vm545_vm0, %v4198_v48 }
 0x71b   : > { %5294 = vmatmul.msk.f32.vlgmr.msra.gmra.mxu3 %vm542_vm1, %v4194_v37  ;;  %v1521_v37 = vpop.f32.mrf.mxu0 }
 0x71c   : > { %v1524_v50 = vadd.f32 %v1521_v37, %v1491_v33 }
 0x71e   : > { %v4456_v59 = vld.sshfl [vmem:[#allocation1 + $0x8] sm:$0xff pattern:$0x75316420]  ;;  %v1557_v44 = vadd.f32 %v1554_v9, %v1524_v50 }
 0x71f   : > { %4457 = vrot.lane.b32.xlu1 %v4456_v59, %s7242_s27  ;;  %4459 = vst [vmem:[#allocation1] ss:$2 sm:$0xff] %v6678_v10 }
 0x721   : > { %v4227_v4 = vpop.permute.xlu1 %4226 }
 0x722   : > { %5296 = vmatmul.msk.f32.vlgmr.msrb.gmra.mxu0 %vm542_vm1, %v4227_v4  ;;  %v1587_v4 = vpop.f32.mrf.mxu2 }
 0x723   : > { %v1651_v18 = vpop.f32.mrf.mxu0 }
 0x726   : > { %v4460_v61 = vld.sshfl [vmem:[#allocation1] sm:$0xff pattern:$0x75316420] }
 0x727   : > { %4461 = vrot.lane.b32.xlu2 %v4460_v61, %s7075_s20  ;;  %4488 = vst [vmem:[#allocation1] ss:$2 sm:$0xff] %v6005_v14  ;;  %s7248_s20 = smov 89   ;;  %v1590_v61 = vadd.f32 %v1587_v4, %v1557_v44 }
 0x72b   : > { %v1783_v0 = vpop.f32.mrf.mxu0 }
 0x72e   : > { %v4489_v23 = vld.sshfl [vmem:[#allocation1 + $0x8] sm:$0xff pattern:$0x75316420] }
 0x72f   : > { %4492 = vst [vmem:[#allocation1] ss:$2 sm:$0xff] %v6678_v10  ;;  %4490 = vrot.lane.b32.xlu2 %v4489_v23, %s7243_s30  ;;  %v1623_v23 = vadd.f32 %v1620_v12, %v1590_v61 }
 0x731   : > { %v4260_v21 = vpop.permute.xlu1 %4259  ;;  %v1654_v58 = vadd.f32 %v1651_v18, %v1623_v23 }
 0x736   : > { %v4494_v60 = vld.sshfl [vmem:[#allocation1 + $0x8] sm:$0xff pattern:$0x75316420]  ;;  %v4493_v3 = vld.sshfl [vmem:[#allocation1] sm:$0xff pattern:$0x75316420] }
 0x737   : > { %4497 = vrot.lane.b32.xlu1 %v4494_v60, %s7244_s11  ;;  %4495 = vrot.lane.b32.xlu0 %v4493_v3, %s7244_s11  ;;  %4525 = vst [vmem:[#allocation1] ss:$2 sm:$0xff] %v6005_v14  ;;  %v1687_v60 = vadd.f32 %v1684_v49, %v1654_v58  ;;  %v1717_v3 = vpop.f32.mrf.mxu2 }
 0x739   : > { %v4264_v29 = vpop.permute.xlu0 %4263  ;;  %v4326_v8 = vpop.permute.xlu2 %4325  ;;  %v1720_v26 = vadd.f32 %v1717_v3, %v1687_v60 }
 0x73a   : > { %5297 = vmatpush.msk.msrb.mxu1 %vm545_vm0, %v4264_v29  ;;  %v1750_v29 = vpop.f32.mrf.mxu3 }
 0x73b   : > { %5298 = vmatmul.msk.f32.vlgmr.msrb.gmra.mxu1 %vm542_vm1, %v4260_v21 }
 0x73e   : > { %v4526_v15 = vld.sshfl [vmem:[#allocation1 + $0x8] sm:$0xff pattern:$0x75316420] }
 0x73f   : > { %4527 = vrot.lane.b32.xlu0 %v4526_v15, %s7245_s25  ;;  %4529 = vst [vmem:[#allocation1] ss:$2 sm:$0xff] %v6678_v10  ;;  %v1753_v15 = vadd.f32 %v1750_v29, %v1720_v26 }
 0x741   : > { %v4293_v2 = vpop.permute.xlu1 %4292  ;;  %v1786_v62 = vadd.f32 %v1783_v0, %v1753_v15 }
 0x742   : > { %v1882_v28 = vpop.f32.mrf.mxu3 }
 0x746   : > { %v4531_v27 = vld.sshfl [vmem:[#allocation1 + $0x8] sm:$0xff pattern:$0x75316420]  ;;  %v4530_v30 = vld.sshfl [vmem:[#allocation1] sm:$0xff pattern:$0x75316420] }
 0x747   : > { %4534 = vrot.lane.b32.xlu1 %v4531_v27, %s7246_s26  ;;  %4532 = vrot.lane.b32.xlu0 %v4530_v30, %s7246_s26  ;;  %4562 = vst [vmem:[#allocation1] ss:$2 sm:$0xff] %v6005_v14  ;;  %v1819_v27 = vadd.f32 %v1816_v57, %v1786_v62  ;;  %v1849_v30 = vpop.f32.mrf.mxu2 }
 0x749   : > { %v4297_v63 = vpop.permute.xlu0 %4296 }
 0x74a   : > { %5299 = vmatpush.msk.msrb.mxu2 %vm545_vm0, %v4297_v63  ;;  %v2026_v54 = vpop.f32.mrf.mxu3 }
 0x74b   : > { %5300 = vmatmul.msk.f32.vlgmr.msrb.gmra.mxu2 %vm542_vm1, %v4293_v2  ;;  %v1852_v2 = vadd.f32 %v1849_v30, %v1819_v27 }
 0x74d   : > { %v1885_v25 = vadd.f32 %v1882_v28, %v1852_v2 }
 0x74e   : > { %v4563_v39 = vld.sshfl [vmem:[#allocation1 + $0x8] sm:$0xff pattern:$0x75316420] }
 0x74f   : > { %4566 = vst [vmem:[#allocation1] ss:$2 sm:$0xff] %v6678_v10  ;;  %4564 = vrot.lane.b32.xlu2 %v4563_v39, %s7247_s12  ;;  %v1915_v39 = vpop.f32.mrf.mxu0 }
 0x750   : > { %v1918_v35 = vadd.f32 %v1915_v39, %v1885_v25 }
 0x752   : > { %v1955_v52 = vadd.f32 %v1952_v36, %v1918_v35  ;;  %v2174_v33 = vpop.f32.mrf.mxu3 }
 0x756   : > { %v4567_v20 = vld.sshfl [vmem:[#allocation1] sm:$0xff pattern:$0x75316420]  ;;  %v4568_v24 = vld.sshfl [vmem:[#allocation1 + $0x8] sm:$0xff pattern:$0x75316420] }
 0x757   : > { %4569 = vrot.lane.b32.xlu1 %v4567_v20, %s7248_s20  ;;  %4599 = vst [vmem:[#allocation1] ss:$2 sm:$0xff] %v6005_v14  ;;  %4571 = vrot.lane.b32.xlu2 %v4568_v24, %s7248_s20  ;;  %v1989_v20 = vpop.f32.mrf.mxu2  ;;  %v2063_v42 = vpop.f32.mrf.mxu0 }
 0x758   : > { %v1992_v24 = vadd.f32 %v1989_v20, %v1955_v52 }
 0x759   : > { %v4330_v34 = vpop.permute.xlu0 %4329 }
 0x75a   : > { %5301 = vmatpush.msk.msrb.mxu3 %vm545_vm0, %v4330_v34  ;;  %v2029_v34 = vadd.f32 %v2026_v54, %v1992_v24 }
 0x75b   : > { %5302 = vmatmul.msk.f32.vlgmr.msrb.gmra.mxu3 %vm542_vm1, %v4326_v8 }
 0x75e   : > { %v4600_v46 = vld.sshfl [vmem:[#allocation1 + $0x8] sm:$0xff pattern:$0x75316420] }
 0x75f   : > { %4603 = vst [vmem:[#allocation1] ss:$2 sm:$0xff] %v6678_v10  ;;  %4601 = vrot.lane.b32.xlu2 %v4600_v46, %s7249_s13  ;;  %v2211_v9 = vpop.f32.mrf.mxu0 }
 0x761   : > { %v4396_v53 = vpop.permute.xlu2 %4395  ;;  %v4359_v16 = vpop.permute.xlu0 %4358 }
 0x762   : > { %5305 = vmatpush.msk.msra.mxu1 %vm545_vm0, %v4396_v53  ;;  %v2066_v53 = vadd.f32 %v2063_v42, %v2029_v34 }
 0x766   : > { %v4605_v1 = vld.sshfl [vmem:[#allocation1 + $0x8] sm:$0xff pattern:$0x75316420]  ;;  %v4604_v6 = vld.sshfl [vmem:[#allocation1] sm:$0xff pattern:$0x75316420] }
 0x767   : > { %4608 = vrot.lane.b32.xlu1 %v4605_v1, %s7077_s3  ;;  %4606 = vrot.lane.b32.xlu0 %v4604_v6, %s7077_s3  ;;  %4636 = vst [vmem:[#allocation1] ss:$2 sm:$0xff] %v6005_v14  ;;  %s7251_s3 = smov 79   ;;  %v2103_v1 = vadd.f32 %v2100_v55, %v2066_v53  ;;  %v2344_v58 = vpop.f32.mrf.mxu0 }
 0x769   : > { %v4363_v48 = vpop.permute.xlu1 %4362 }
 0x76a   : > { %5303 = vmatpush.msk.msra.mxu0 %vm545_vm0, %v4363_v48 }
 0x76b   : > { %5304 = vmatmul.msk.f32.vlgmr.msra.gmra.mxu0 %vm542_vm1, %v4359_v16 }
 0x76e   : > { %v4637_v59 = vld.sshfl [vmem:[#allocation1 + $0x8] sm:$0xff pattern:$0x75316420] }
 0x76f   : > { %4640 = vst [vmem:[#allocation1] ss:$2 sm:$0xff] %v6678_v10  ;;  %4638 = vrot.lane.b32.xlu2 %v4637_v59, %s7250_s14 }
 0x771   : > { %v4392_v7 = vpop.permute.xlu0 %4391  ;;  %v4429_v13 = vpop.permute.xlu2 %4428 }
 0x772   : > { %5306 = vmatmul.msk.f32.vlgmr.msra.gmra.mxu1 %vm542_vm1, %v4392_v7  ;;  %5307 = vmatpush.msk.msra.mxu2 %vm545_vm0, %v4429_v13  ;;  %v2248_v7 = vpop.f32.mrf.mxu1 }
 0x776   : > { %v4642_v19 = vld.sshfl [vmem:[#allocation1 + $0x8] sm:$0xff pattern:$0x75316420]  ;;  %v4641_v22 = vld.sshfl [vmem:[#allocation1] sm:$0xff pattern:$0x75316420] }
 0x777   : > { %4645 = vrot.lane.b32.xlu1 %v4642_v19, %s7081_s29  ;;  %4643 = vrot.lane.b32.xlu0 %v4641_v22, %s7081_s29  ;;  %4673 = vst [vmem:[#allocation1] ss:$2 sm:$0xff] %v6005_v14  ;;  %s7252_s29 = smov 24   ;;  %v2311_v22 = vpop.f32.mrf.mxu3 }
 0x77a   : > { %v2377_v3 = vpop.f32.mrf.mxu1 }
 0x77e   : > { %v4674_v41 = vld.sshfl [vmem:[#allocation1 + $0x8] sm:$0xff pattern:$0x75316420] }
 0x77f   : > { %4677 = vst [vmem:[#allocation1] ss:$2 sm:$0xff] %v6678_v10  ;;  %v2443_v29 = vpop.f32.mrf.mxu3 }
 0x781   : > { %v4425_v5 = vpop.permute.xlu0 %4424  ;;  %v4462_v21 = vpop.permute.xlu2 %4461 }
 0x782   : > { %5308 = vmatmul.msk.f32.vlgmr.msra.gmra.mxu2 %vm542_vm1, %v4425_v5  ;;  %5309 = vmatpush.msk.msra.mxu3 %vm545_vm0, %v4462_v21  ;;  %v2509_v27 = vpop.f32.mrf.mxu1 }
 0x786   : > { %v4679_v38 = vld.sshfl [vmem:[#allocation1 + $0x8] sm:$0xff pattern:$0x75316420]  ;;  %v4678_v17 = vld.sshfl [vmem:[#allocation1] sm:$0xff pattern:$0x75316420] }
 0x787   : > { %4682 = vrot.lane.b32.xlu1 %v4679_v38, %s7251_s3  ;;  %4710 = vst [vmem:[#allocation1] ss:$2 sm:$0xff] %v6005_v14  ;;  %4680 = vrot.lane.b32.xlu0 %v4678_v17, %s7251_s3  ;;  %v2476_v17 = vpop.f32.mrf.mxu0  ;;  %v2575_v28 = vpop.f32.mrf.mxu3 }
 0x789   : > { %v4491_v43 = vpop.permute.xlu2 %4490 }
 0x78a   : > { %v2641_v52 = vpop.f32.mrf.mxu1 }
 0x78e   : > { %v4711_v40 = vld.sshfl [vmem:[#allocation1 + $0x8] sm:$0xff pattern:$0x75316420] }
 0x78f   : > { %4714 = vst [vmem:[#allocation1] ss:$2 sm:$0xff] %v6678_v10  ;;  %4712 = vrot.lane.b32.xlu2 %v4711_v40, %s7252_s29 }
 0x791   : > { %v4458_v11 = vpop.permute.xlu1 %4457 }
 0x792   : > { %5310 = vmatmul.msk.f32.vlgmr.msra.gmra.mxu3 %vm542_vm1, %v4458_v11 }
 0x796   : > { %v4715_v63 = vld.sshfl [vmem:[#allocation1] sm:$0xff pattern:$0x75316420]  ;;  %v4716_v31 = vld.sshfl [vmem:[#allocation1 + $0x8] sm:$0xff pattern:$0x75316420] }
 0x797   : > { %4717 = vrot.lane.b32.xlu1 %v4715_v63, %s7253_s17  ;;  %4747 = vst [vmem:[#allocation1] ss:$2 sm:$0xff] %v6005_v14  ;;  %4719 = vrot.lane.b32.xlu2 %v4716_v31, %s7253_s17  ;;  %v2608_v31 = vpop.f32.mrf.mxu0 }
 0x79e   : > { %v4748_v51 = vld.sshfl [vmem:[#allocation1 + $0x8] sm:$0xff pattern:$0x75316420] }
 0x79f   : > { %4751 = vst [vmem:[#allocation1] ss:$2 sm:$0xff] %v6678_v10  ;;  %4749 = vrot.lane.b32.xlu2 %v4748_v51, %s7254_s18  ;;  %v2737_v34 = vpop.f32.mrf.mxu0 }
 0x7a6   : > { %v4752_v8 = vld.sshfl [vmem:[#allocation1] sm:$0xff pattern:$0x75316420]  ;;  %v4753_v32 = vld.sshfl [vmem:[#allocation1 + $0x8] sm:$0xff pattern:$0x75316420] }
 0x7a7   : > { %4754 = vrot.lane.b32.xlu0 %v4752_v8, %s7255_s19  ;;  %4756 = vrot.lane.b32.xlu1 %v4753_v32, %s7255_s19  ;;  %4784 = vst [vmem:[#allocation1] ss:$2 sm:$0xff] %v6005_v14  ;;  %v2137_v14 = vpop.f32.mrf.mxu2  ;;  %v2707_v8 = vpop.f32.mrf.mxu3 }
 0x7a8   : > { %v2140_v16 = vadd.f32 %v2137_v14, %v2103_v1 }
 0x7a9   : > { %v4498_v46 = vpop.permute.xlu1 %4497  ;;  %v4496_v47 = vpop.permute.xlu0 %4495 }
 0x7aa   : > { %v4499_v45 = vsel %vm1065_vm2, %v4496_v47, %v4498_v46  ;;  %v2177_v50 = vadd.f32 %v2174_v33, %v2140_v16  ;;  %v4565_v13 = vpop.permute.xlu2 %4564  ;;  %v2881_v33 = vpop.f32.mrf.mxu0 }
 0x7ab   : > { %5311 = vmatpush.msk.msrb.mxu0 %vm545_vm0, %v4499_v45  ;;  %v2770_v45 = vpop.f32.mrf.mxu1 }
 0x7ac   : > { %5312 = vmatmul.msk.f32.vlgmr.msrb.gmra.mxu0 %vm542_vm1, %v4491_v43  ;;  %v2214_v4 = vadd.f32 %v2211_v9, %v2177_v50 }
 0x7ae   : > { %v4785_v56 = vld.sshfl [vmem:[#allocation1 + $0x8] sm:$0xff pattern:$0x75316420]  ;;  %v2251_v61 = vadd.f32 %v2248_v7, %v2214_v4 }
 0x7af   : > { %4788 = vst [vmem:[#allocation1] ss:$2 sm:$0xff] %v6678_v10  ;;  %4675 = vrot.lane.b32.xlu0 %v4674_v41, %s7256_s21  ;;  %v2278_v12 = vpop.f32.mrf.mxu2  ;;  %v2844_v14 = vpop.f32.mrf.mxu3 }
 0x7b0   : > { %v2281_v19 = vadd.f32 %v2278_v12, %v2251_v61 }
 0x7b1   : > { %v4528_v6 = vpop.permute.xlu0 %4527 }
 0x7b2   : > { %v4572_v23 = vpop.permute.xlu2 %4571  ;;  %v2314_v18 = vadd.f32 %v2311_v22, %v2281_v19 }
 0x7b3   : > { %v2918_v9 = vpop.f32.mrf.mxu1 }
 0x7b4   : > { %v2347_v60 = vadd.f32 %v2344_v58, %v2314_v18 }
 0x7b6   : > { %v4789_v37 = vld.sshfl [vmem:[#allocation1] sm:$0xff pattern:$0x75316420]  ;;  %v4790_v48 = vld.sshfl [vmem:[#allocation1 + $0x8] sm:$0xff pattern:$0x75316420]  ;;  %v2380_v5 = vadd.f32 %v2377_v3, %v2347_v60 }
 0x7b7   : > { %4791 = vrot.lane.b32.xlu1 %v4789_v37, %s7082_s9  ;;  %4786 = vrot.lane.b32.xlu0 %v4785_v56, %s7257_s1  ;;  %v2410_v21 = vpop.f32.mrf.mxu2  ;;  %v2992_v4 = vpop.f32.mrf.mxu3 }
 0x7b8   : > { %4793 = vrot.lane.b32.xlu2 %v4790_v48, %s7082_s9  ;;  %v2413_v26 = vadd.f32 %v2410_v21, %v2380_v5  ;;  %s7258_s9 = sld [smem:[#allocation2_spill]] }
 0x7b9   : > { %v4535_v59 = vpop.permute.xlu1 %4534  ;;  %v4533_v44 = vpop.permute.xlu0 %4532 }
 0x7ba   : > { %v4536_v10 = vsel %vm1103_vm4, %v4533_v44, %v4535_v59  ;;  %v2446_v38 = vadd.f32 %v2443_v29, %v2413_v26  ;;  %v4602_v15 = vpop.permute.xlu2 %4601 }
 0x7bb   : > { %5313 = vmatpush.msk.msrb.mxu1 %vm545_vm0, %v4536_v10  ;;  %v3066_v18 = vpop.f32.mrf.mxu1 }
 0x7bc   : > { %5314 = vmatmul.msk.f32.vlgmr.msrb.gmra.mxu1 %vm542_vm1, %v4528_v6  ;;  %v2479_v40 = vadd.f32 %v2476_v17, %v2446_v38 }
 0x7be   : > { %v2512_v30 = vadd.f32 %v2509_v27, %v2479_v40  ;;  %p511_p11 = scmp.lt.s32.totalorder %s7258_s9, 7 }
 0x7bf   : > { %v2542_v11 = vpop.f32.mrf.mxu2  ;;  %v3133_v3 = vpop.f32.mrf.mxu3 }
 0x7c0   : > { %v2545_v2 = vadd.f32 %v2542_v11, %v2512_v30  ;;  %s7285_s9 = smov (!%p511_p11, %s7258_s9), 7 }
 0x7c1   : > { %s514_s28 = sadd.s32 %s5075_s6, %s7285_s9 }
 0x7c2   : > { %v2578_v63 = vadd.f32 %v2575_v28, %v2545_v2  ;;  %s5076_s23 = sshll.u32 %s514_s28, 2 }
 0x7c3   : > { %s516_s8 = scalar_lea.vmem %s7261_s16, %s5076_s23  ;;  %s524_s27 = scalar_lea.vmem %s7262_s7, %s5076_s23 }
 0x7c4   : > { %v2611_v51 = vadd.f32 %v2608_v31, %v2578_v63 }
 0x7c6   : > { %v2644_v20 = vadd.f32 %v2641_v52, %v2611_v51 }
 0x7c7   : > { %v2674_v24 = vpop.f32.mrf.mxu2  ;;  %v3265_v27 = vpop.f32.mrf.mxu3 }
 0x7c8   : > { %v2677_v54 = vadd.f32 %v2674_v24, %v2644_v20 }
 0x7c9   : > { %v4570_v49 = vpop.permute.xlu1 %4569  ;;  %v4639_v25 = vpop.permute.xlu2 %4638 }
 0x7ca   : > { %v4573_v41 = vsel %vm1141_vm3, %v4570_v49, %v4572_v23  ;;  %v2710_v32 = vadd.f32 %v2707_v8, %v2677_v54 }
 0x7cb   : > { %5315 = vmatpush.msk.msrb.mxu2 %vm545_vm0, %v4573_v41 }
 0x7cc   : > { %5316 = vmatmul.msk.f32.vlgmr.msrb.gmra.mxu2 %vm542_vm1, %v4565_v13  ;;  %v2740_v47 = vadd.f32 %v2737_v34, %v2710_v32  ;;  %v3029_v13 = vpop.f32.mrf.mxu0 }
 0x7ce   : > { %v2773_v55 = vadd.f32 %v2770_v45, %v2740_v47 }
 0x7cf   : > { %v2807_v56 = vpop.f32.mrf.mxu2 }
 0x7d0   : > { %v2810_v1 = vadd.f32 %v2807_v56, %v2773_v55 }
 0x7d2   : > { %v2847_v16 = vadd.f32 %v2844_v14, %v2810_v1 }
 0x7d4   : > { %v2884_v50 = vadd.f32 %v2881_v33, %v2847_v16  ;;  %v3166_v26 = vpop.f32.mrf.mxu0 }
 0x7d6   : > { %v2921_v59 = vadd.f32 %v2918_v9, %v2884_v50 }
 0x7d7   : > { %v2955_v44 = vpop.f32.mrf.mxu2 }
 0x7d8   : > { %v2958_v10 = vadd.f32 %v2955_v44, %v2921_v59 }
 0x7d9   : > { %v4609_v0 = vpop.permute.xlu1 %4608  ;;  %v4607_v62 = vpop.permute.xlu0 %4606 }
 0x7da   : > { %v4610_v57 = vsel %vm1179_vm5, %v4607_v62, %v4609_v0  ;;  %v2995_v7 = vadd.f32 %v2992_v4, %v2958_v10  ;;  %v3199_v0 = vpop.f32.mrf.mxu1 }
 0x7db   : > { %5317 = vmatpush.msk.msrb.mxu3 %vm545_vm0, %v4610_v57 }
 0x7dc   : > { %5318 = vmatmul.msk.f32.vlgmr.msrb.gmra.mxu3 %vm542_vm1, %v4602_v15  ;;  %v3032_v23 = vadd.f32 %v3029_v13, %v2995_v7  ;;  %v3298_v11 = vpop.f32.mrf.mxu0 }
 0x7de   : > { %v3069_v58 = vadd.f32 %v3066_v18, %v3032_v23 }
 0x7df   : > { %v3103_v49 = vpop.f32.mrf.mxu2 }
 0x7e0   : > { %v3106_v60 = vadd.f32 %v3103_v49, %v3069_v58 }
 0x7e2   : > { %v3136_v21 = vadd.f32 %v3133_v3, %v3106_v60  ;;  %v3331_v28 = vpop.f32.mrf.mxu1 }
 0x7e4   : > { %v3169_v15 = vadd.f32 %v3166_v26, %v3136_v21 }
 0x7e6   : > { %v3202_v62 = vadd.f32 %v3199_v0, %v3169_v15 }
 0x7e7   : > { %v3232_v57 = vpop.f32.mrf.mxu2 }
 0x7e8   : > { %v3235_v40 = vadd.f32 %v3232_v57, %v3202_v62 }
 0x7e9   : > { %v4646_v39 = vpop.permute.xlu1 %4645  ;;  %v4644_v35 = vpop.permute.xlu0 %4643 }
 0x7ea   : > { %v4647_v36 = vsel %vm1217_vm6, %v4644_v35, %v4646_v39  ;;  %v4713_v53 = vpop.permute.xlu2 %4712  ;;  %v3268_v30 = vadd.f32 %v3265_v27, %v3235_v40  ;;  %v3397_v39 = vpop.f32.mrf.mxu3 }
 0x7eb   : > { %5319 = vmatpush.msk.msra.mxu0 %vm545_vm0, %v4647_v36  ;;  %v3430_v36 = vpop.f32.mrf.mxu0  ;;  %v3463_v52 = vpop.f32.mrf.mxu1 }
 0x7ec   : > { %5320 = vmatmul.msk.f32.vlgmr.msra.gmra.mxu0 %vm542_vm1, %v4639_v25  ;;  %v3301_v2 = vadd.f32 %v3298_v11, %v3268_v30 }
 0x7ee   : > { %v3334_v63 = vadd.f32 %v3331_v28, %v3301_v2 }
 0x7ef   : > { %v3364_v31 = vpop.f32.mrf.mxu2 }
 0x7f0   : > { %v3367_v25 = vadd.f32 %v3364_v31, %v3334_v63 }
 0x7f2   : > { %v4720_v6 = vpop.permute.xlu2 %4719  ;;  %v3400_v35 = vadd.f32 %v3397_v39, %v3367_v25  ;;  %v3529_v8 = vpop.f32.mrf.mxu3 }
 0x7f3   : > { %v3562_v32 = vpop.f32.mrf.mxu0 }
 0x7f4   : > { %v3433_v51 = vadd.f32 %v3430_v36, %v3400_v35 }
 0x7f6   : > { %v3466_v20 = vadd.f32 %v3463_v52, %v3433_v51 }
 0x7f7   : > { %v3496_v24 = vpop.f32.mrf.mxu2 }
 0x7f8   : > { %v3499_v54 = vadd.f32 %v3496_v24, %v3466_v20 }
 0x7f9   : > { %v4683_v42 = vpop.permute.xlu1 %4682  ;;  %v4681_v43 = vpop.permute.xlu0 %4680 }
 0x7fa   : > { %v4684_v46 = vsel %vm1255_vm8, %v4681_v43, %v4683_v42  ;;  %v4750_v61 = vpop.permute.xlu2 %4749  ;;  %v3532_v34 = vadd.f32 %v3529_v8, %v3499_v54  ;;  %v3595_v42 = vpop.f32.mrf.mxu1 }
 0x7fb   : > { %5321 = vmatpush.msk.msra.mxu1 %vm545_vm0, %v4684_v46  ;;  %v3665_v45 = vpop.f32.mrf.mxu3  ;;  %v3702_v55 = vpop.f32.mrf.mxu0 }
 0x7fc   : > { %v3565_v43 = vadd.f32 %v3562_v32, %v3532_v34 }
 0x7fe   : > { %v3598_v47 = vadd.f32 %v3595_v42, %v3565_v43 }
 0x7ff   : > { %v3628_v46 = vpop.f32.mrf.mxu2 }
 0x802   : > { %v3739_v1 = vpop.f32.mrf.mxu1 }
 0x803   : > { %v3813_v33 = vpop.f32.mrf.mxu3 }
 0x809   : > { %v4718_v37 = vpop.permute.xlu1 %4717 }
 0x80a   : > { %v4721_v48 = vsel %vm1293_vm7, %v4718_v37, %v4720_v6  ;;  %v3776_v6 = vpop.f32.mrf.mxu2  ;;  %v3885_v9 = vpop.f32.mrf.mxu1 }
 0x80b   : > { %5323 = vmatpush.msk.msra.mxu2 %vm545_vm0, %v4721_v48  ;;  %v3848_v48 = vpop.f32.mrf.mxu0  ;;  %v3959_v4 = vpop.f32.mrf.mxu3 }
 0x80c   : > { %5324 = vmatmul.msk.f32.vlgmr.msra.gmra.mxu2 %vm542_vm1, %v4713_v53  ;;  %v3631_v53 = vadd.f32 %v3628_v46, %v3598_v47 }
 0x80e   : > { %v3668_v56 = vadd.f32 %v3665_v45, %v3631_v53 }
 0x810   : > { %v3705_v14 = vadd.f32 %v3702_v55, %v3668_v56  ;;  %v5418_v56 = vld [vmem:[%s7260_s4] ss:$0 sm:$0xff] }
 0x812   : > { %v4794_v5 = vpop.permute.xlu2 %4793  ;;  %v3742_v16 = vadd.f32 %v3739_v1, %v3705_v14  ;;  %v3922_v44 = vpop.f32.mrf.mxu2 }
 0x813   : > { %v4088_v18 = vpop.f32.mrf.mxu3 }
 0x814   : > { %v3779_v37 = vadd.f32 %v3776_v6, %v3742_v16 }
 0x816   : > { %v3816_v50 = vadd.f32 %v3813_v33, %v3779_v37 }
 0x818   : > { %v3851_v59 = vadd.f32 %v3848_v48, %v3816_v50 }
 0x819   : > { %v4755_v12 = vpop.permute.xlu0 %4754  ;;  %v4757_v19 = vpop.permute.xlu1 %4756 }
 0x81a   : > { %v4758_v22 = vsel %vm1331_vm9, %v4755_v12, %v4757_v19  ;;  %v3888_v10 = vadd.f32 %v3885_v9, %v3851_v59  ;;  %v4022_v12 = vpop.f32.mrf.mxu1 }
 0x81b   : > { %5325 = vmatpush.msk.msra.mxu3 %vm545_vm0, %v4758_v22  ;;  %v4055_v22 = vpop.f32.mrf.mxu2  ;;  %v4220_v26 = vpop.f32.mrf.mxu3 }
 0x81c   : > { %5326 = vmatmul.msk.f32.vlgmr.msra.gmra.mxu3 %vm542_vm1, %v4750_v61  ;;  %v3925_v7 = vadd.f32 %v3922_v44, %v3888_v10  ;;  %v3989_v61 = vpop.f32.mrf.mxu0 }
 0x81e   : > { %v3962_v13 = vadd.f32 %v3959_v4, %v3925_v7 }
 0x820   : > { %v3992_v19 = vadd.f32 %v3989_v61, %v3962_v13 }
 0x821   : > { %v4676_v41 = vpop.permute.xlu0 %4675 }
 0x822   : > { %5322 = vmatmul.msk.f32.vlgmr.msra.gmra.mxu1 %vm542_vm1, %v4676_v41  ;;  %v4025_v23 = vadd.f32 %v4022_v12, %v3992_v19  ;;  %v4154_v60 = vpop.f32.mrf.mxu1 }
 0x823   : > { %v4352_v40 = vpop.f32.mrf.mxu3 }
 0x824   : > { %v4058_v58 = vadd.f32 %v4055_v22, %v4025_v23  ;;  %v4121_v49 = vpop.f32.mrf.mxu0 }
 0x826   : > { %v4091_v41 = vadd.f32 %v4088_v18, %v4058_v58 }
 0x828   : > { %v4124_v3 = vadd.f32 %v4121_v49, %v4091_v41 }
 0x829   : > { %v4792_v29 = vpop.permute.xlu1 %4791  ;;  %v4787_v17 = vpop.permute.xlu0 %4786 }
 0x82a   : > { %v4795_v38 = vsel %vm1369_vm10, %v4792_v29, %v4794_v5  ;;  %v4187_v5 = vpop.f32.mrf.mxu2  ;;  %v4157_v21 = vadd.f32 %v4154_v60, %v4124_v3  ;;  %v4286_v15 = vpop.f32.mrf.mxu1 }
 0x82b   : > { %5327 = vmatpush.msk.msrb.mxu0 %vm545_vm0, %v4795_v38  ;;  %v4484_v25 = vpop.f32.mrf.mxu3 }
 0x82c   : > { %5328 = vmatmul.msk.f32.vlgmr.msrb.gmra.mxu0 %vm542_vm1, %v4787_v17  ;;  %v4190_v29 = vadd.f32 %v4187_v5, %v4157_v21  ;;  %v4253_v17 = vpop.f32.mrf.mxu0 }
 0x82e   : > { %v4223_v38 = vadd.f32 %v4220_v26, %v4190_v29 }
 0x830   : > { %v4256_v0 = vadd.f32 %v4253_v17, %v4223_v38 }
 0x832   : > { %v4319_v62 = vpop.f32.mrf.mxu2  ;;  %v4289_v57 = vadd.f32 %v4286_v15, %v4256_v0  ;;  %v4418_v2 = vpop.f32.mrf.mxu1 }
 0x834   : > { %v4322_v27 = vadd.f32 %v4319_v62, %v4289_v57  ;;  %v4385_v30 = vpop.f32.mrf.mxu0 }
 0x836   : > { %v4355_v11 = vadd.f32 %v4352_v40, %v4322_v27 }
 0x838   : > { %v4388_v28 = vadd.f32 %v4385_v30, %v4355_v11 }
 0x83a   : > { %v4451_v63 = vpop.f32.mrf.mxu2  ;;  %v4421_v31 = vadd.f32 %v4418_v2, %v4388_v28  ;;  %v4558_v51 = vpop.f32.mrf.mxu1 }
 0x83c   : > { %v4454_v39 = vadd.f32 %v4451_v63, %v4421_v31  ;;  %v4521_v35 = vpop.f32.mrf.mxu0 }
 0x83e   : > { %v4487_v36 = vadd.f32 %v4484_v25, %v4454_v39 }
 0x840   : > { %v4524_v52 = vadd.f32 %v4521_v35, %v4487_v36 }
 0x842   : > { %v4561_v24 = vadd.f32 %v4558_v51, %v4524_v52 }
 0x84f   : > { %v4595_v20 = vpop.f32.mrf.mxu2 }
 0x850   : > { %v4598_v8 = vadd.f32 %v4595_v20, %v4561_v24 }
 0x85f   : > { %v4632_v54 = vpop.f32.mrf.mxu3 }
 0x860   : > { %v4635_v34 = vadd.f32 %v4632_v54, %v4598_v8 }
 0x869   : > { %v4669_v32 = vpop.f32.mrf.mxu0 }
 0x86a   : > { %v4672_v42 = vadd.f32 %v4669_v32, %v4635_v34 }
 0x88f   : > { %v4743_v47 = vpop.f32.mrf.mxu2 }
 0x89f   : > { %v4706_v43 = vpop.f32.mrf.mxu1  ;;  %v4780_v53 = vpop.f32.mrf.mxu3 }
 0x8a0   : > { %v4709_v46 = vadd.f32 %v4706_v43, %v4672_v42 }
 0x8a2   : > { %v4746_v45 = vadd.f32 %v4743_v47, %v4709_v46 }
 0x8a4   : > { %v4783_v55 = vadd.f32 %v4780_v53, %v4746_v45 }
 0x8a9   : > { %v4817_v1 = vpop.f32.mrf.mxu0 }
 0x8aa   : > { %v4820_v14 = vadd.f32 %v4817_v1, %v4783_v55 }
 0x8ac   : > { %v4830_v6 = vmul.f32 %v4820_v14, %v4820_v14  ;;  %v4825_v16 = vmul.f32 %v5418_v56, %v4820_v14  ;;  %4839 = vst.msk [vmem:[%s516_s8] sm:$0xf] %vm4826_vm11, %v4820_v14 }
 0x8ae   : > { %v4827_v33 = vsel %vm4826_vm11, %v4825_v16, 0.0  ;;  %v4831_v37 = vmul.f32 %v5418_v56, %v4830_v6 }
 0x8af   : > { %4828 = vadd.xlane.f32.xlu1 %v4827_v33 }
 0x8b0   : > { %v4832_v48 = vsel %vm4826_vm11, %v4831_v37, 0.0 }
 0x8b1   : > { %4833 = vadd.xlane.f32.xlu2 %v4832_v48 }
 0x922   : > { %v4829_v50 = vpop.xlane.xlu1 %4828 }
 0x924   : > { %v4834_v9 = vpop.xlane.xlu2 %4833 }
 0x925   : > { %v4836_v59 = vsel %vm4835_vm12, %v4829_v50, %v4834_v9 }
 0x926   : > { %4838 = vst.msk [vmem:[%s524_s27] sm:$0xf] %vm4837_vm13, %v4836_v59 }
 0x927 PF: > { %s7263_s30 = sld [smem:[#allocation5_spill]] }
 0x928   : > { %s7264_s27 = sld [smem:[#allocation3_spill]] }
 0x929   : > { %s7265_s28 = sld [smem:[#allocation4_spill]] }
 0x92a   : > { %s7266_s29 = sld [smem:[#allocation6_spill]] }
 0x92d   : > { %s19_s9 = sadd.s32 1, %s7263_s30   ;;  %s7267_s30 = sld [smem:[#allocation7_spill]] }
 0x92e   : > { %p16_p12 = scmp.ge.s32.totalorder %s19_s9, 18  }
 0x930   :  { %18 = sbr.rel (!%p16_p12) target bundleno = 10 (0xa), region = 102 }

</bundles_post_ra>
